<compile_context>
chip_gen: v5e
topology: v5e:2x2
jax: 0.10.0
libtpu: 0.0.40
codegen_flags: <defaults>
</compile_context>

<pallas_src>
import functools

import jax
import jax.numpy as jnp
from jax.experimental import pallas as pl
from jax.experimental.pallas import tpu as pltpu

EPS = 1e-5
LANES = 128


# ----------------------------------------------------------------------------
# Fused kernel
# ----------------------------------------------------------------------------
def _make_fused_kernel(*, N, Ph, Pw, Ho, Wo, stride, has_proj, eps=EPS):
    """Fused ResidualBlock over a flattened [N*Ph*Pw, C] grid.

    Valid outputs live at the top-left Ho x Wo corner of each image's Ph x Pw
    block; the remaining rows are masked garbage the wrapper slices away.  The
    masked rows double as conv2's zero-padding ring (flattened-index trick).
    """
    R = N * Ph * Pw
    G = Pw + 1                         # guard rows for conv2's negative shifts
    inv_cnt = 1.0 / float(N * Ho * Wo)

    def stats(y, m):
        # single-pass masked batch statistics (biased variance), per channel
        s = jnp.sum(y * m, axis=0, keepdims=True)
        ss = jnp.sum(y * y * m, axis=0, keepdims=True)
        mu = s * inv_cnt
        var = ss * inv_cnt - mu * mu
        return mu, jax.lax.rsqrt(var + eps)

    def body(planes_ref, mask_ref, w1_ref, w2_ref, bn_ref, ws_ref, out_ref, a1x_ref):
        C = out_ref.shape[-1]
        m = mask_ref[...]                                        # [R, 1] f32

        # ---- conv1: 3x3 / stride s as 9 shifted bf16 matmuls ----
        y1 = jnp.zeros((R, C), jnp.float32)
        for kh in range(3):
            for kw in range(3):
                p = (kh % stride) * stride + (kw % stride)       # parity plane
                off = (kh // stride) * Pw + (kw // stride)       # row shift
                xs = planes_ref[p, off:off + R, :].astype(jnp.bfloat16)
                y1 = y1 + jnp.dot(xs, w1_ref[kh * 3 + kw],
                                  preferred_element_type=jnp.float32)

        # ---- bn1 (training-mode batch stats) + relu  (conv bias cancelled by BN)
        mu1, rs1 = stats(y1, m)
        a1 = jnp.maximum((y1 - mu1) * rs1 * bn_ref[0:1, :] + bn_ref[1:2, :], 0.0) * m

        # masked a1 on the same flat grid *is* conv2's zero-padded input
        a1x_ref[0:G, :] = jnp.zeros((G, C), jnp.float32)
        a1x_ref[G + R:G + R + G, :] = jnp.zeros((G, C), jnp.float32)
        a1x_ref[G:G + R, :] = a1

        # ---- conv2: 3x3 / stride 1 / pad 1 over the VMEM-resident activation ----
        y2 = jnp.zeros((R, C), jnp.float32)
        for kh in range(3):
            for kw in range(3):
                off = G + (kh - 1) * Pw + (kw - 1)
                xs = a1x_ref[off:off + R, :].astype(jnp.bfloat16)
                y2 = y2 + jnp.dot(xs, w2_ref[kh * 3 + kw],
                                  preferred_element_type=jnp.float32)
        mu2, rs2 = stats(y2, m)
        z = (y2 - mu2) * rs2 * bn_ref[2:3, :] + bn_ref[3:4, :]

        # ---- shortcut ----
        if has_proj:
            # 1x1 conv, stride s == one matmul over the (1,1)-parity plane
            pp, sh = (0, Pw + 1) if stride == 1 else (stride * stride - 1, 0)
            xsc = planes_ref[pp, sh:sh + R, :].astype(jnp.bfloat16)
            ysc = jnp.dot(xsc, ws_ref[...], preferred_element_type=jnp.float32)
            mus, rss = stats(ysc, m)
            sc = (ysc - mus) * rss * bn_ref[4:5, :] + bn_ref[5:6, :]
        else:
            # identity: the original f32 (channel-padded) input, realigned
            sc = planes_ref[0, Pw + 1:Pw + 1 + R, :]

        out_ref[...] = jnp.maximum(z + sc, 0.0)

    if has_proj:
        def kernel(planes_ref, mask_ref, w1_ref, w2_ref, bn_ref, ws_ref, out_ref, a1x_ref):
            body(planes_ref, mask_ref, w1_ref, w2_ref, bn_ref, ws_ref, out_ref, a1x_ref)
    else:
        def kernel(planes_ref, mask_ref, w1_ref, w2_ref, bn_ref, out_ref, a1x_ref):
            body(planes_ref, mask_ref, w1_ref, w2_ref, bn_ref, None, out_ref, a1x_ref)
    return kernel


# ----------------------------------------------------------------------------
# Wrapper (plain-JAX glue: padding / parity planes / weight re-layout only)
# ----------------------------------------------------------------------------
def _round_up(x, m):
    return (x + m - 1) // m * m


def _w3x3_to_taps(w, C):
    """PyTorch [Cout, Cin, 3, 3] -> [9, C, C] bf16, tap index = kh*3 + kw."""
    co, ci = w.shape[0], w.shape[1]
    wt = jnp.transpose(w, (2, 3, 1, 0))                          # [3,3,Cin,Cout]
    wt = jnp.pad(wt, ((0, 0), (0, 0), (0, C - ci), (0, C - co)))
    return wt.reshape(9, C, C).astype(jnp.bfloat16)


def _vec(v, C):
    return jnp.pad(v.astype(jnp.float32), (0, C - v.shape[0]))


@functools.partial(jax.jit, static_argnames=("stride",))
def residual_block_pallas(x_nchw, params, stride):
    assert stride in (1, 2)
    x = jnp.transpose(x_nchw, (0, 2, 3, 1)).astype(jnp.float32)  # NHWC
    N, H, W, Cin = x.shape
    Cout = params["w1"].shape[0]
    C = _round_up(max(Cin, Cout, LANES), LANES)                  # lane-dense channels
    has_proj = "ws" in params

    Ho = (H + 2 - 3) // stride + 1
    Wo = (W + 2 - 3) // stride + 1
    # flattened computation grid [N, Ph, Pw]; valid outputs at i<Ho, j<Wo
    Ph, Pw = (H + 2, W + 2) if stride == 1 else (Ho + 1, Wo + 1)
    R = N * Ph * Pw
    guard = 2 * Pw + 2                                           # max conv1 tap offset

    # channel-pad + spatial-pad once (~1.3x, instead of 9x im2col inflation)
    xp = jnp.pad(x, ((0, 0), (1, 1), (1, 1), (0, C - Cin)))
    if stride == 1:
        planes = xp.reshape(1, R, C)
    else:
        xp2 = jnp.pad(xp, ((0, 0), (0, stride), (0, stride), (0, 0)))
        planes = jnp.stack(
            [xp2[:, p::stride, q::stride, :][:, :Ph, :Pw, :].reshape(R, C)
             for p in range(stride) for q in range(stride)], axis=0)
    planes = jnp.pad(planes, ((0, 0), (0, guard), (0, 0)))       # zero guard rows

    mask = jnp.pad(jnp.ones((N, Ho, Wo, 1), jnp.float32),
                   ((0, 0), (0, Ph - Ho), (0, Pw - Wo), (0, 0))).reshape(R, 1)

    w1m = _w3x3_to_taps(params["w1"], C)
    w2m = _w3x3_to_taps(params["w2"], C)
    # NOTE: conv biases (b1/b2/bs) are intentionally not used: training-mode
    # BatchNorm subtracts the batch mean, which cancels a per-channel bias exactly.
    bn_rows = [params["g1"], params["be1"], params["g2"], params["be2"]]
    if has_proj:
        bn_rows += [params["gs"], params["bes"]]
    else:
        bn_rows += [jnp.zeros((Cout,), jnp.float32)] * 2
    bnp = jnp.stack([_vec(r, C) for r in bn_rows], axis=0)       # [6, C] f32

    args = [planes, mask, w1m, w2m, bnp]
    if has_proj:
        ws = params["ws"].reshape(Cout, Cin)
        wsm = jnp.pad(jnp.transpose(ws),
                      ((0, C - Cin), (0, C - Cout))).astype(jnp.bfloat16)
        args.append(wsm)

    kernel = _make_fused_kernel(N=N, Ph=Ph, Pw=Pw, Ho=Ho, Wo=Wo,
                                stride=stride, has_proj=has_proj)
    out = pl.pallas_call(
        kernel,
        out_shape=jax.ShapeDtypeStruct((R, C), jnp.float32),
        in_specs=[pl.BlockSpec(memory_space=pltpu.MemorySpace.VMEM)] * len(args),
        out_specs=pl.BlockSpec(memory_space=pltpu.MemorySpace.VMEM),
        scratch_shapes=[pltpu.VMEM((R + 2 * (Pw + 1), C), jnp.float32)],
    )(*args)

    out = out.reshape(N, Ph, Pw, C)[:, :Ho, :Wo, :Cout]
    return jnp.transpose(out, (0, 3, 1, 2))                      # -> NCHW


# ----------------------------------------------------------------------------
# References
# ----------------------------------------------------------------------------
def _conv_ref(x, w, b, stride, padding):
    y = jax.lax.conv_general_dilated(
        x, w, (stride, stride), [(padding, padding)] * 2,
        dimension_numbers=("NCHW", "OIHW", "NCHW"),
        precision=jax.lax.Precision.HIGHEST)
    return y + b[None, :, None, None]


def _bn_ref(x, g, be):
    mean = x.mean(axis=(0, 2, 3), keepdims=True)
    var = ((x - mean) ** 2).mean(axis=(0, 2, 3), keepdims=True)
    return g[None, :, None, None] * (x - mean) / jnp.sqrt(var + EPS) + be[None, :, None, None]


def residual_block_ref(x, params, stride):
    """Semantic reference: full f32, HIGHEST precision, conv biases included."""
    y = jnp.maximum(_bn_ref(_conv_ref(x, params["w1"], params["b1"], stride, 1),
                            params["g1"], params["be1"]), 0.0)
    y = _bn_ref(_conv_ref(y, params["w2"], params["b2"], 1, 1),
                params["g2"], params["be2"])
    if "ws" in params:
        sc = _bn_ref(_conv_ref(x, params["ws"], params["bs"], stride, 0),
                     params["gs"], params["bes"])
    else:
        sc = x
    return jnp.maximum(y + sc, 0.0)


def residual_block_bf16_ref(x, params, stride):
    """Structural reference: same pipeline as the kernel (bf16 matmul operands,
    f32 accumulation / BN, bias dropped)."""
    def conv(a, w, s, pad):
        return jax.lax.conv_general_dilated(
            a.astype(jnp.bfloat16), w.astype(jnp.bfloat16), (s, s),
            [(pad, pad)] * 2, dimension_numbers=("NCHW", "OIHW", "NCHW"),
            preferred_element_type=jnp.float32)

    def bn(y, g, b):
        mu = y.mean(axis=(0, 2, 3), keepdims=True)
        var = (y * y).mean(axis=(0, 2, 3), keepdims=True) - mu * mu
        return (g[None, :, None, None] * (y - mu) * jax.lax.rsqrt(var + EPS)
                + b[None, :, None, None])

    a1 = jnp.maximum(bn(conv(x, params["w1"], stride, 1), params["g1"], params["be1"]), 0.0)
    z = bn(conv(a1, params["w2"], 1, 1), params["g2"], params["be2"])
    if "ws" in params:
        sc = bn(conv(x, params["ws"], stride, 0), params["gs"], params["bes"])
    else:
        sc = x
    return jnp.maximum(z + sc, 0.0)


# ----------------------------------------------------------------------------
# Deterministic parameter init (shapes from the module's __init__)
# ----------------------------------------------------------------------------
def init_params(key, cin, cout, stride):
    ks = jax.random.split(key, 12)
    p = {
        "w1": 0.1 * jax.random.normal(ks[0], (cout, cin, 3, 3), jnp.float32),
        "b1": 0.1 * jax.random.normal(ks[1], (cout,), jnp.float32),
        "g1": 1.0 + 0.1 * jax.random.normal(ks[2], (cout,), jnp.float32),
        "be1": 0.1 * jax.random.normal(ks[3], (cout,), jnp.float32),
        "w2": 0.1 * jax.random.normal(ks[4], (cout, cout, 3, 3), jnp.float32),
        "b2": 0.1 * jax.random.normal(ks[5], (cout,), jnp.float32),
        "g2": 1.0 + 0.1 * jax.random.normal(ks[6], (cout,), jnp.float32),
        "be2": 0.1 * jax.random.normal(ks[7], (cout,), jnp.float32),
    }
    if stride != 1 or cin != cout:               # ShortcutProjection
        p["ws"] = 0.1 * jax.random.normal(ks[8], (cout, cin, 1, 1), jnp.float32)
        p["bs"] = 0.1 * jax.random.normal(ks[9], (cout,), jnp.float32)
        p["gs"] = 1.0 + 0.1 * jax.random.normal(ks[10], (cout,), jnp.float32)
        p["bes"] = 0.1 * jax.random.normal(ks[11], (cout,), jnp.float32)
    return p


if __name__ == "__main__":
    key = jax.random.PRNGKey(0)
    kx1, kx2, kp1, kp2 = jax.random.split(key, 4)

    # Case 1: stride=2, channel change -> ShortcutProjection path.
    x1 = jax.random.normal(kx1, (2, 4, 16, 16), jnp.float32)
    params1 = init_params(kp1, 4, 8, 2)
    out1 = residual_block_pallas(x1, params1, 2)

    # Case 2: stride=1, same channels -> identity shortcut.
    x2 = jax.random.normal(kx2, (2, 8, 16, 16), jnp.float32)
    params2 = init_params(kp2, 8, 8, 1)
    out2 = residual_block_pallas(x2, params2, 1)

    jax.block_until_ready((out1, out2))
    assert out1.shape == (2, 8, 8, 8), out1.shape
    assert out2.shape == (2, 8, 16, 16), out2.shape

    # Tight structural check: identical bf16-operand pipeline computed by XLA.
    s1 = residual_block_bf16_ref(x1, params1, 2)
    s2 = residual_block_bf16_ref(x2, params2, 1)
    assert jnp.allclose(out1, s1, rtol=3e-3, atol=3e-3), float(jnp.max(jnp.abs(out1 - s1)))
    assert jnp.allclose(out2, s2, rtol=3e-3, atol=3e-3), float(jnp.max(jnp.abs(out2 - s2)))

    # Semantic check vs the full-f32 HIGHEST reference (with conv biases);
    # looser tolerance only reflects bf16 MXU operands in the kernel.
    r1 = residual_block_ref(x1, params1, 2)
    r2 = residual_block_ref(x2, params2, 1)
    assert jnp.allclose(out1, r1, rtol=5e-2, atol=5e-2), float(jnp.max(jnp.abs(out1 - r1)))
    assert jnp.allclose(out2, r2, rtol=5e-2, atol=5e-2), float(jnp.max(jnp.abs(out2 - r2)))

    print("KERNEL_OK")
</pallas_src>

<mosaic_0001>
module attributes {stable_mosaic.version = 11 : i64} {
  func.func @kernel(%arg0: memref<4x182x128xf32, #tpu.memory_space<vmem>>, %arg1: memref<162x1xf32, #tpu.memory_space<vmem>>, %arg2: memref<9x128x128xbf16, #tpu.memory_space<vmem>>, %arg3: memref<9x128x128xbf16, #tpu.memory_space<vmem>>, %arg4: memref<6x128xf32, #tpu.memory_space<vmem>>, %arg5: memref<128x128xbf16, #tpu.memory_space<vmem>>, %arg6: memref<162x128xf32, #tpu.memory_space<vmem>>, %arg7: memref<182x128xf32, #tpu.memory_space<vmem>>) attributes {dimension_semantics = [], scalar_prefetch = 0 : i64, scratch_operands = 1 : i64, tpu.core_type = #tpu.core_type<tc>} {
    %c0 = arith.constant 0 : index
    %c0_0 = arith.constant 0 : index
    %0 = vector.load %arg1[%c0, %c0_0] : memref<162x1xf32, #tpu.memory_space<vmem>>, vector<162x1xf32>
    %cst = arith.constant 0.000000e+00 : f32
    %1 = vector.broadcast %cst : f32 to vector<162x128xf32>
    %c0_1 = arith.constant 0 : index
    %c0_2 = arith.constant 0 : index
    %c0_3 = arith.constant 0 : index
    %2 = vector.load %arg0[%c0_1, %c0_2, %c0_3] : memref<4x182x128xf32, #tpu.memory_space<vmem>>, vector<1x162x128xf32>
    %3 = vector.shape_cast %2 : vector<1x162x128xf32> to vector<162x128xf32>
    %4 = arith.truncf %3 : vector<162x128xf32> to vector<162x128xbf16>
    %c0_4 = arith.constant 0 : index
    %c0_5 = arith.constant 0 : index
    %c0_6 = arith.constant 0 : index
    %5 = vector.load %arg2[%c0_4, %c0_5, %c0_6] : memref<9x128x128xbf16, #tpu.memory_space<vmem>>, vector<1x128x128xbf16>
    %6 = vector.shape_cast %5 : vector<1x128x128xbf16> to vector<128x128xbf16>
    %cst_7 = arith.constant dense<0.000000e+00> : vector<162x128xf32>
    %7 = tpu.matmul %4, %6, %cst_7 {dimension_numbers = #tpu.dot_dimension_numbers<[1], [0], [0], [1], [0, 0, 1, 1], [], []>} : vector<162x128xbf16>, vector<128x128xbf16>, vector<162x128xf32> -> vector<162x128xf32>
    %8 = arith.addf %1, %7 : vector<162x128xf32>
    %c1 = arith.constant 1 : index
    %c0_8 = arith.constant 0 : index
    %c0_9 = arith.constant 0 : index
    %9 = vector.load %arg0[%c1, %c0_8, %c0_9] : memref<4x182x128xf32, #tpu.memory_space<vmem>>, vector<1x162x128xf32>
    %10 = vector.shape_cast %9 : vector<1x162x128xf32> to vector<162x128xf32>
    %11 = arith.truncf %10 : vector<162x128xf32> to vector<162x128xbf16>
    %c1_10 = arith.constant 1 : index
    %c0_11 = arith.constant 0 : index
    %c0_12 = arith.constant 0 : index
    %12 = vector.load %arg2[%c1_10, %c0_11, %c0_12] : memref<9x128x128xbf16, #tpu.memory_space<vmem>>, vector<1x128x128xbf16>
    %13 = vector.shape_cast %12 : vector<1x128x128xbf16> to vector<128x128xbf16>
    %cst_13 = arith.constant dense<0.000000e+00> : vector<162x128xf32>
    %14 = tpu.matmul %11, %13, %cst_13 {dimension_numbers = #tpu.dot_dimension_numbers<[1], [0], [0], [1], [0, 0, 1, 1], [], []>} : vector<162x128xbf16>, vector<128x128xbf16>, vector<162x128xf32> -> vector<162x128xf32>
    %15 = arith.addf %8, %14 : vector<162x128xf32>
    %c0_14 = arith.constant 0 : index
    %c1_15 = arith.constant 1 : index
    %c0_16 = arith.constant 0 : index
    %16 = vector.load %arg0[%c0_14, %c1_15, %c0_16] : memref<4x182x128xf32, #tpu.memory_space<vmem>>, vector<1x162x128xf32>
    %17 = vector.shape_cast %16 : vector<1x162x128xf32> to vector<162x128xf32>
    %18 = arith.truncf %17 : vector<162x128xf32> to vector<162x128xbf16>
    %c2 = arith.constant 2 : index
    %c0_17 = arith.constant 0 : index
    %c0_18 = arith.constant 0 : index
    %19 = vector.load %arg2[%c2, %c0_17, %c0_18] : memref<9x128x128xbf16, #tpu.memory_space<vmem>>, vector<1x128x128xbf16>
    %20 = vector.shape_cast %19 : vector<1x128x128xbf16> to vector<128x128xbf16>
    %cst_19 = arith.constant dense<0.000000e+00> : vector<162x128xf32>
    %21 = tpu.matmul %18, %20, %cst_19 {dimension_numbers = #tpu.dot_dimension_numbers<[1], [0], [0], [1], [0, 0, 1, 1], [], []>} : vector<162x128xbf16>, vector<128x128xbf16>, vector<162x128xf32> -> vector<162x128xf32>
    %22 = arith.addf %15, %21 : vector<162x128xf32>
    %c2_20 = arith.constant 2 : index
    %c0_21 = arith.constant 0 : index
    %c0_22 = arith.constant 0 : index
    %23 = vector.load %arg0[%c2_20, %c0_21, %c0_22] : memref<4x182x128xf32, #tpu.memory_space<vmem>>, vector<1x162x128xf32>
    %24 = vector.shape_cast %23 : vector<1x162x128xf32> to vector<162x128xf32>
    %25 = arith.truncf %24 : vector<162x128xf32> to vector<162x128xbf16>
    %c3 = arith.constant 3 : index
    %c0_23 = arith.constant 0 : index
    %c0_24 = arith.constant 0 : index
    %26 = vector.load %arg2[%c3, %c0_23, %c0_24] : memref<9x128x128xbf16, #tpu.memory_space<vmem>>, vector<1x128x128xbf16>
    %27 = vector.shape_cast %26 : vector<1x128x128xbf16> to vector<128x128xbf16>
    %cst_25 = arith.constant dense<0.000000e+00> : vector<162x128xf32>
    %28 = tpu.matmul %25, %27, %cst_25 {dimension_numbers = #tpu.dot_dimension_numbers<[1], [0], [0], [1], [0, 0, 1, 1], [], []>} : vector<162x128xbf16>, vector<128x128xbf16>, vector<162x128xf32> -> vector<162x128xf32>
    %29 = arith.addf %22, %28 : vector<162x128xf32>
    %c3_26 = arith.constant 3 : index
    %c0_27 = arith.constant 0 : index
    %c0_28 = arith.constant 0 : index
    %30 = vector.load %arg0[%c3_26, %c0_27, %c0_28] : memref<4x182x128xf32, #tpu.memory_space<vmem>>, vector<1x162x128xf32>
    %31 = vector.shape_cast %30 : vector<1x162x128xf32> to vector<162x128xf32>
    %32 = arith.truncf %31 : vector<162x128xf32> to vector<162x128xbf16>
    %c4 = arith.constant 4 : index
    %c0_29 = arith.constant 0 : index
    %c0_30 = arith.constant 0 : index
    %33 = vector.load %arg2[%c4, %c0_29, %c0_30] : memref<9x128x128xbf16, #tpu.memory_space<vmem>>, vector<1x128x128xbf16>
    %34 = vector.shape_cast %33 : vector<1x128x128xbf16> to vector<128x128xbf16>
    %cst_31 = arith.constant dense<0.000000e+00> : vector<162x128xf32>
    %35 = tpu.matmul %32, %34, %cst_31 {dimension_numbers = #tpu.dot_dimension_numbers<[1], [0], [0], [1], [0, 0, 1, 1], [], []>} : vector<162x128xbf16>, vector<128x128xbf16>, vector<162x128xf32> -> vector<162x128xf32>
    %36 = arith.addf %29, %35 : vector<162x128xf32>
    %c2_32 = arith.constant 2 : index
    %c1_33 = arith.constant 1 : index
    %c0_34 = arith.constant 0 : index
    %37 = vector.load %arg0[%c2_32, %c1_33, %c0_34] : memref<4x182x128xf32, #tpu.memory_space<vmem>>, vector<1x162x128xf32>
    %38 = vector.shape_cast %37 : vector<1x162x128xf32> to vector<162x128xf32>
    %39 = arith.truncf %38 : vector<162x128xf32> to vector<162x128xbf16>
    %c5 = arith.constant 5 : index
    %c0_35 = arith.constant 0 : index
    %c0_36 = arith.constant 0 : index
    %40 = vector.load %arg2[%c5, %c0_35, %c0_36] : memref<9x128x128xbf16, #tpu.memory_space<vmem>>, vector<1x128x128xbf16>
    %41 = vector.shape_cast %40 : vector<1x128x128xbf16> to vector<128x128xbf16>
    %cst_37 = arith.constant dense<0.000000e+00> : vector<162x128xf32>
    %42 = tpu.matmul %39, %41, %cst_37 {dimension_numbers = #tpu.dot_dimension_numbers<[1], [0], [0], [1], [0, 0, 1, 1], [], []>} : vector<162x128xbf16>, vector<128x128xbf16>, vector<162x128xf32> -> vector<162x128xf32>
    %43 = arith.addf %36, %42 : vector<162x128xf32>
    %c0_38 = arith.constant 0 : index
    %c9 = arith.constant 9 : index
    %c0_39 = arith.constant 0 : index
    %44 = vector.load %arg0[%c0_38, %c9, %c0_39] : memref<4x182x128xf32, #tpu.memory_space<vmem>>, vector<1x162x128xf32>
    %45 = vector.shape_cast %44 : vector<1x162x128xf32> to vector<162x128xf32>
    %46 = arith.truncf %45 : vector<162x128xf32> to vector<162x128xbf16>
    %c6 = arith.constant 6 : index
    %c0_40 = arith.constant 0 : index
    %c0_41 = arith.constant 0 : index
    %47 = vector.load %arg2[%c6, %c0_40, %c0_41] : memref<9x128x128xbf16, #tpu.memory_space<vmem>>, vector<1x128x128xbf16>
    %48 = vector.shape_cast %47 : vector<1x128x128xbf16> to vector<128x128xbf16>
    %cst_42 = arith.constant dense<0.000000e+00> : vector<162x128xf32>
    %49 = tpu.matmul %46, %48, %cst_42 {dimension_numbers = #tpu.dot_dimension_numbers<[1], [0], [0], [1], [0, 0, 1, 1], [], []>} : vector<162x128xbf16>, vector<128x128xbf16>, vector<162x128xf32> -> vector<162x128xf32>
    %50 = arith.addf %43, %49 : vector<162x128xf32>
    %c1_43 = arith.constant 1 : index
    %c9_44 = arith.constant 9 : index
    %c0_45 = arith.constant 0 : index
    %51 = vector.load %arg0[%c1_43, %c9_44, %c0_45] : memref<4x182x128xf32, #tpu.memory_space<vmem>>, vector<1x162x128xf32>
    %52 = vector.shape_cast %51 : vector<1x162x128xf32> to vector<162x128xf32>
    %53 = arith.truncf %52 : vector<162x128xf32> to vector<162x128xbf16>
    %c7 = arith.constant 7 : index
    %c0_46 = arith.constant 0 : index
    %c0_47 = arith.constant 0 : index
    %54 = vector.load %arg2[%c7, %c0_46, %c0_47] : memref<9x128x128xbf16, #tpu.memory_space<vmem>>, vector<1x128x128xbf16>
    %55 = vector.shape_cast %54 : vector<1x128x128xbf16> to vector<128x128xbf16>
    %cst_48 = arith.constant dense<0.000000e+00> : vector<162x128xf32>
    %56 = tpu.matmul %53, %55, %cst_48 {dimension_numbers = #tpu.dot_dimension_numbers<[1], [0], [0], [1], [0, 0, 1, 1], [], []>} : vector<162x128xbf16>, vector<128x128xbf16>, vector<162x128xf32> -> vector<162x128xf32>
    %57 = arith.addf %50, %56 : vector<162x128xf32>
    %c0_49 = arith.constant 0 : index
    %c10 = arith.constant 10 : index
    %c0_50 = arith.constant 0 : index
    %58 = vector.load %arg0[%c0_49, %c10, %c0_50] : memref<4x182x128xf32, #tpu.memory_space<vmem>>, vector<1x162x128xf32>
    %59 = vector.shape_cast %58 : vector<1x162x128xf32> to vector<162x128xf32>
    %60 = arith.truncf %59 : vector<162x128xf32> to vector<162x128xbf16>
    %c8 = arith.constant 8 : index
    %c0_51 = arith.constant 0 : index
    %c0_52 = arith.constant 0 : index
    %61 = vector.load %arg2[%c8, %c0_51, %c0_52] : memref<9x128x128xbf16, #tpu.memory_space<vmem>>, vector<1x128x128xbf16>
    %62 = vector.shape_cast %61 : vector<1x128x128xbf16> to vector<128x128xbf16>
    %cst_53 = arith.constant dense<0.000000e+00> : vector<162x128xf32>
    %63 = tpu.matmul %60, %62, %cst_53 {dimension_numbers = #tpu.dot_dimension_numbers<[1], [0], [0], [1], [0, 0, 1, 1], [], []>} : vector<162x128xbf16>, vector<128x128xbf16>, vector<162x128xf32> -> vector<162x128xf32>
    %64 = arith.addf %57, %63 : vector<162x128xf32>
    %65 = vector.broadcast %0 : vector<162x1xf32> to vector<162x128xf32>
    %66 = arith.mulf %64, %65 : vector<162x128xf32>
    %cst_54 = arith.constant dense<0.000000e+00> : vector<128xf32>
    %67 = vector.multi_reduction <add>, %66, %cst_54 [0] : vector<162x128xf32> to vector<128xf32>
    %68 = vector.shape_cast %67 : vector<128xf32> to vector<1x128xf32>
    %69 = arith.mulf %64, %64 : vector<162x128xf32>
    %70 = vector.broadcast %0 : vector<162x1xf32> to vector<162x128xf32>
    %71 = arith.mulf %69, %70 : vector<162x128xf32>
    %cst_55 = arith.constant dense<0.000000e+00> : vector<128xf32>
    %72 = vector.multi_reduction <add>, %71, %cst_55 [0] : vector<162x128xf32> to vector<128xf32>
    %73 = vector.shape_cast %72 : vector<128xf32> to vector<1x128xf32>
    %cst_56 = arith.constant 7.812500e-03 : f32
    %74 = vector.broadcast %cst_56 : f32 to vector<1x128xf32>
    %75 = arith.mulf %68, %74 : vector<1x128xf32>
    %cst_57 = arith.constant 7.812500e-03 : f32
    %76 = vector.broadcast %cst_57 : f32 to vector<1x128xf32>
    %77 = arith.mulf %73, %76 : vector<1x128xf32>
    %78 = arith.mulf %75, %75 : vector<1x128xf32>
    %79 = arith.subf %77, %78 : vector<1x128xf32>
    %cst_58 = arith.constant 9.99999974E-6 : f32
    %80 = vector.broadcast %cst_58 : f32 to vector<1x128xf32>
    %81 = arith.addf %79, %80 : vector<1x128xf32>
    %82 = math.rsqrt %81 : vector<1x128xf32>
    %83 = vector.broadcast %75 : vector<1x128xf32> to vector<162x128xf32>
    %84 = arith.subf %64, %83 : vector<162x128xf32>
    %85 = vector.broadcast %82 : vector<1x128xf32> to vector<162x128xf32>
    %86 = arith.mulf %84, %85 : vector<162x128xf32>
    %c0_59 = arith.constant 0 : index
    %c0_60 = arith.constant 0 : index
    %87 = vector.load %arg4[%c0_59, %c0_60] : memref<6x128xf32, #tpu.memory_space<vmem>>, vector<1x128xf32>
    %88 = vector.broadcast %87 : vector<1x128xf32> to vector<162x128xf32>
    %89 = arith.mulf %86, %88 : vector<162x128xf32>
    %c1_61 = arith.constant 1 : index
    %c0_62 = arith.constant 0 : index
    %90 = vector.load %arg4[%c1_61, %c0_62] : memref<6x128xf32, #tpu.memory_space<vmem>>, vector<1x128xf32>
    %91 = vector.broadcast %90 : vector<1x128xf32> to vector<162x128xf32>
    %92 = arith.addf %89, %91 : vector<162x128xf32>
    %cst_63 = arith.constant 0.000000e+00 : f32
    %93 = vector.broadcast %cst_63 : f32 to vector<162x128xf32>
    %94 = arith.maximumf %92, %93 : vector<162x128xf32>
    %95 = vector.broadcast %0 : vector<162x1xf32> to vector<162x128xf32>
    %96 = arith.mulf %94, %95 : vector<162x128xf32>
    %cst_64 = arith.constant 0.000000e+00 : f32
    %97 = vector.broadcast %cst_64 : f32 to vector<10x128xf32>
    %c0_65 = arith.constant 0 : index
    %c0_66 = arith.constant 0 : index
    %98 = vector.load %arg7[%c0_65, %c0_66] : memref<182x128xf32, #tpu.memory_space<vmem>>, vector<10x128xf32>
    tpu.vector_store %arg7[%c0_65, %c0_66], %97 {strides = array<i32>} : memref<182x128xf32, #tpu.memory_space<vmem>>, vector<10x128xf32>,
    %cst_67 = arith.constant 0.000000e+00 : f32
    %99 = vector.broadcast %cst_67 : f32 to vector<10x128xf32>
    %c172 = arith.constant 172 : index
    %c0_68 = arith.constant 0 : index
    %100 = vector.load %arg7[%c172, %c0_68] : memref<182x128xf32, #tpu.memory_space<vmem>>, vector<10x128xf32>
    tpu.vector_store %arg7[%c172, %c0_68], %99 {strides = array<i32>} : memref<182x128xf32, #tpu.memory_space<vmem>>, vector<10x128xf32>,
    %c10_69 = arith.constant 10 : index
    %c0_70 = arith.constant 0 : index
    %101 = vector.load %arg7[%c10_69, %c0_70] : memref<182x128xf32, #tpu.memory_space<vmem>>, vector<162x128xf32>
    tpu.vector_store %arg7[%c10_69, %c0_70], %96 {strides = array<i32>} : memref<182x128xf32, #tpu.memory_space<vmem>>, vector<162x128xf32>,
    %cst_71 = arith.constant 0.000000e+00 : f32
    %102 = vector.broadcast %cst_71 : f32 to vector<162x128xf32>
    %c0_72 = arith.constant 0 : index
    %c0_73 = arith.constant 0 : index
    %103 = vector.load %arg7[%c0_72, %c0_73] : memref<182x128xf32, #tpu.memory_space<vmem>>, vector<162x128xf32>
    %104 = arith.truncf %103 : vector<162x128xf32> to vector<162x128xbf16>
    %c0_74 = arith.constant 0 : index
    %c0_75 = arith.constant 0 : index
    %c0_76 = arith.constant 0 : index
    %105 = vector.load %arg3[%c0_74, %c0_75, %c0_76] : memref<9x128x128xbf16, #tpu.memory_space<vmem>>, vector<1x128x128xbf16>
    %106 = vector.shape_cast %105 : vector<1x128x128xbf16> to vector<128x128xbf16>
    %cst_77 = arith.constant dense<0.000000e+00> : vector<162x128xf32>
    %107 = tpu.matmul %104, %106, %cst_77 {dimension_numbers = #tpu.dot_dimension_numbers<[1], [0], [0], [1], [0, 0, 1, 1], [], []>} : vector<162x128xbf16>, vector<128x128xbf16>, vector<162x128xf32> -> vector<162x128xf32>
    %108 = arith.addf %102, %107 : vector<162x128xf32>
    %c1_78 = arith.constant 1 : index
    %c0_79 = arith.constant 0 : index
    %109 = vector.load %arg7[%c1_78, %c0_79] : memref<182x128xf32, #tpu.memory_space<vmem>>, vector<162x128xf32>
    %110 = arith.truncf %109 : vector<162x128xf32> to vector<162x128xbf16>
    %c1_80 = arith.constant 1 : index
    %c0_81 = arith.constant 0 : index
    %c0_82 = arith.constant 0 : index
    %111 = vector.load %arg3[%c1_80, %c0_81, %c0_82] : memref<9x128x128xbf16, #tpu.memory_space<vmem>>, vector<1x128x128xbf16>
    %112 = vector.shape_cast %111 : vector<1x128x128xbf16> to vector<128x128xbf16>
    %cst_83 = arith.constant dense<0.000000e+00> : vector<162x128xf32>
    %113 = tpu.matmul %110, %112, %cst_83 {dimension_numbers = #tpu.dot_dimension_numbers<[1], [0], [0], [1], [0, 0, 1, 1], [], []>} : vector<162x128xbf16>, vector<128x128xbf16>, vector<162x128xf32> -> vector<162x128xf32>
    %114 = arith.addf %108, %113 : vector<162x128xf32>
    %c2_84 = arith.constant 2 : index
    %c0_85 = arith.constant 0 : index
    %115 = vector.load %arg7[%c2_84, %c0_85] : memref<182x128xf32, #tpu.memory_space<vmem>>, vector<162x128xf32>
    %116 = arith.truncf %115 : vector<162x128xf32> to vector<162x128xbf16>
    %c2_86 = arith.constant 2 : index
    %c0_87 = arith.constant 0 : index
    %c0_88 = arith.constant 0 : index
    %117 = vector.load %arg3[%c2_86, %c0_87, %c0_88] : memref<9x128x128xbf16, #tpu.memory_space<vmem>>, vector<1x128x128xbf16>
    %118 = vector.shape_cast %117 : vector<1x128x128xbf16> to vector<128x128xbf16>
    %cst_89 = arith.constant dense<0.000000e+00> : vector<162x128xf32>
    %119 = tpu.matmul %116, %118, %cst_89 {dimension_numbers = #tpu.dot_dimension_numbers<[1], [0], [0], [1], [0, 0, 1, 1], [], []>} : vector<162x128xbf16>, vector<128x128xbf16>, vector<162x128xf32> -> vector<162x128xf32>
    %120 = arith.addf %114, %119 : vector<162x128xf32>
    %c9_90 = arith.constant 9 : index
    %c0_91 = arith.constant 0 : index
    %121 = vector.load %arg7[%c9_90, %c0_91] : memref<182x128xf32, #tpu.memory_space<vmem>>, vector<162x128xf32>
    %122 = arith.truncf %121 : vector<162x128xf32> to vector<162x128xbf16>
    %c3_92 = arith.constant 3 : index
    %c0_93 = arith.constant 0 : index
    %c0_94 = arith.constant 0 : index
    %123 = vector.load %arg3[%c3_92, %c0_93, %c0_94] : memref<9x128x128xbf16, #tpu.memory_space<vmem>>, vector<1x128x128xbf16>
    %124 = vector.shape_cast %123 : vector<1x128x128xbf16> to vector<128x128xbf16>
    %cst_95 = arith.constant dense<0.000000e+00> : vector<162x128xf32>
    %125 = tpu.matmul %122, %124, %cst_95 {dimension_numbers = #tpu.dot_dimension_numbers<[1], [0], [0], [1], [0, 0, 1, 1], [], []>} : vector<162x128xbf16>, vector<128x128xbf16>, vector<162x128xf32> -> vector<162x128xf32>
    %126 = arith.addf %120, %125 : vector<162x128xf32>
    %c10_96 = arith.constant 10 : index
    %c0_97 = arith.constant 0 : index
    %127 = vector.load %arg7[%c10_96, %c0_97] : memref<182x128xf32, #tpu.memory_space<vmem>>, vector<162x128xf32>
    %128 = arith.truncf %127 : vector<162x128xf32> to vector<162x128xbf16>
    %c4_98 = arith.constant 4 : index
    %c0_99 = arith.constant 0 : index
    %c0_100 = arith.constant 0 : index
    %129 = vector.load %arg3[%c4_98, %c0_99, %c0_100] : memref<9x128x128xbf16, #tpu.memory_space<vmem>>, vector<1x128x128xbf16>
    %130 = vector.shape_cast %129 : vector<1x128x128xbf16> to vector<128x128xbf16>
    %cst_101 = arith.constant dense<0.000000e+00> : vector<162x128xf32>
    %131 = tpu.matmul %128, %130, %cst_101 {dimension_numbers = #tpu.dot_dimension_numbers<[1], [0], [0], [1], [0, 0, 1, 1], [], []>} : vector<162x128xbf16>, vector<128x128xbf16>, vector<162x128xf32> -> vector<162x128xf32>
    %132 = arith.addf %126, %131 : vector<162x128xf32>
    %c11 = arith.constant 11 : index
    %c0_102 = arith.constant 0 : index
    %133 = vector.load %arg7[%c11, %c0_102] : memref<182x128xf32, #tpu.memory_space<vmem>>, vector<162x128xf32>
    %134 = arith.truncf %133 : vector<162x128xf32> to vector<162x128xbf16>
    %c5_103 = arith.constant 5 : index
    %c0_104 = arith.constant 0 : index
    %c0_105 = arith.constant 0 : index
    %135 = vector.load %arg3[%c5_103, %c0_104, %c0_105] : memref<9x128x128xbf16, #tpu.memory_space<vmem>>, vector<1x128x128xbf16>
    %136 = vector.shape_cast %135 : vector<1x128x128xbf16> to vector<128x128xbf16>
    %cst_106 = arith.constant dense<0.000000e+00> : vector<162x128xf32>
    %137 = tpu.matmul %134, %136, %cst_106 {dimension_numbers = #tpu.dot_dimension_numbers<[1], [0], [0], [1], [0, 0, 1, 1], [], []>} : vector<162x128xbf16>, vector<128x128xbf16>, vector<162x128xf32> -> vector<162x128xf32>
    %138 = arith.addf %132, %137 : vector<162x128xf32>
    %c18 = arith.constant 18 : index
    %c0_107 = arith.constant 0 : index
    %139 = vector.load %arg7[%c18, %c0_107] : memref<182x128xf32, #tpu.memory_space<vmem>>, vector<162x128xf32>
    %140 = arith.truncf %139 : vector<162x128xf32> to vector<162x128xbf16>
    %c6_108 = arith.constant 6 : index
    %c0_109 = arith.constant 0 : index
    %c0_110 = arith.constant 0 : index
    %141 = vector.load %arg3[%c6_108, %c0_109, %c0_110] : memref<9x128x128xbf16, #tpu.memory_space<vmem>>, vector<1x128x128xbf16>
    %142 = vector.shape_cast %141 : vector<1x128x128xbf16> to vector<128x128xbf16>
    %cst_111 = arith.constant dense<0.000000e+00> : vector<162x128xf32>
    %143 = tpu.matmul %140, %142, %cst_111 {dimension_numbers = #tpu.dot_dimension_numbers<[1], [0], [0], [1], [0, 0, 1, 1], [], []>} : vector<162x128xbf16>, vector<128x128xbf16>, vector<162x128xf32> -> vector<162x128xf32>
    %144 = arith.addf %138, %143 : vector<162x128xf32>
    %c19 = arith.constant 19 : index
    %c0_112 = arith.constant 0 : index
    %145 = vector.load %arg7[%c19, %c0_112] : memref<182x128xf32, #tpu.memory_space<vmem>>, vector<162x128xf32>
    %146 = arith.truncf %145 : vector<162x128xf32> to vector<162x128xbf16>
    %c7_113 = arith.constant 7 : index
    %c0_114 = arith.constant 0 : index
    %c0_115 = arith.constant 0 : index
    %147 = vector.load %arg3[%c7_113, %c0_114, %c0_115] : memref<9x128x128xbf16, #tpu.memory_space<vmem>>, vector<1x128x128xbf16>
    %148 = vector.shape_cast %147 : vector<1x128x128xbf16> to vector<128x128xbf16>
    %cst_116 = arith.constant dense<0.000000e+00> : vector<162x128xf32>
    %149 = tpu.matmul %146, %148, %cst_116 {dimension_numbers = #tpu.dot_dimension_numbers<[1], [0], [0], [1], [0, 0, 1, 1], [], []>} : vector<162x128xbf16>, vector<128x128xbf16>, vector<162x128xf32> -> vector<162x128xf32>
    %150 = arith.addf %144, %149 : vector<162x128xf32>
    %c20 = arith.constant 20 : index
    %c0_117 = arith.constant 0 : index
    %151 = vector.load %arg7[%c20, %c0_117] : memref<182x128xf32, #tpu.memory_space<vmem>>, vector<162x128xf32>
    %152 = arith.truncf %151 : vector<162x128xf32> to vector<162x128xbf16>
    %c8_118 = arith.constant 8 : index
    %c0_119 = arith.constant 0 : index
    %c0_120 = arith.constant 0 : index
    %153 = vector.load %arg3[%c8_118, %c0_119, %c0_120] : memref<9x128x128xbf16, #tpu.memory_space<vmem>>, vector<1x128x128xbf16>
    %154 = vector.shape_cast %153 : vector<1x128x128xbf16> to vector<128x128xbf16>
    %cst_121 = arith.constant dense<0.000000e+00> : vector<162x128xf32>
    %155 = tpu.matmul %152, %154, %cst_121 {dimension_numbers = #tpu.dot_dimension_numbers<[1], [0], [0], [1], [0, 0, 1, 1], [], []>} : vector<162x128xbf16>, vector<128x128xbf16>, vector<162x128xf32> -> vector<162x128xf32>
    %156 = arith.addf %150, %155 : vector<162x128xf32>
    %157 = vector.broadcast %0 : vector<162x1xf32> to vector<162x128xf32>
    %158 = arith.mulf %156, %157 : vector<162x128xf32>
    %cst_122 = arith.constant dense<0.000000e+00> : vector<128xf32>
    %159 = vector.multi_reduction <add>, %158, %cst_122 [0] : vector<162x128xf32> to vector<128xf32>
    %160 = vector.shape_cast %159 : vector<128xf32> to vector<1x128xf32>
    %161 = arith.mulf %156, %156 : vector<162x128xf32>
    %162 = vector.broadcast %0 : vector<162x1xf32> to vector<162x128xf32>
    %163 = arith.mulf %161, %162 : vector<162x128xf32>
    %cst_123 = arith.constant dense<0.000000e+00> : vector<128xf32>
    %164 = vector.multi_reduction <add>, %163, %cst_123 [0] : vector<162x128xf32> to vector<128xf32>
    %165 = vector.shape_cast %164 : vector<128xf32> to vector<1x128xf32>
    %cst_124 = arith.constant 7.812500e-03 : f32
    %166 = vector.broadcast %cst_124 : f32 to vector<1x128xf32>
    %167 = arith.mulf %160, %166 : vector<1x128xf32>
    %cst_125 = arith.constant 7.812500e-03 : f32
    %168 = vector.broadcast %cst_125 : f32 to vector<1x128xf32>
    %169 = arith.mulf %165, %168 : vector<1x128xf32>
    %170 = arith.mulf %167, %167 : vector<1x128xf32>
    %171 = arith.subf %169, %170 : vector<1x128xf32>
    %cst_126 = arith.constant 9.99999974E-6 : f32
    %172 = vector.broadcast %cst_126 : f32 to vector<1x128xf32>
    %173 = arith.addf %171, %172 : vector<1x128xf32>
    %174 = math.rsqrt %173 : vector<1x128xf32>
    %175 = vector.broadcast %167 : vector<1x128xf32> to vector<162x128xf32>
    %176 = arith.subf %156, %175 : vector<162x128xf32>
    %177 = vector.broadcast %174 : vector<1x128xf32> to vector<162x128xf32>
    %178 = arith.mulf %176, %177 : vector<162x128xf32>
    %c2_127 = arith.constant 2 : index
    %c0_128 = arith.constant 0 : index
    %179 = vector.load %arg4[%c2_127, %c0_128] : memref<6x128xf32, #tpu.memory_space<vmem>>, vector<1x128xf32>
    %180 = vector.broadcast %179 : vector<1x128xf32> to vector<162x128xf32>
    %181 = arith.mulf %178, %180 : vector<162x128xf32>
    %c3_129 = arith.constant 3 : index
    %c0_130 = arith.constant 0 : index
    %182 = vector.load %arg4[%c3_129, %c0_130] : memref<6x128xf32, #tpu.memory_space<vmem>>, vector<1x128xf32>
    %183 = vector.broadcast %182 : vector<1x128xf32> to vector<162x128xf32>
    %184 = arith.addf %181, %183 : vector<162x128xf32>
    %c3_131 = arith.constant 3 : index
    %c0_132 = arith.constant 0 : index
    %c0_133 = arith.constant 0 : index
    %185 = vector.load %arg0[%c3_131, %c0_132, %c0_133] : memref<4x182x128xf32, #tpu.memory_space<vmem>>, vector<1x162x128xf32>
    %186 = vector.shape_cast %185 : vector<1x162x128xf32> to vector<162x128xf32>
    %187 = arith.truncf %186 : vector<162x128xf32> to vector<162x128xbf16>
    %c0_134 = arith.constant 0 : index
    %c0_135 = arith.constant 0 : index
    %188 = vector.load %arg5[%c0_134, %c0_135] : memref<128x128xbf16, #tpu.memory_space<vmem>>, vector<128x128xbf16>
    %cst_136 = arith.constant dense<0.000000e+00> : vector<162x128xf32>
    %189 = tpu.matmul %187, %188, %cst_136 {dimension_numbers = #tpu.dot_dimension_numbers<[1], [0], [0], [1], [0, 0, 1, 1], [], []>} : vector<162x128xbf16>, vector<128x128xbf16>, vector<162x128xf32> -> vector<162x128xf32>
    %190 = vector.broadcast %0 : vector<162x1xf32> to vector<162x128xf32>
    %191 = arith.mulf %189, %190 : vector<162x128xf32>
    %cst_137 = arith.constant dense<0.000000e+00> : vector<128xf32>
    %192 = vector.multi_reduction <add>, %191, %cst_137 [0] : vector<162x128xf32> to vector<128xf32>
    %193 = vector.shape_cast %192 : vector<128xf32> to vector<1x128xf32>
    %194 = arith.mulf %189, %189 : vector<162x128xf32>
    %195 = vector.broadcast %0 : vector<162x1xf32> to vector<162x128xf32>
    %196 = arith.mulf %194, %195 : vector<162x128xf32>
    %cst_138 = arith.constant dense<0.000000e+00> : vector<128xf32>
    %197 = vector.multi_reduction <add>, %196, %cst_138 [0] : vector<162x128xf32> to vector<128xf32>
    %198 = vector.shape_cast %197 : vector<128xf32> to vector<1x128xf32>
    %cst_139 = arith.constant 7.812500e-03 : f32
    %199 = vector.broadcast %cst_139 : f32 to vector<1x128xf32>
    %200 = arith.mulf %193, %199 : vector<1x128xf32>
    %cst_140 = arith.constant 7.812500e-03 : f32
    %201 = vector.broadcast %cst_140 : f32 to vector<1x128xf32>
    %202 = arith.mulf %198, %201 : vector<1x128xf32>
    %203 = arith.mulf %200, %200 : vector<1x128xf32>
    %204 = arith.subf %202, %203 : vector<1x128xf32>
    %cst_141 = arith.constant 9.99999974E-6 : f32
    %205 = vector.broadcast %cst_141 : f32 to vector<1x128xf32>
    %206 = arith.addf %204, %205 : vector<1x128xf32>
    %207 = math.rsqrt %206 : vector<1x128xf32>
    %208 = vector.broadcast %200 : vector<1x128xf32> to vector<162x128xf32>
    %209 = arith.subf %189, %208 : vector<162x128xf32>
    %210 = vector.broadcast %207 : vector<1x128xf32> to vector<162x128xf32>
    %211 = arith.mulf %209, %210 : vector<162x128xf32>
    %c4_142 = arith.constant 4 : index
    %c0_143 = arith.constant 0 : index
    %212 = vector.load %arg4[%c4_142, %c0_143] : memref<6x128xf32, #tpu.memory_space<vmem>>, vector<1x128xf32>
    %213 = vector.broadcast %212 : vector<1x128xf32> to vector<162x128xf32>
    %214 = arith.mulf %211, %213 : vector<162x128xf32>
    %c5_144 = arith.constant 5 : index
    %c0_145 = arith.constant 0 : index
    %215 = vector.load %arg4[%c5_144, %c0_145] : memref<6x128xf32, #tpu.memory_space<vmem>>, vector<1x128xf32>
    %216 = vector.broadcast %215 : vector<1x128xf32> to vector<162x128xf32>
    %217 = arith.addf %214, %216 : vector<162x128xf32>
    %218 = arith.addf %184, %217 : vector<162x128xf32>
    %cst_146 = arith.constant 0.000000e+00 : f32
    %219 = vector.broadcast %cst_146 : f32 to vector<162x128xf32>
    %220 = arith.maximumf %218, %219 : vector<162x128xf32>
    %c0_147 = arith.constant 0 : index
    %c0_148 = arith.constant 0 : index
    %221 = vector.load %arg6[%c0_147, %c0_148] : memref<162x128xf32, #tpu.memory_space<vmem>>, vector<162x128xf32>
    tpu.vector_store %arg6[%c0_147, %c0_148], %220 {strides = array<i32>} : memref<162x128xf32, #tpu.memory_space<vmem>>, vector<162x128xf32>,
    return
  }
}

</mosaic_0001>

<bundles_post_ra>
// kernel: residual_block_pallas.1
= control target key start
LH: loop header
LB: loop body
LE: loop exit
PB: predicated region body
PF: predicated region fallthrough
CT: control target
= control target key end

     0   :  { %vm1778_vm0 = vcmask 1041408   ;;  %s8363_s2 = inlined_call_operand.vmem [shape: bf16[9,128,128], index: 2, kind: input, shape index: {}]   ;;  %s8364_s0 = inlined_call_operand.vmem [shape: f32[4,182,128], index: 0, kind: input, shape index: {}]   ;;  %s8365_s1 = inlined_call_operand.vmem [shape: f32[162,1], index: 1, kind: input, shape index: {}]   ;;  %s8366_s3 = inlined_call_operand.vmem [shape: bf16[9,128,128], index: 3, kind: input, shape index: {}]   ;;  %s8367_s4 = inlined_call_operand.vmem [shape: f32[6,128], index: 4, kind: input, shape index: {}]   ;;  %s8368_s5 = inlined_call_operand.vmem [shape: bf16[128,128], index: 5, kind: input, shape index: {}]   ;;  %s8369_s6 = inlined_call_operand.vmem [shape: f32[162,128], index: 6, kind: output, shape index: {}]  }
   0x1   :  { %v5283_v0 = vld [vmem:[%s8363_s2 + $0x78] sm:$0xff]  ;;  %v5282_v3 = vld [vmem:[%s8363_s2 + $0x70] sm:$0xff]  ;;  %v5281_v6 = vld [vmem:[%s8363_s2 + $0x68] sm:$0xff] }
   0x2   :  { %v5505_v1 = vld [vmem:[%s8363_s2 + $0xb8] sm:$0xff]  ;;  %190 = vmatpush.bf16.msra.mxu0 %v5283_v0  ;;  %5420 = vmatpush.bf16.msra.mxu3 %v5283_v0  ;;  %v5520_v4 = vld [vmem:[%s8363_s2 + $0xb0] sm:$0xff]  ;;  %v5535_v7 = vld [vmem:[%s8363_s2 + $0xa8] sm:$0xff] }
   0x3   :  { %v5510_v2 = vld [vmem:[%s8363_s2 + $0x38] sm:$0xff]  ;;  %5436 = vmatpush.bf16.msra.mxu2 %v5505_v1  ;;  %v5525_v5 = vld [vmem:[%s8363_s2 + $0x30] sm:$0xff]  ;;  %v5540_v8 = vld [vmem:[%s8363_s2 + $0x28] sm:$0xff] }
   0x4   :  { %5428 = vmatpush.bf16.msra.mxu1 %v5510_v2  ;;  %v5280_v9 = vld [vmem:[%s8363_s2 + $0x60] sm:$0xff]  ;;  %v5279_v12 = vld [vmem:[%s8363_s2 + $0x58] sm:$0xff]  ;;  %v5278_v15 = vld [vmem:[%s8363_s2 + $0x50] sm:$0xff] }
   0x5   :  { %v5550_v10 = vld [vmem:[%s8363_s2 + $0xa0] sm:$0xff]  ;;  %v5565_v13 = vld [vmem:[%s8363_s2 + $0x98] sm:$0xff]  ;;  %v5580_v16 = vld [vmem:[%s8363_s2 + $0x90] sm:$0xff] }
   0x6   :  { %191 = vmatpush.bf16.msra.mxu0 %v5282_v3  ;;  %5421 = vmatpush.bf16.msra.mxu3 %v5282_v3  ;;  %v5555_v11 = vld [vmem:[%s8363_s2 + $0x20] sm:$0xff]  ;;  %v5570_v14 = vld [vmem:[%s8363_s2 + $0x18] sm:$0xff]  ;;  %v5585_v17 = vld [vmem:[%s8363_s2 + $0x10] sm:$0xff] }
   0x7   :  { %5437 = vmatpush.bf16.msra.mxu2 %v5520_v4  ;;  %v5277_v18 = vld [vmem:[%s8363_s2 + $0x48] sm:$0xff]  ;;  %v5276_v21 = vld [vmem:[%s8363_s2 + $0x40] sm:$0xff]  ;;  %v4278_v23 = vld [vmem:[%s8364_s0 + $0xb8] sm:$0xff] }
   0x8   :  { %5429 = vmatpush.bf16.msra.mxu1 %v5525_v5  ;;  %v5595_v19 = vld [vmem:[%s8363_s2 + $0x88] sm:$0xff]  ;;  %v5606_v22 = vld [vmem:[%s8363_s2 + $0x80] sm:$0xff]  ;;  %v4282_v25 = vld [vmem:[%s8364_s0 + $0xd8] sm:$0xff] }
   0x9   :  { %v5269_v20 = vld [vmem:[%s8363_s2 + $0x8] sm:$0xff]  ;;  %v4279_v24 = vld [vmem:[%s8364_s0 + $0xc0] sm:$0xff]  ;;  %v5299_v27 = vld [vmem:[%s8363_s2 + $0xf8] sm:$0xff] }
   0xa   :  { %192 = vmatpush.bf16.msra.mxu0 %v5281_v6  ;;  %5422 = vmatpush.bf16.msra.mxu3 %v5281_v6  ;;  %v4283_v26 = vld [vmem:[%s8364_s0 + $0xe0] sm:$0xff]  ;;  %v5632_v29 = vld [vmem:[%s8364_s0 + $0x29] sm:$0xff]  ;;  %v114_v33 = vpack.c.bf16 %v4279_v24, %v4278_v23  ;;  %v5670_v43 = vld [vmem:[%s8364_s0 + $0x31] sm:$0xff] }
   0xb   :  { %5438 = vmatpush.bf16.msra.mxu2 %v5535_v7  ;;  %v5627_v28 = vld [vmem:[%s8364_s0 + $0x21] sm:$0xff]  ;;  %v116_v34 = vpack.c.bf16 %v4283_v26, %v4282_v25  ;;  %v5298_v37 = vld [vmem:[%s8363_s2 + $0xf0] sm:$0xff]  ;;  %v5675_v44 = vld [vmem:[%s8364_s0 + $0x39] sm:$0xff] }
   0xc   :  { %5430 = vmatpush.bf16.msra.mxu1 %v5540_v8  ;;  %v5268_v30 = vld [vmem:[%s8363_s2] sm:$0xff]  ;;  %v49_v32 = vld [vmem:[%s8364_s0 + $0x28] sm:$0xff]  ;;  %v387_v35 = vpack.c.bf16 %v5632_v29, %v5627_v28  ;;  %v4281_v40 = vld [vmem:[%s8364_s0 + $0xd0] sm:$0xff]  ;;  %v388_v49 = vpack.c.bf16 %v5675_v44, %v5670_v43 }
   0xd   :  { %v48_v31 = vld [vmem:[%s8364_s0 + $0x20] sm:$0xff]  ;;  %v5297_v38 = vld [vmem:[%s8363_s2 + $0xe8] sm:$0xff]  ;;  %v4285_v42 = vld [vmem:[%s8364_s0 + $0xf0] sm:$0xff] }
   0xe   :  { %193 = vmatpush.bf16.msra.mxu0 %v5280_v9  ;;  %5423 = vmatpush.bf16.msra.mxu3 %v5280_v9  ;;  %v67_v36 = vpack.c.bf16 %v49_v32, %v48_v31  ;;  %v4280_v39 = vld [vmem:[%s8364_s0 + $0xc8] sm:$0xff]  ;;  %v50_v45 = vld [vmem:[%s8364_s0 + $0x30] sm:$0xff]  ;;  %v51_v46 = vld [vmem:[%s8364_s0 + $0x38] sm:$0xff] }
   0xf   :  { %5439 = vmatpush.bf16.msra.mxu2 %v5550_v10  ;;  %v4284_v41 = vld [vmem:[%s8364_s0 + $0xe8] sm:$0xff]  ;;  %v115_v47 = vpack.c.bf16 %v4281_v40, %v4280_v39  ;;  %v68_v50 = vpack.c.bf16 %v51_v46, %v50_v45  ;;  %v5296_v51 = vld [vmem:[%s8363_s2 + $0xe0] sm:$0xff]  ;;  %v4286_v52 = vld [vmem:[%s8364_s0 + $0xf8] sm:$0xff] }
  0x10   :  { %5431 = vmatpush.bf16.msra.mxu1 %v5555_v11  ;;  %v117_v48 = vpack.c.bf16 %v4285_v42, %v4284_v41  ;;  %v4287_v53 = vld [vmem:[%s8364_s0 + $0x100] sm:$0xff]  ;;  %v45_v55 = vld [vmem:[%s8364_s0 + $0x8] sm:$0xff]  ;;  %v5295_v0 = vld [vmem:[%s8363_s2 + $0xd8] sm:$0xff] }
  0x11   :  { %v44_v54 = vld [vmem:[%s8364_s0] sm:$0xff]  ;;  %v5711_v57 = vld [vmem:[%s8364_s0 + $0x49] sm:$0xff]  ;;  %v118_v60 = vpack.c.bf16 %v4287_v53, %v4286_v52  ;;  %v5810_v31 = vld [vmem:[%s8364_s0 + $0x11] sm:$0xff] }
  0x12   :  { %194 = vmatpush.bf16.msra.mxu0 %v5279_v12  ;;  %5424 = vmatpush.bf16.msra.mxu3 %v5279_v12  ;;  %v5706_v56 = vld [vmem:[%s8364_s0 + $0x41] sm:$0xff]  ;;  %v65_v61 = vpack.c.bf16 %v45_v55, %v44_v54  ;;  %v46_v3 = vld [vmem:[%s8364_s0 + $0x10] sm:$0xff]  ;;  %v5748_v6 = vld [vmem:[%s8364_s0 + $0x59] sm:$0xff] }
  0x13   :  { %5440 = vmatpush.bf16.msra.mxu2 %v5565_v13  ;;  %v52_v58 = vld [vmem:[%s8364_s0 + $0x40] sm:$0xff]  ;;  %v53_v59 = vld [vmem:[%s8364_s0 + $0x48] sm:$0xff]  ;;  %v389_v62 = vpack.c.bf16 %v5711_v57, %v5706_v56  ;;  %v5307_v41 = vld [vmem:[%s8363_s2 + $0x138] sm:$0xff] }
  0x14   :  { %5432 = vmatpush.bf16.msra.mxu1 %v5570_v14  ;;  %v69_v63 = vpack.c.bf16 %v53_v59, %v52_v58  ;;  %v5293_v26 = vld [vmem:[%s8363_s2 + $0xc8] sm:$0xff]  ;;  %v5815_v32 = vld [vmem:[%s8364_s0 + $0x19] sm:$0xff]  ;;  %v5306_v42 = vld [vmem:[%s8363_s2 + $0x130] sm:$0xff] }
  0x15   :  { %v5323_v45 = vld [vmem:[%s8363_s2 + $0x1b8] sm:$0xff]  ;;  %v5869_v52 = vld [vmem:[%s8364_s0 + $0x89] sm:$0xff]  ;;  %v60_v53 = vld [vmem:[%s8364_s0 + $0x80] sm:$0xff] }
  0x16   :  { %195 = vmatpush.bf16.msra.mxu0 %v5278_v15  ;;  %5425 = vmatpush.bf16.msra.mxu3 %v5278_v15  ;;  %v4291_v15 = vld [vmem:[%s8364_s0 + $0x120] sm:$0xff]  ;;  %v5315_v46 = vld [vmem:[%s8363_s2 + $0x178] sm:$0xff]  ;;  %v61_v54 = vld [vmem:[%s8364_s0 + $0x88] sm:$0xff] }
  0x17   :  { %5441 = vmatpush.bf16.msra.mxu2 %v5580_v16  ;;  %v5304_v55 = vld [vmem:[%s8363_s2 + $0x120] sm:$0xff] }
  0x18   :  { %5433 = vmatpush.bf16.msra.mxu1 %v5585_v17 }
  0x1a   :  { %196 = vmatpush.bf16.msra.mxu0 %v5277_v18  ;;  %5426 = vmatpush.bf16.msra.mxu3 %v5277_v18  ;;  %v5782_v18 = vld [vmem:[%s8364_s0 + $0x61] sm:$0xff] }
  0x1b   :  { %5442 = vmatpush.bf16.msra.mxu2 %v5595_v19 }
  0x1c   :  { %5434 = vmatpush.bf16.msra.mxu1 %v5269_v20 }
  0x1e   :  { %197 = vmatpush.bf16.msra.mxu0 %v5276_v21  ;;  %5427 = vmatpush.bf16.msra.mxu3 %v5276_v21  ;;  %v57_v21 = vld [vmem:[%s8364_s0 + $0x68] sm:$0xff] }
  0x1f   :  { %5443 = vmatpush.bf16.msra.mxu2 %v5606_v22 }
  0x20   :  { %5435 = vmatpush.bf16.msra.mxu1 %v5268_v30 }
  0x21   :  { %198 = vmatmul.bf16.vlgmr.msra.gmra.mxu0 %v114_v33  ;;  %208 = vmatmul.bf16.vlgmr.msra.gmra.mxu3 %v116_v34  ;;  %v5820_v33 = vld [vmem:[%s8364_s0 + $0x71] sm:$0xff]  ;;  %v5825_v34 = vld [vmem:[%s8364_s0 + $0x79] sm:$0xff] }
  0x22   :  { %643 = vmatpush.bf16.msrb.mxu3 %v5299_v27  ;;  %301 = vmatpush.bf16.msrb.mxu0 %v5510_v2  ;;  %v4289_v2 = vld [vmem:[%s8364_s0 + $0x110] sm:$0xff]  ;;  %v4292_v27 = vld [vmem:[%s8364_s0 + $0x128] sm:$0xff]  ;;  %v392_v39 = vpack.c.bf16 %v5825_v34, %v5820_v33 }
  0x23   :  { %479 = vmatmul.bf16.vlgmr.msra.gmra.mxu2 %v387_v35  ;;  %319 = vmatmul.bf16.vlgmr.msra.gmra.mxu1 %v67_v36  ;;  %v58_v35 = vld [vmem:[%s8364_s0 + $0x70] sm:$0xff]  ;;  %v59_v36 = vld [vmem:[%s8364_s0 + $0x78] sm:$0xff] }
  0x24   :  { %v72_v40 = vpack.c.bf16 %v59_v36, %v58_v35  ;;  %1187 = vmatpush.bf16.msrb.mxu2 %v5323_v45  ;;  %1006 = vmatpush.bf16.msrb.mxu1 %v5315_v46  ;;  %v5331_v35 = vld [vmem:[%s8363_s2 + $0x1f8] sm:$0xff]  ;;  %v5309_v36 = vld [vmem:[%s8363_s2 + $0x148] sm:$0xff] }
  0x26   :  { %644 = vmatpush.bf16.msrb.mxu3 %v5298_v37  ;;  %302 = vmatpush.bf16.msrb.mxu0 %v5525_v5  ;;  %v5743_v5 = vld [vmem:[%s8364_s0 + $0x51] sm:$0xff] }
  0x2a   :  { %645 = vmatpush.bf16.msrb.mxu3 %v5297_v38  ;;  %303 = vmatpush.bf16.msrb.mxu0 %v5540_v8  ;;  %v55_v8 = vld [vmem:[%s8364_s0 + $0x58] sm:$0xff]  ;;  %v386_v38 = vpack.c.bf16 %v5815_v32, %v5810_v31 }
  0x2e   :  { %304 = vmatpush.bf16.msrb.mxu0 %v5555_v11  ;;  %646 = vmatpush.bf16.msrb.mxu3 %v5296_v51  ;;  %v390_v11 = vpack.c.bf16 %v5748_v6, %v5743_v5  ;;  %v5864_v51 = vld [vmem:[%s8364_s0 + $0x81] sm:$0xff] }
  0x2f   :  { %v393_v59 = vpack.c.bf16 %v5869_v52, %v5864_v51 }
  0x31   :  { %203 = vmatmul.bf16.gmra.mxu0 %v115_v47  ;;  %213 = vmatmul.bf16.gmra.mxu3 %v117_v48  ;;  %v5322_v47 = vld [vmem:[%s8363_s2 + $0x1b0] sm:$0xff]  ;;  %v5305_v48 = vld [vmem:[%s8363_s2 + $0x128] sm:$0xff] }
  0x32   :  { %305 = vmatpush.bf16.msrb.mxu0 %v5570_v14  ;;  %647 = vmatpush.bf16.msrb.mxu3 %v5295_v0  ;;  %v5294_v14 = vld [vmem:[%s8363_s2 + $0xd0] sm:$0xff]  ;;  %v5303_v0 = vld [vmem:[%s8363_s2 + $0x118] sm:$0xff] }
  0x33   :  { %484 = vmatmul.bf16.gmra.mxu2 %v388_v49  ;;  %324 = vmatmul.bf16.gmra.mxu1 %v68_v50  ;;  %v4294_v49 = vld [vmem:[%s8364_s0 + $0x138] sm:$0xff]  ;;  %v4295_v50 = vld [vmem:[%s8364_s0 + $0x140] sm:$0xff] }
  0x34   :  { %1188 = vmatpush.bf16.msrb.mxu2 %v5322_v47  ;;  %v122_v58 = vpack.c.bf16 %v4295_v50, %v4294_v49  ;;  %v4499_v50 = vld [vmem:[%s8364_s0 + $0x240] sm:$0xff] }
  0x36   :  { %306 = vmatpush.bf16.msrb.mxu0 %v5585_v17  ;;  %648 = vmatpush.bf16.msrb.mxu3 %v5294_v14  ;;  %v5777_v17 = vld [vmem:[%s8364_s0 + $0x9] sm:$0xff]  ;;  %v5927_v14 = vld [vmem:[%s8364_s0 + $0x91] sm:$0xff] }
  0x3a   :  { %307 = vmatpush.bf16.msrb.mxu0 %v5269_v20  ;;  %v56_v20 = vld [vmem:[%s8364_s0 + $0x60] sm:$0xff]  ;;  %649 = vmatpush.bf16.msrb.mxu3 %v5293_v26  ;;  %v4496_v26 = vld [vmem:[%s8364_s0 + $0x228] sm:$0xff] }
  0x3b   :  { %v71_v25 = vpack.c.bf16 %v57_v21, %v56_v20  ;;  %v5300_v20 = vld [vmem:[%s8363_s2 + $0x100] sm:$0xff] }
  0x3e   :  { %308 = vmatpush.bf16.msrb.mxu0 %v5268_v30  ;;  %v4293_v30 = vld [vmem:[%s8364_s0 + $0x130] sm:$0xff] }
  0x3f   :  { %v121_v37 = vpack.c.bf16 %v4293_v30, %v4292_v27  ;;  %v4497_v27 = vld [vmem:[%s8364_s0 + $0x230] sm:$0xff] }
  0x40   :  { %v749_v30 = vpack.c.bf16 %v4497_v27, %v4496_v26 }
  0x41   :  { %218 = vmatmul.bf16.gmra.mxu3 %v118_v60  ;;  %309 = vmatmul.bf16.vlgmr.msrb.gmra.mxu0 %v65_v61  ;;  %v5292_v60 = vld [vmem:[%s8363_s2 + $0xc0] sm:$0xff]  ;;  %v5314_v61 = vld [vmem:[%s8363_s2 + $0x170] sm:$0xff] }
  0x42   :  { %461 = vmatpush.bf16.msra.mxu0 %v5505_v1  ;;  %v4288_v1 = vld [vmem:[%s8364_s0 + $0x108] sm:$0xff]  ;;  %650 = vmatpush.bf16.msrb.mxu3 %v5292_v60 }
  0x43   :  { %489 = vmatmul.bf16.gmra.mxu2 %v389_v62  ;;  %329 = vmatmul.bf16.gmra.mxu1 %v69_v63  ;;  %v119_v9 = vpack.c.bf16 %v4289_v2, %v4288_v1  ;;  %v5321_v62 = vld [vmem:[%s8363_s2 + $0x1a8] sm:$0xff]  ;;  %v73_v63 = vpack.c.bf16 %v61_v54, %v60_v53  ;;  %v5320_v2 = vld [vmem:[%s8363_s2 + $0x1a0] sm:$0xff] }
  0x44   :  { %1007 = vmatpush.bf16.msrb.mxu1 %v5314_v61  ;;  %1189 = vmatpush.bf16.msrb.mxu2 %v5321_v62  ;;  %v5313_v1 = vld [vmem:[%s8363_s2 + $0x168] sm:$0xff]  ;;  %v5330_v62 = vld [vmem:[%s8363_s2 + $0x1f0] sm:$0xff] }
  0x46   :  { %462 = vmatpush.bf16.msra.mxu0 %v5520_v4  ;;  %v47_v4 = vld [vmem:[%s8364_s0 + $0x18] sm:$0xff]  ;;  %1368 = vmatpush.bf16.msra.mxu3 %v5331_v35  ;;  %v4430_v35 = vld [vmem:[%s8364_s0 + $0x188] sm:$0xff] }
  0x48   :  { %1008 = vmatpush.bf16.msrb.mxu1 %v5313_v1  ;;  %1190 = vmatpush.bf16.msrb.mxu2 %v5320_v2  ;;  %v4428_v1 = vld [vmem:[%s8364_s0 + $0x178] sm:$0xff] }
  0x4a   :  { %463 = vmatpush.bf16.msra.mxu0 %v5535_v7  ;;  %v54_v7 = vld [vmem:[%s8364_s0 + $0x50] sm:$0xff]  ;;  %1369 = vmatpush.bf16.msra.mxu3 %v5330_v62 }
  0x4b   :  { %v70_v12 = vpack.c.bf16 %v55_v8, %v54_v7  ;;  %v5319_v7 = vld [vmem:[%s8363_s2 + $0x198] sm:$0xff]  ;;  %v5301_v8 = vld [vmem:[%s8363_s2 + $0x108] sm:$0xff] }
  0x4c   :  { %1191 = vmatpush.bf16.msrb.mxu2 %v5319_v7 }
  0x4e   :  { %464 = vmatpush.bf16.msra.mxu0 %v5550_v10  ;;  %v66_v10 = vpack.c.bf16 %v47_v4, %v46_v3  ;;  %v5302_v3 = vld [vmem:[%s8363_s2 + $0x110] sm:$0xff]  ;;  %v5312_v4 = vld [vmem:[%s8363_s2 + $0x160] sm:$0xff] }
  0x4f   :  { %1009 = vmatpush.bf16.msrb.mxu1 %v5312_v4  ;;  %v4566_v4 = vld [vmem:[%s8364_s0 + $0x179] sm:$0xff] }
  0x51   :  { %223 = vmatmul.bf16.gmra.mxu3 %v119_v9  ;;  %314 = vmatmul.bf16.gmra.mxu0 %v66_v10  ;;  %v4296_v9 = vld [vmem:[%s8364_s0 + $0x148] sm:$0xff]  ;;  %v4297_v10 = vld [vmem:[%s8364_s0 + $0x150] sm:$0xff] }
  0x52   :  { %465 = vmatpush.bf16.msra.mxu0 %v5565_v13  ;;  %v4290_v13 = vld [vmem:[%s8364_s0 + $0x118] sm:$0xff]  ;;  %v123_v21 = vpack.c.bf16 %v4297_v10, %v4296_v9 }
  0x53   :  { %494 = vmatmul.bf16.gmra.mxu2 %v390_v11  ;;  %334 = vmatmul.bf16.gmra.mxu1 %v70_v12  ;;  %v5311_v11 = vld [vmem:[%s8363_s2 + $0x158] sm:$0xff]  ;;  %v5318_v12 = vld [vmem:[%s8363_s2 + $0x190] sm:$0xff] }
  0x54   :  { %1010 = vmatpush.bf16.msrb.mxu1 %v5311_v11  ;;  %1192 = vmatpush.bf16.msrb.mxu2 %v5318_v12  ;;  %v1111_v11 = vpack.c.bf16 %v5810_v31, %v5777_v17  ;;  %v4500_v12 = vld [vmem:[%s8364_s0 + $0x248] sm:$0xff] }
  0x56   :  { %466 = vmatpush.bf16.msra.mxu0 %v5580_v16  ;;  %v364_v16 = vld [vmem:[%s8364_s0 + $0x1] sm:$0xff] }
  0x57   :  { %v385_v23 = vpack.c.bf16 %v5777_v17, %v364_v16  ;;  %v63_v16 = vld [vmem:[%s8364_s0 + $0x98] sm:$0xff] }
  0x5a   :  { %467 = vmatpush.bf16.msra.mxu0 %v5595_v19  ;;  %v5787_v19 = vld [vmem:[%s8364_s0 + $0x69] sm:$0xff] }
  0x5b   :  { %v391_v24 = vpack.c.bf16 %v5787_v19, %v5782_v18 }
  0x5e   :  { %468 = vmatpush.bf16.msra.mxu0 %v5606_v22  ;;  %v120_v22 = vpack.c.bf16 %v4291_v15, %v4290_v13  ;;  %v5932_v13 = vld [vmem:[%s8364_s0 + $0x99] sm:$0xff]  ;;  %v62_v15 = vld [vmem:[%s8364_s0 + $0x90] sm:$0xff] }
  0x61   :  { %228 = vmatmul.bf16.gmra.mxu3 %v120_v22  ;;  %469 = vmatmul.bf16.vlgmr.msra.gmra.mxu0 %v385_v23  ;;  %v394_v22 = vpack.c.bf16 %v5932_v13, %v5927_v14  ;;  %v5310_v23 = vld [vmem:[%s8363_s2 + $0x150] sm:$0xff] }
  0x62   :  { %825 = vmatpush.bf16.msrb.mxu0 %v5307_v41  ;;  %1011 = vmatpush.bf16.msrb.mxu1 %v5310_v23  ;;  %v384_v41 = vld [vmem:[%s8364_s0 + $0xa1] sm:$0x3] }
  0x63   :  { %499 = vmatmul.bf16.gmra.mxu2 %v391_v24  ;;  %339 = vmatmul.bf16.gmra.mxu1 %v71_v25  ;;  %v5317_v24 = vld [vmem:[%s8363_s2 + $0x188] sm:$0xff]  ;;  %v74_v25 = vpack.c.bf16 %v63_v16, %v62_v15  ;;  %v395_v47 = vpack.c.bf16 %v384_v41, %v384_v41 }
  0x64   :  { %1193 = vmatpush.bf16.msrb.mxu2 %v5317_v24 }
  0x66   :  { %826 = vmatpush.bf16.msrb.mxu0 %v5306_v42  ;;  %1012 = vmatpush.bf16.msrb.mxu1 %v5309_v36  ;;  %v64_v42 = vld [vmem:[%s8364_s0 + $0xa0] sm:$0x3] }
  0x67   :  { %v75_v49 = vpack.c.bf16 %v64_v42, %v64_v42  ;;  %v5329_v42 = vld [vmem:[%s8363_s2 + $0x1e8] sm:$0xff] }
  0x68   :  { %1370 = vmatpush.bf16.msra.mxu3 %v5329_v42  ;;  %v4572_v42 = vld [vmem:[%s8364_s0 + $0x1a9] sm:$0xff] }
  0x6a   :  { %827 = vmatpush.bf16.msrb.mxu0 %v5305_v48  ;;  %v4498_v48 = vld [vmem:[%s8364_s0 + $0x238] sm:$0xff] }
  0x6b   :  { %v750_v54 = vpack.c.bf16 %v4499_v50, %v4498_v48  ;;  %v4502_v48 = vld [vmem:[%s8364_s0 + $0x258] sm:$0xff] }
  0x6e   :  { %828 = vmatpush.bf16.msrb.mxu0 %v5304_v55 }
  0x71   :  { %233 = vmatmul.bf16.gmra.mxu3 %v121_v37  ;;  %474 = vmatmul.bf16.gmra.mxu0 %v386_v38  ;;  %v5316_v37 = vld [vmem:[%s8363_s2 + $0x180] sm:$0xff] }
  0x72   :  { %829 = vmatpush.bf16.msrb.mxu0 %v5303_v0  ;;  %1194 = vmatpush.bf16.msrb.mxu2 %v5316_v37  ;;  %v5308_v38 = vld [vmem:[%s8363_s2 + $0x140] sm:$0xff]  ;;  %v4427_v0 = vld [vmem:[%s8364_s0 + $0x170] sm:$0xff] }
  0x73   :  { %504 = vmatmul.bf16.gmra.mxu2 %v392_v39  ;;  %344 = vmatmul.bf16.gmra.mxu1 %v72_v40  ;;  %v5339_v39 = vld [vmem:[%s8363_s2 + $0x238] sm:$0xff]  ;;  %v567_v9 = vpack.c.bf16 %v4428_v1, %v4427_v0  ;;  %v4567_v37 = vld [vmem:[%s8364_s0 + $0x181] sm:$0xff]  ;;  %v4431_v1 = vld [vmem:[%s8364_s0 + $0x190] sm:$0xff] }
  0x74   :  { %1013 = vmatpush.bf16.msrb.mxu1 %v5308_v38  ;;  %v4298_v40 = vld [vmem:[%s8364_s0 + $0x158] sm:$0x3]  ;;  %v4568_v38 = vld [vmem:[%s8364_s0 + $0x189] sm:$0xff] }
  0x75   :  { %v124_v45 = vpack.c.bf16 %v4298_v40, %v4298_v40 }
  0x76   :  { %830 = vmatpush.bf16.msrb.mxu0 %v5302_v3  ;;  %v4565_v3 = vld [vmem:[%s8364_s0 + $0x171] sm:$0xff] }
  0x77   :  { %v930_v16 = vpack.c.bf16 %v4566_v4, %v4565_v3  ;;  %v4569_v4 = vld [vmem:[%s8364_s0 + $0x191] sm:$0xff] }
  0x7a   :  { %831 = vmatpush.bf16.msrb.mxu0 %v5301_v8 }
  0x7e   :  { %832 = vmatpush.bf16.msrb.mxu0 %v5300_v20  ;;  %v5338_v20 = vld [vmem:[%s8363_s2 + $0x230] sm:$0xff] }
  0x81   :  { %238 = vmatmul.bf16.gmra.mxu3 %v122_v58  ;;  %833 = vmatmul.bf16.vlgmr.msrb.gmra.mxu0 %v749_v30  ;;  %v4429_v30 = vld [vmem:[%s8364_s0 + $0x180] sm:$0xff] }
  0x82   :  { %1549 = vmatpush.bf16.msra.mxu0 %v5339_v39  ;;  %v568_v41 = vpack.c.bf16 %v4430_v35, %v4429_v30 }
  0x83   :  { %509 = vmatmul.bf16.gmra.mxu2 %v393_v59  ;;  %349 = vmatmul.bf16.gmra.mxu1 %v73_v63 }
  0x86   :  { %1550 = vmatpush.bf16.msra.mxu0 %v5338_v20  ;;  %v4504_v20 = vld [vmem:[%s8364_s0 + $0x268] sm:$0xff] }
  0x91   :  { %243 = vmatmul.bf16.gmra.mxu3 %v123_v21  ;;  %838 = vmatmul.bf16.gmra.mxu0 %v750_v54  ;;  %v4501_v21 = vld [vmem:[%s8364_s0 + $0x250] sm:$0xff]  ;;  %v4503_v54 = vld [vmem:[%s8364_s0 + $0x260] sm:$0xff] }
  0x92   :  { %v751_v23 = vpack.c.bf16 %v4501_v21, %v4500_v12 }
  0x93   :  { %514 = vmatmul.bf16.gmra.mxu2 %v394_v22  ;;  %354 = vmatmul.bf16.gmra.mxu1 %v74_v25 }
  0x9e   :  { %v199_v46 = vpop.f32.mrf.mxu0 }
  0xa0   :  { %v320_v53 = vpop.f32.mrf.mxu1 }
  0xa1   :  { %248 = vmatmul.bf16.gmra.mxu3 %v124_v45  ;;  %843 = vmatmul.bf16.gmra.mxu0 %v751_v23 }
  0xa3   :  { %519 = vmatmul.bf16.gmra.mxu2 %v395_v47  ;;  %359 = vmatmul.bf16.gmra.mxu1 %v75_v49  ;;  %v1112_v47 = vpack.c.bf16 %v5627_v28, %v5815_v32 }
  0xa4   :  { %v209_v55 = vpop.f32.mrf.mxu3 }
  0xa5   :  { %v321_v58 = vadd.f32 %v320_v53, %v209_v55  ;;  %v931_v53 = vpack.c.bf16 %v4568_v38, %v4567_v37  ;;  %v4433_v38 = vld [vmem:[%s8364_s0 + $0x1a0] sm:$0xff] }
  0xa6   :  { %v480_v59 = vpop.f32.mrf.mxu2  ;;  %v5987_v60 = vpop.f32.mrf.mxu0 }
  0xa7   :  { %v5989_v61 = vadd.f32 %v480_v59, %v321_v58  ;;  %v752_v58 = vpack.c.bf16 %v4503_v54, %v4502_v48  ;;  %v1114_v54 = vpack.c.bf16 %v5706_v56, %v5675_v44 }
  0xa8   :  { %v322_v63 = vpop.f32.mrf.mxu1 }
  0xac   :  { %v211_v2 = vpop.f32.mrf.mxu3 }
  0xad   :  { %v323_v7 = vadd.f32 %v322_v63, %v211_v2  ;;  %v4432_v2 = vld [vmem:[%s8364_s0 + $0x198] sm:$0xff] }
  0xae   :  { %v482_v8 = vpop.f32.mrf.mxu2  ;;  %v204_v10 = vpop.f32.mrf.mxu0 }
  0xaf   :  { %v6011_v15 = vadd.f32 %v482_v8, %v323_v7  ;;  %v4570_v7 = vld [vmem:[%s8364_s0 + $0x199] sm:$0xff] }
  0xb0   :  { %v325_v22 = vpop.f32.mrf.mxu1  ;;  %v932_v23 = vpack.c.bf16 %v4570_v7, %v4569_v4  ;;  %v4435_v7 = vld [vmem:[%s8364_s0 + $0x1b0] sm:$0xff] }
  0xb1   :  { %651 = vmatmul.bf16.vlgmr.msrb.gmra.mxu3 %v567_v9  ;;  %848 = vmatmul.bf16.gmra.mxu0 %v752_v58 }
  0xb3   :  { %1195 = vmatmul.bf16.vlgmr.msrb.gmra.mxu2 %v1111_v11  ;;  %1014 = vmatmul.bf16.vlgmr.msrb.gmra.mxu1 %v930_v16  ;;  %v569_v11 = vpack.c.bf16 %v4432_v2, %v4431_v1  ;;  %v1113_v16 = vpack.c.bf16 %v5670_v43, %v5632_v29 }
  0xb4   :  { %v214_v17 = vpop.f32.mrf.mxu3 }
  0xb5   :  { %v326_v31 = vadd.f32 %v325_v22, %v214_v17  ;;  %v4505_v17 = vld [vmem:[%s8364_s0 + $0x270] sm:$0xff] }
  0xb6   :  { %v485_v24 = vpop.f32.mrf.mxu2  ;;  %v6019_v25 = vpop.f32.mrf.mxu0 }
  0xb7   :  { %v6021_v26 = vadd.f32 %v485_v24, %v326_v31  ;;  %v753_v24 = vpack.c.bf16 %v4505_v17, %v4504_v20 }
  0xb8   :  { %v327_v27 = vpop.f32.mrf.mxu1 }
  0xbc   :  { %v216_v36 = vpop.f32.mrf.mxu3 }
  0xbd   :  { %v328_v39 = vadd.f32 %v327_v27, %v216_v36  ;;  %v5328_v27 = vld [vmem:[%s8363_s2 + $0x1e0] sm:$0xff] }
  0xbe   :  { %v487_v40 = vpop.f32.mrf.mxu2  ;;  %v310_v45 = vpop.f32.mrf.mxu0  ;;  %1371 = vmatpush.bf16.msra.mxu3 %v5328_v27  ;;  %v5336_v36 = vld [vmem:[%s8363_s2 + $0x220] sm:$0xff] }
  0xbf   :  { %v311_v49 = vadd.f32 %v310_v45, %v199_v46  ;;  %v6043_v50 = vadd.f32 %v487_v40, %v328_v39  ;;  %v5337_v46 = vld [vmem:[%s8363_s2 + $0x228] sm:$0xff] }
  0xc0   :  { %v330_v55 = vpop.f32.mrf.mxu1  ;;  %1551 = vmatpush.bf16.msra.mxu0 %v5337_v46  ;;  %v4434_v39 = vld [vmem:[%s8364_s0 + $0x1a8] sm:$0xff] }
  0xc1   :  { %656 = vmatmul.bf16.gmra.mxu3 %v568_v41  ;;  %853 = vmatmul.bf16.gmra.mxu0 %v753_v24  ;;  %v4571_v41 = vld [vmem:[%s8364_s0 + $0x1a1] sm:$0xff]  ;;  %v570_v48 = vpack.c.bf16 %v4434_v39, %v4433_v38 }
  0xc2   :  { %v4508_v24 = vld [vmem:[%s8364_s0 + $0x288] sm:$0xff] }
  0xc3   :  { %1200 = vmatmul.bf16.gmra.mxu2 %v1112_v47  ;;  %1019 = vmatmul.bf16.gmra.mxu1 %v931_v53 }
  0xc4   :  { %v219_v28 = vpop.f32.mrf.mxu3  ;;  %1552 = vmatpush.bf16.msra.mxu0 %v5336_v36 }
  0xc5   :  { %v331_v32 = vadd.f32 %v330_v55, %v219_v28  ;;  %v4506_v55 = vld [vmem:[%s8364_s0 + $0x278] sm:$0xff] }
  0xc6   :  { %v490_v59 = vpop.f32.mrf.mxu2  ;;  %v6051_v62 = vpop.f32.mrf.mxu0 }
  0xc7   :  { %v6053_v63 = vadd.f32 %v490_v59, %v331_v32  ;;  %v933_v32 = vpack.c.bf16 %v4572_v42, %v4571_v41  ;;  %v4507_v59 = vld [vmem:[%s8364_s0 + $0x280] sm:$0xff]  ;;  %v4438_v42 = vld [vmem:[%s8364_s0 + $0x1c8] sm:$0xff] }
  0xc8   :  { %v332_v0 = vpop.f32.mrf.mxu1  ;;  %v4437_v41 = vld [vmem:[%s8364_s0 + $0x1c0] sm:$0xff] }
  0xcc   :  { %v221_v3 = vpop.f32.mrf.mxu3 }
  0xcd   :  { %v333_v8 = vadd.f32 %v332_v0, %v221_v3  ;;  %v754_v0 = vpack.c.bf16 %v4507_v59, %v4506_v55  ;;  %v5327_v3 = vld [vmem:[%s8363_s2 + $0x1d8] sm:$0xff]  ;;  %v572_v55 = vpack.c.bf16 %v4438_v42, %v4437_v41  ;;  %v5325_v42 = vld [vmem:[%s8363_s2 + $0x1c8] sm:$0xff] }
  0xce   :  { %v492_v9 = vpop.f32.mrf.mxu2  ;;  %v315_v12 = vpop.f32.mrf.mxu0  ;;  %1372 = vmatpush.bf16.msra.mxu3 %v5327_v3  ;;  %v4510_v59 = vld [vmem:[%s8364_s0 + $0x298] sm:$0xff] }
  0xcf   :  { %v316_v21 = vadd.f32 %v315_v12, %v204_v10  ;;  %v6072_v22 = vadd.f32 %v492_v9, %v333_v8  ;;  %v4436_v8 = vld [vmem:[%s8364_s0 + $0x1b8] sm:$0xff] }
  0xd0   :  { %v335_v31 = vpop.f32.mrf.mxu1  ;;  %v4574_v12 = vld [vmem:[%s8364_s0 + $0x1b9] sm:$0xff] }
  0xd1   :  { %661 = vmatmul.bf16.gmra.mxu3 %v569_v11  ;;  %858 = vmatmul.bf16.gmra.mxu0 %v754_v0  ;;  %v4573_v11 = vld [vmem:[%s8364_s0 + $0x1b1] sm:$0xff] }
  0xd3   :  { %1205 = vmatmul.bf16.gmra.mxu2 %v1113_v16  ;;  %1024 = vmatmul.bf16.gmra.mxu1 %v932_v23  ;;  %v571_v23 = vpack.c.bf16 %v4436_v8, %v4435_v7 }
  0xd4   :  { %v224_v29 = vpop.f32.mrf.mxu3 }
  0xd5   :  { %v336_v43 = vadd.f32 %v335_v31, %v224_v29  ;;  %v1115_v31 = vpack.c.bf16 %v5743_v5, %v5711_v57  ;;  %v5335_v57 = vld [vmem:[%s8363_s2 + $0x218] sm:$0xff] }
  0xd6   :  { %v495_v10 = vpop.f32.mrf.mxu2  ;;  %v6080_v30 = vpop.f32.mrf.mxu0  ;;  %1553 = vmatpush.bf16.msra.mxu0 %v5335_v57 }
  0xd7   :  { %v6082_v35 = vadd.f32 %v495_v10, %v336_v43  ;;  %v934_v43 = vpack.c.bf16 %v4574_v12, %v4573_v11  ;;  %v4509_v10 = vld [vmem:[%s8364_s0 + $0x290] sm:$0xff] }
  0xd8   :  { %v337_v37 = vpop.f32.mrf.mxu1  ;;  %v4439_v12 = vld [vmem:[%s8364_s0 + $0x1d0] sm:$0xff] }
  0xdc   :  { %v226_v40 = vpop.f32.mrf.mxu3 }
  0xdd   :  { %v338_v45 = vadd.f32 %v337_v37, %v226_v40  ;;  %v755_v37 = vpack.c.bf16 %v4509_v10, %v4508_v24  ;;  %v1117_v10 = vpack.c.bf16 %v5820_v33, %v5787_v19 }
  0xde   :  { %v497_v47 = vpop.f32.mrf.mxu2  ;;  %v470_v53 = vpop.f32.mrf.mxu0 }
  0xdf   :  { %v6104_v58 = vadd.f32 %v470_v53, %v311_v49  ;;  %v6106_v28 = vadd.f32 %v497_v47, %v338_v45  ;;  %v4575_v47 = vld [vmem:[%s8364_s0 + $0x1c1] sm:$0xff] }
  0xe0   :  { %v340_v46 = vpop.f32.mrf.mxu1 }
  0xe1   :  { %666 = vmatmul.bf16.gmra.mxu3 %v570_v48  ;;  %863 = vmatmul.bf16.gmra.mxu0 %v755_v37  ;;  %v4576_v48 = vld [vmem:[%s8364_s0 + $0x1c9] sm:$0xff] }
  0xe2   :  { %v935_v0 = vpack.c.bf16 %v4576_v48, %v4575_v47  ;;  %v4513_v37 = vld [vmem:[%s8364_s0 + $0x2b0] sm:$0xff] }
  0xe3   :  { %1210 = vmatmul.bf16.gmra.mxu2 %v1114_v54  ;;  %1029 = vmatmul.bf16.gmra.mxu1 %v933_v32  ;;  %v1116_v32 = vpack.c.bf16 %v5782_v18, %v5748_v6 }
  0xe4   :  { %v229_v44 = vpop.f32.mrf.mxu3 }
  0xe5   :  { %v341_v56 = vadd.f32 %v340_v46, %v229_v44  ;;  %v5326_v44 = vld [vmem:[%s8363_s2 + $0x1d0] sm:$0xff] }
  0xe6   :  { %v500_v1 = vpop.f32.mrf.mxu2  ;;  %v6111_v2 = vpop.f32.mrf.mxu0  ;;  %1373 = vmatpush.bf16.msra.mxu3 %v5326_v44 }
  0xe7   :  { %v6113_v49 = vadd.f32 %v500_v1, %v341_v56  ;;  %v4511_v56 = vld [vmem:[%s8364_s0 + $0x2a0] sm:$0xff] }
  0xe8   :  { %v342_v4 = vpop.f32.mrf.mxu1  ;;  %v756_v3 = vpack.c.bf16 %v4511_v56, %v4510_v59  ;;  %v4580_v59 = vld [vmem:[%s8364_s0 + $0x1e9] sm:$0xff] }
  0xea   :  { %1374 = vmatpush.bf16.msra.mxu3 %v5325_v42 }
  0xec   :  { %v231_v9 = vpop.f32.mrf.mxu3 }
  0xed   :  { %v343_v16 = vadd.f32 %v342_v4, %v231_v9  ;;  %v5334_v9 = vld [vmem:[%s8363_s2 + $0x210] sm:$0xff] }
  0xee   :  { %v502_v20 = vpop.f32.mrf.mxu2  ;;  %v475_v17 = vpop.f32.mrf.mxu0  ;;  %1554 = vmatpush.bf16.msra.mxu0 %v5334_v9 }
  0xef   :  { %v6135_v27 = vadd.f32 %v475_v17, %v316_v21  ;;  %v6137_v29 = vadd.f32 %v502_v20, %v343_v16  ;;  %v4440_v16 = vld [vmem:[%s8364_s0 + $0x1d8] sm:$0xff] }
  0xf0   :  { %v345_v36 = vpop.f32.mrf.mxu1  ;;  %v4578_v17 = vld [vmem:[%s8364_s0 + $0x1d9] sm:$0xff] }
  0xf1   :  { %671 = vmatmul.bf16.gmra.mxu3 %v571_v23  ;;  %868 = vmatmul.bf16.gmra.mxu0 %v756_v3  ;;  %v4577_v23 = vld [vmem:[%s8364_s0 + $0x1d1] sm:$0xff]  ;;  %v1118_v3 = vpack.c.bf16 %v5864_v51, %v5825_v34 }
  0xf3   :  { %1215 = vmatmul.bf16.gmra.mxu2 %v1115_v31  ;;  %1034 = vmatmul.bf16.gmra.mxu1 %v934_v43  ;;  %v573_v43 = vpack.c.bf16 %v4440_v16, %v4439_v12 }
  0xf4   :  { %v234_v5 = vpop.f32.mrf.mxu3 }
  0xf5   :  { %v346_v21 = vadd.f32 %v345_v36, %v234_v5  ;;  %v4512_v36 = vld [vmem:[%s8364_s0 + $0x2a8] sm:$0xff]  ;;  %v936_v5 = vpack.c.bf16 %v4578_v17, %v4577_v23 }
  0xf6   :  { %v505_v38 = vpop.f32.mrf.mxu2  ;;  %v6172_v7 = vpop.f32.mrf.mxu0 }
  0xf7   :  { %v6145_v39 = vadd.f32 %v505_v38, %v346_v21  ;;  %v757_v38 = vpack.c.bf16 %v4513_v37, %v4512_v36  ;;  %v4581_v37 = vld [vmem:[%s8364_s0 + $0x1f1] sm:$0xff] }
  0xf8   :  { %v347_v40 = vpop.f32.mrf.mxu1 }
  0xfc   :  { %v236_v45 = vpop.f32.mrf.mxu3 }
  0xfd   :  { %v348_v53 = vadd.f32 %v347_v40, %v236_v45 }
  0xfe   :  { %v507_v54 = vpop.f32.mrf.mxu2  ;;  %v6201_v21 = vpop.f32.mrf.mxu0 }
  0xff   :  { %v6164_v46 = vadd.f32 %v507_v54, %v348_v53  ;;  %v4441_v53 = vld [vmem:[%s8364_s0 + $0x1e0] sm:$0xff]  ;;  %v4442_v54 = vld [vmem:[%s8364_s0 + $0x1e8] sm:$0xff] }
 0x100   :  { %v350_v1 = vpop.f32.mrf.mxu1  ;;  %v574_v56 = vpack.c.bf16 %v4442_v54, %v4441_v53  ;;  %v5332_v54 = vld [vmem:[%s8363_s2 + $0x200] sm:$0xff] }
 0x101   :  { %676 = vmatmul.bf16.gmra.mxu3 %v572_v55  ;;  %873 = vmatmul.bf16.gmra.mxu0 %v757_v38 }
 0x103   :  { %1220 = vmatmul.bf16.gmra.mxu2 %v1116_v32  ;;  %1039 = vmatmul.bf16.gmra.mxu1 %v935_v0  ;;  %v4579_v32 = vld [vmem:[%s8364_s0 + $0x1e1] sm:$0xff] }
 0x104   :  { %v239_v6 = vpop.f32.mrf.mxu3 }
 0x105   :  { %v351_v18 = vadd.f32 %v350_v1, %v239_v6  ;;  %v5333_v1 = vld [vmem:[%s8363_s2 + $0x208] sm:$0xff]  ;;  %v4514_v6 = vld [vmem:[%s8364_s0 + $0x2b8] sm:$0xff] }
 0x106   :  { %v510_v4 = vpop.f32.mrf.mxu2  ;;  %v6208_v47 = vpop.f32.mrf.mxu0  ;;  %1555 = vmatpush.bf16.msra.mxu0 %v5333_v1  ;;  %v4445_v1 = vld [vmem:[%s8364_s0 + $0x200] sm:$0xff] }
 0x107   :  { %v6174_v8 = vadd.f32 %v510_v4, %v351_v18  ;;  %v937_v4 = vpack.c.bf16 %v4580_v59, %v4579_v32 }
 0x108   :  { %v352_v11 = vpop.f32.mrf.mxu1 }
 0x10a   :  { %1556 = vmatpush.bf16.msra.mxu0 %v5332_v54 }
 0x10c   :  { %v241_v20 = vpop.f32.mrf.mxu3 }
 0x10d   :  { %v353_v31 = vadd.f32 %v352_v11, %v241_v20  ;;  %v4515_v11 = vld [vmem:[%s8364_s0 + $0x2c0] sm:$0xff] }
 0x10e   :  { %v512_v24 = vpop.f32.mrf.mxu2  ;;  %v6232_v9 = vpop.f32.mrf.mxu0  ;;  %v758_v16 = vpack.c.bf16 %v4515_v11, %v4514_v6 }
 0x10f   :  { %v6199_v57 = vadd.f32 %v512_v24, %v353_v31  ;;  %v4443_v24 = vld [vmem:[%s8364_s0 + $0x1f0] sm:$0xff] }
 0x110   :  { %v355_v40 = vpop.f32.mrf.mxu1 }
 0x111   :  { %681 = vmatmul.bf16.gmra.mxu3 %v573_v43  ;;  %878 = vmatmul.bf16.gmra.mxu0 %v758_v16  ;;  %v4444_v43 = vld [vmem:[%s8364_s0 + $0x1f8] sm:$0xff] }
 0x112   :  { %v575_v38 = vpack.c.bf16 %v4444_v43, %v4443_v24  ;;  %v1453_v24 = vld [vmem:[%s8364_s0 + $0x12] sm:$0xff] }
 0x113   :  { %1225 = vmatmul.bf16.gmra.mxu2 %v1117_v10  ;;  %1044 = vmatmul.bf16.gmra.mxu1 %v936_v5  ;;  %v5324_v10 = vld [vmem:[%s8363_s2 + $0x1c0] sm:$0xff] }
 0x114   :  { %v244_v19 = vpop.f32.mrf.mxu3  ;;  %v4582_v5 = vld [vmem:[%s8364_s0 + $0x1f9] sm:$0xff]  ;;  %1375 = vmatpush.bf16.msra.mxu3 %v5324_v10 }
 0x115   :  { %v356_v33 = vadd.f32 %v355_v40, %v244_v19  ;;  %v1119_v19 = vpack.c.bf16 %v5927_v14, %v5869_v52 }
 0x116   :  { %v515_v41 = vpop.f32.mrf.mxu2  ;;  %v6239_v17 = vpop.f32.mrf.mxu0 }
 0x117   :  { %v6206_v45 = vadd.f32 %v515_v41, %v356_v33  ;;  %v4516_v33 = vld [vmem:[%s8364_s0 + $0x2c8] sm:$0x3]  ;;  %v938_v41 = vpack.c.bf16 %v4582_v5, %v4581_v37 }
 0x118   :  { %v357_v48 = vpop.f32.mrf.mxu1 }
 0x11c   :  { %v246_v55 = vpop.f32.mrf.mxu3 }
 0x11d   :  { %v358_v0 = vadd.f32 %v357_v48, %v246_v55  ;;  %v759_v48 = vpack.c.bf16 %v4516_v33, %v4516_v33  ;;  %v4447_v33 = vld [vmem:[%s8364_s0 + $0x210] sm:$0x3] }
 0x11e   :  { %v517_v44 = vpop.f32.mrf.mxu2  ;;  %v6261_v42 = vpop.f32.mrf.mxu0 }
 0x11f   :  { %v6230_v18 = vadd.f32 %v517_v44, %v358_v0  ;;  %v313_v44 = vadd.f32 %v6051_v62, %v5987_v60  ;;  %v4583_v60 = vld [vmem:[%s8364_s0 + $0x201] sm:$0xff]  ;;  %v4584_v62 = vld [vmem:[%s8364_s0 + $0x209] sm:$0xff] }
 0x120   :  { %v360_v12 = vpop.f32.mrf.mxu1 }
 0x121   :  { %686 = vmatmul.bf16.gmra.mxu3 %v574_v56  ;;  %883 = vmatmul.bf16.gmra.mxu0 %v759_v48 }
 0x123   :  { %1230 = vmatmul.bf16.gmra.mxu2 %v1118_v3  ;;  %1049 = vmatmul.bf16.gmra.mxu1 %v937_v4  ;;  %v525_v3 = vadd.f32 %v6111_v2, %v313_v44  ;;  %v1455_v44 = vld [vmem:[%s8364_s0 + $0x22] sm:$0xff] }
 0x124   :  { %v249_v34 = vpop.f32.mrf.mxu3 }
 0x125   :  { %v361_v51 = vadd.f32 %v360_v12, %v249_v34  ;;  %v1452_v34 = vld [vmem:[%s8364_s0 + $0xa] sm:$0xff] }
 0x126   :  { %v520_v20 = vpop.f32.mrf.mxu2  ;;  %v6268_v59 = vpop.f32.mrf.mxu0  ;;  %v1473_v10 = vpack.c.bf16 %v1453_v24, %v1452_v34 }
 0x127   :  { %v6237_v23 = vadd.f32 %v520_v20, %v361_v51  ;;  %v939_v20 = vpack.c.bf16 %v4584_v62, %v4583_v60 }
 0x128   :  { %v362_v31 = vpop.f32.mrf.mxu1 }
 0x12c   :  { %v251_v36 = vpop.f32.mrf.mxu3 }
 0x12e   :  { %v522_v40 = vpop.f32.mrf.mxu2  ;;  %v6301_v31 = vpop.f32.mrf.mxu0 }
 0x12f   :  { %v318_v40 = vadd.f32 %v6080_v30, %v6019_v25  ;;  %v577_v25 = vpack.c.bf16 %v4447_v33, %v4447_v33 }
 0x130   :  { %v1015_v53 = vpop.f32.mrf.mxu1 }
 0x131   :  { %691 = vmatmul.bf16.gmra.mxu3 %v575_v38  ;;  %1557 = vmatmul.bf16.vlgmr.msra.gmra.mxu0 %v1473_v10 }
 0x133   :  { %1235 = vmatmul.bf16.gmra.mxu2 %v1119_v19  ;;  %1054 = vmatmul.bf16.gmra.mxu1 %v938_v41  ;;  %v527_v41 = vadd.f32 %v6172_v7, %v318_v40  ;;  %v1454_v7 = vld [vmem:[%s8364_s0 + $0x1a] sm:$0xff] }
 0x134   :  { %v652_v55 = vpop.f32.mrf.mxu3 }
 0x135   :  { %v706_v52 = vadd.f32 %v652_v55, %v6104_v58  ;;  %v4446_v58 = vld [vmem:[%s8364_s0 + $0x208] sm:$0xff] }
 0x136   :  { %v1196_v14 = vpop.f32.mrf.mxu2  ;;  %v576_v12 = vpack.c.bf16 %v4446_v58, %v4445_v1  ;;  %v6308_v5 = vpop.f32.mrf.mxu0  ;;  %v1474_v1 = vpack.c.bf16 %v1455_v44, %v1454_v7 }
 0x137   :  { %v888_v32 = vadd.f32 %v6201_v21, %v706_v52  ;;  %v1109_v21 = vld [vmem:[%s8364_s0 + $0xa1] sm:$0xff] }
 0x138   :  { %v6270_v0 = vpop.f32.mrf.mxu1  ;;  %v1120_v2 = vpack.c.bf16 %v1109_v21, %v5932_v13 }
 0x139   :  { %v1069_v56 = vadd.f32 %v1015_v53, %v888_v32  ;;  %v4585_v53 = vld [vmem:[%s8364_s0 + $0x211] sm:$0x3] }
 0x13b   :  { %v6281_v6 = vadd.f32 %v1196_v14, %v1069_v56  ;;  %v940_v14 = vpack.c.bf16 %v4585_v53, %v4585_v53 }
 0x13c   :  { %v654_v4 = vpop.f32.mrf.mxu3 }
 0x13d   :  { %v707_v11 = vadd.f32 %v654_v4, %v525_v3  ;;  %v5462_v4 = vmov 0  }
 0x13e   :  { %v6292_v16 = vpop.f32.mrf.mxu2  ;;  %v6334_v32 = vpop.f32.mrf.mxu0  ;;  %5446 = vset.pattern.permute.xlu0 %v5462_v4  ;;  %5447 = vset.pattern.permute.xlu1 %v5462_v4 }
 0x13f   :  { %v6299_v51 = vadd.f32 %v6208_v47, %v707_v11  ;;  %5448 = vset.pattern.permute.xlu2 %v5462_v4 }
 0x140   :  { %v1020_v43 = vpop.f32.mrf.mxu1 }
 0x141   :  { %696 = vmatmul.bf16.gmra.mxu3 %v576_v12  ;;  %1562 = vmatmul.bf16.gmra.mxu0 %v1474_v1  ;;  %v1458_v1 = vld [vmem:[%s8364_s0 + $0x3a] sm:$0xff] }
 0x143   :  { %1240 = vmatmul.bf16.gmra.mxu2 %v1120_v2  ;;  %1059 = vmatmul.bf16.gmra.mxu1 %v939_v20  ;;  %v4683_v2 = vld [vmem:[%s8364_s0 + $0xc9] sm:$0xff] }
 0x144   :  { %v657_v13 = vpop.f32.mrf.mxu3 }
 0x145   :  { %v708_v36 = vadd.f32 %v657_v13, %v6135_v27  ;;  %v1110_v27 = vld [vmem:[%s8364_s0 + $0xa9] sm:$0x3] }
 0x146   :  { %v1201_v37 = vpop.f32.mrf.mxu2  ;;  %v1121_v55 = vpack.c.bf16 %v1110_v27, %v1110_v27  ;;  %v856_v62 = vpop.f32.mrf.mxu0  ;;  %v1456_v13 = vld [vmem:[%s8364_s0 + $0x2a] sm:$0xff] }
 0x147   :  { %v890_v47 = vadd.f32 %v6232_v9, %v708_v36  ;;  %v25_v27 = vld [vmem:[%s8365_s1 + $0x10] sm:$0xff] }
 0x148   :  { %v6310_v38 = vpop.f32.mrf.mxu1  ;;  %1645 = vperm.xlu1 %5447, %v25_v27  }
 0x149   :  { %v1071_v19 = vadd.f32 %v1020_v43, %v890_v47 }
 0x14b   :  { %v6318_v48 = vadd.f32 %v1201_v37, %v1071_v19 }
 0x14c   :  { %v659_v9 = vpop.f32.mrf.mxu3 }
 0x14d   :  { %v709_v54 = vadd.f32 %v659_v9, %v527_v41 }
 0x14e   :  { %v6326_v30 = vpop.f32.mrf.mxu2  ;;  %v859_v37 = vpop.f32.mrf.mxu0 }
 0x14f   :  { %v6332_v52 = vadd.f32 %v6239_v17, %v709_v54  ;;  %v23_v17 = vld [vmem:[%s8365_s1] sm:$0xff] }
 0x150   :  { %v1025_v56 = vpop.f32.mrf.mxu1  ;;  %1635 = vperm.xlu0 %5446, %v23_v17  }
 0x151   :  { %701 = vmatmul.bf16.gmra.mxu3 %v577_v25  ;;  %v4684_v25 = vld [vmem:[%s8364_s0 + $0xd1] sm:$0xff] }
 0x153   :  { %1245 = vmatmul.bf16.gmra.mxu2 %v1121_v55  ;;  %1064 = vmatmul.bf16.gmra.mxu1 %v940_v14 }
 0x154   :  { %v662_v58 = vpop.f32.mrf.mxu3 }
 0x155   :  { %v710_v3 = vadd.f32 %v662_v58, %v5989_v61  ;;  %v4682_v61 = vld [vmem:[%s8364_s0 + $0xc1] sm:$0xff] }
 0x156   :  { %v1206_v21 = vpop.f32.mrf.mxu2  ;;  %v1292_v43 = vpack.c.bf16 %v4683_v2, %v4682_v61  ;;  %v6374_v9 = vpop.f32.mrf.mxu0 }
 0x157   :  { %v892_v60 = vadd.f32 %v6261_v42, %v710_v3  ;;  %v24_v42 = vld [vmem:[%s8365_s1 + $0x8] sm:$0xff] }
 0x158   :  { %v6344_v11 = vpop.f32.mrf.mxu1  ;;  %1640 = vperm.xlu0 %5446, %v24_v42  }
 0x159   :  { %v1073_v12 = vadd.f32 %v1025_v56, %v892_v60  ;;  %v26_v56 = vld [vmem:[%s8365_s1 + $0x18] sm:$0xff] }
 0x15a   :  { %1650 = vperm.xlu1 %5447, %v26_v56  }
 0x15b   :  { %v6352_v34 = vadd.f32 %v1206_v21, %v1073_v12 }
 0x15c   :  { %v664_v20 = vpop.f32.mrf.mxu3 }
 0x15d   :  { %v711_v24 = vadd.f32 %v664_v20, %v6011_v15  ;;  %v1457_v15 = vld [vmem:[%s8364_s0 + $0x32] sm:$0xff] }
 0x15e   :  { %v6355_v10 = vpop.f32.mrf.mxu2  ;;  %v1475_v40 = vpack.c.bf16 %v1457_v15, %v1456_v13  ;;  %v864_v3 = vpop.f32.mrf.mxu0 }
 0x15f   :  { %v6364_v36 = vadd.f32 %v6268_v59, %v711_v24  ;;  %v4686_v24 = vld [vmem:[%s8364_s0 + $0xe1] sm:$0xff] }
 0x160   :  { %v1030_v47 = vpop.f32.mrf.mxu1  ;;  %1567 = vmatmul.bf16.gmra.mxu0 %v1475_v40 }
 0x161   :  { %1376 = vmatmul.bf16.vlgmr.msra.gmra.mxu3 %v1292_v43  ;;  %v4687_v43 = vld [vmem:[%s8364_s0 + $0xe9] sm:$0xff] }
 0x162   :  { %v1294_v15 = vpack.c.bf16 %v4687_v43, %v4686_v24 }
 0x164   :  { %v667_v19 = vpop.f32.mrf.mxu3 }
 0x165   :  { %v712_v33 = vadd.f32 %v667_v19, %v6021_v26  ;;  %v4685_v26 = vld [vmem:[%s8364_s0 + $0xd9] sm:$0xff] }
 0x166   :  { %v1211_v41 = vpop.f32.mrf.mxu2  ;;  %v1293_v44 = vpack.c.bf16 %v4685_v26, %v4684_v25  ;;  %v6403_v2 = vpop.f32.mrf.mxu0  ;;  %v1461_v19 = vld [vmem:[%s8364_s0 + $0x52] sm:$0xff] }
 0x167   :  { %v894_v59 = vadd.f32 %v6301_v31, %v712_v33  ;;  %v29_v25 = vld [vmem:[%s8365_s1 + $0x30] sm:$0xff] }
 0x168   :  { %v6376_v53 = vpop.f32.mrf.mxu1  ;;  %1665 = vperm.xlu0 %5446, %v29_v25  }
 0x169   :  { %v1075_v54 = vadd.f32 %v1030_v47, %v894_v59  ;;  %v1460_v47 = vld [vmem:[%s8364_s0 + $0x4a] sm:$0xff] }
 0x16a   :  { %v1477_v27 = vpack.c.bf16 %v1461_v19, %v1460_v47 }
 0x16b   :  { %v6384_v55 = vadd.f32 %v1211_v41, %v1075_v54 }
 0x16c   :  { %v669_v7 = vpop.f32.mrf.mxu3 }
 0x16d   :  { %v713_v14 = vadd.f32 %v669_v7, %v6043_v50  ;;  %v1459_v50 = vld [vmem:[%s8364_s0 + $0x42] sm:$0xff] }
 0x16e   :  { %v6387_v31 = vpop.f32.mrf.mxu2  ;;  %v1476_v4 = vpack.c.bf16 %v1459_v50, %v1458_v1  ;;  %v6426_v41 = vpop.f32.mrf.mxu0 }
 0x16f   :  { %v6396_v58 = vadd.f32 %v6308_v5, %v713_v14 }
 0x170   :  { %v1035_v21 = vpop.f32.mrf.mxu1  ;;  %1572 = vmatmul.bf16.gmra.mxu0 %v1476_v4  ;;  %v27_v4 = vld [vmem:[%s8365_s1 + $0x20] sm:$0xff] }
 0x171   :  { %1381 = vmatmul.bf16.gmra.mxu3 %v1293_v44  ;;  %v4688_v44 = vld [vmem:[%s8364_s0 + $0xf1] sm:$0xff]  ;;  %1655 = vperm.xlu2 %5448, %v27_v4  }
 0x174   :  { %v672_v17 = vpop.f32.mrf.mxu3 }
 0x175   :  { %v714_v60 = vadd.f32 %v672_v17, %v6053_v63  ;;  %v30_v17 = vld [vmem:[%s8365_s1 + $0x38] sm:$0xff] }
 0x176   :  { %v1216_v12 = vpop.f32.mrf.mxu2  ;;  %v6434_v7 = vpop.f32.mrf.mxu0  ;;  %1670 = vperm.xlu1 %5447, %v30_v17  }
 0x177   :  { %v896_v61 = vadd.f32 %v6334_v32, %v714_v60  ;;  %v1462_v60 = vld [vmem:[%s8364_s0 + $0x5a] sm:$0xff] }
 0x178   :  { %v6405_v20 = vpop.f32.mrf.mxu1 }
 0x179   :  { %v1077_v5 = vadd.f32 %v1035_v21, %v896_v61 }
 0x17b   :  { %v6413_v42 = vadd.f32 %v1216_v12, %v1077_v5 }
 0x17c   :  { %v674_v13 = vpop.f32.mrf.mxu3 }
 0x17d   :  { %v715_v63 = vadd.f32 %v674_v13, %v6072_v22 }
 0x17e   :  { %v6416_v32 = vpop.f32.mrf.mxu2  ;;  %v6462_v5 = vpop.f32.mrf.mxu0 }
 0x17f   :  { %v6421_v40 = vadd.f32 %v856_v62, %v715_v63 }
 0x180   :  { %v1040_v33 = vpop.f32.mrf.mxu1  ;;  %1577 = vmatmul.bf16.gmra.mxu0 %v1477_v27  ;;  %v4690_v27 = vld [vmem:[%s8364_s0 + $0x101] sm:$0xff] }
 0x181   :  { %1386 = vmatmul.bf16.gmra.mxu3 %v1294_v15  ;;  %v28_v15 = vld [vmem:[%s8365_s1 + $0x28] sm:$0xff] }
 0x182   :  { %1660 = vperm.xlu2 %5448, %v28_v15  }
 0x184   :  { %v677_v22 = vpop.f32.mrf.mxu3 }
 0x185   :  { %v716_v59 = vadd.f32 %v677_v22, %v6082_v35  ;;  %v4689_v35 = vld [vmem:[%s8364_s0 + $0xf9] sm:$0xff] }
 0x186   :  { %v1221_v54 = vpop.f32.mrf.mxu2  ;;  %v1295_v21 = vpack.c.bf16 %v4689_v35, %v4688_v44  ;;  %v6470_v19 = vpop.f32.mrf.mxu0  ;;  %v1465_v35 = vld [vmem:[%s8364_s0 + $0x72] sm:$0xff] }
 0x187   :  { %v898_v62 = vadd.f32 %v859_v37, %v716_v59 }
 0x188   :  { %v6432_v26 = vpop.f32.mrf.mxu1 }
 0x189   :  { %v1079_v14 = vadd.f32 %v1040_v33, %v898_v62  ;;  %v32_v62 = vld [vmem:[%s8365_s1 + $0x48] sm:$0xff] }
 0x18a   :  { %1680 = vperm.xlu0 %5446, %v32_v62   ;;  %v35_v62 = vld [vmem:[%s8365_s1 + $0x60] sm:$0xff] }
 0x18b   :  { %v6442_v56 = vadd.f32 %v1221_v54, %v1079_v14  ;;  %v1464_v14 = vld [vmem:[%s8364_s0 + $0x6a] sm:$0xff] }
 0x18c   :  { %v679_v1 = vpop.f32.mrf.mxu3 }
 0x18d   :  { %v717_v50 = vadd.f32 %v679_v1, %v6106_v28  ;;  %v1463_v28 = vld [vmem:[%s8364_s0 + $0x62] sm:$0xff] }
 0x18e   :  { %v6445_v37 = vpop.f32.mrf.mxu2  ;;  %v1478_v24 = vpack.c.bf16 %v1463_v28, %v1462_v60  ;;  %v6495_v1 = vpop.f32.mrf.mxu0  ;;  %v33_v60 = vld [vmem:[%s8365_s1 + $0x50] sm:$0xff] }
 0x18f   :  { %v6457_v12 = vadd.f32 %v6374_v9, %v717_v50  ;;  %v1479_v50 = vpack.c.bf16 %v1465_v35, %v1464_v14  ;;  %1685 = vperm.xlu1 %5447, %v33_v60   ;;  %v4694_v60 = vld [vmem:[%s8364_s0 + $0x121] sm:$0xff] }
 0x190   :  { %v1045_v61 = vpop.f32.mrf.mxu1  ;;  %1582 = vmatmul.bf16.gmra.mxu0 %v1478_v24 }
 0x191   :  { %1391 = vmatmul.bf16.gmra.mxu3 %v1295_v21 }
 0x192   :  { %1695 = vperm.xlu0 %5446, %v35_v62  }
 0x194   :  { %v682_v43 = vpop.f32.mrf.mxu3 }
 0x195   :  { %v718_v13 = vadd.f32 %v682_v43, %v6113_v49  ;;  %v4691_v49 = vld [vmem:[%s8364_s0 + $0x109] sm:$0xff]  ;;  %v4692_v43 = vld [vmem:[%s8364_s0 + $0x111] sm:$0xff] }
 0x196   :  { %v1226_v63 = vpop.f32.mrf.mxu2  ;;  %v1296_v25 = vpack.c.bf16 %v4691_v49, %v4690_v27  ;;  %v1466_v27 = vld [vmem:[%s8364_s0 + $0x7a] sm:$0xff] }
 0x197   :  { %v900_v9 = vadd.f32 %v864_v3, %v718_v13 }
 0x198   :  { %v6468_v47 = vpop.f32.mrf.mxu1 }
 0x199   :  { %v1081_v33 = vadd.f32 %v1045_v61, %v900_v9  ;;  %v6504_v61 = vpop.f32.mrf.mxu0 }
 0x19b   :  { %v6478_v22 = vadd.f32 %v1226_v63, %v1081_v33  ;;  %v31_v33 = vld [vmem:[%s8365_s1 + $0x40] sm:$0xff] }
 0x19c   :  { %v684_v59 = vpop.f32.mrf.mxu3  ;;  %1675 = vperm.xlu2 %5448, %v31_v33   ;;  %v1469_v33 = vld [vmem:[%s8364_s0 + $0x92] sm:$0xff] }
 0x19d   :  { %v719_v54 = vadd.f32 %v684_v59, %v6137_v29  ;;  %v1467_v59 = vld [vmem:[%s8364_s0 + $0x82] sm:$0xff] }
 0x19e   :  { %v6481_v3 = vpop.f32.mrf.mxu2 }
 0x19f   :  { %v6490_v44 = vadd.f32 %v6403_v2, %v719_v54 }
 0x1a0   :  { %v1050_v29 = vpop.f32.mrf.mxu1  ;;  %1587 = vmatmul.bf16.gmra.mxu0 %v1479_v50 }
 0x1a1   :  { %1396 = vmatmul.bf16.gmra.mxu3 %v1296_v25  ;;  %v6529_v54 = vpop.f32.mrf.mxu0  ;;  %v1480_v25 = vpack.c.bf16 %v1467_v59, %v1466_v27 }
 0x1a4   :  { %v687_v21 = vpop.f32.mrf.mxu3 }
 0x1a5   :  { %v720_v4 = vadd.f32 %v687_v21, %v6145_v39  ;;  %v4693_v39 = vld [vmem:[%s8364_s0 + $0x119] sm:$0xff] }
 0x1a6   :  { %v1231_v17 = vpop.f32.mrf.mxu2  ;;  %v1297_v9 = vpack.c.bf16 %v4693_v39, %v4692_v43  ;;  %v39_v43 = vld [vmem:[%s8365_s1 + $0x80] sm:$0xff] }
 0x1a7   :  { %v902_v2 = vadd.f32 %v6426_v41, %v720_v4 }
 0x1a8   :  { %v6502_v28 = vpop.f32.mrf.mxu1 }
 0x1a9   :  { %v1083_v24 = vadd.f32 %v1050_v29, %v902_v2  ;;  %v886_v4 = vpop.f32.mrf.mxu0  ;;  %v4695_v2 = vld [vmem:[%s8364_s0 + $0x129] sm:$0xff] }
 0x1ab   :  { %v6512_v13 = vadd.f32 %v1231_v17, %v1083_v24 }
 0x1ac   :  { %v689_v63 = vpop.f32.mrf.mxu3 }
 0x1ad   :  { %v721_v15 = vadd.f32 %v689_v63, %v6164_v46  ;;  %v1298_v63 = vpack.c.bf16 %v4695_v2, %v4694_v60  ;;  %v4696_v60 = vld [vmem:[%s8364_s0 + $0x131] sm:$0xff] }
 0x1ae   :  { %v6515_v41 = vpop.f32.mrf.mxu2 }
 0x1af   :  { %v6524_v49 = vadd.f32 %v6434_v7, %v721_v15  ;;  %v36_v7 = vld [vmem:[%s8365_s1 + $0x68] sm:$0xff] }
 0x1b0   :  { %v1055_v46 = vpop.f32.mrf.mxu1  ;;  %1592 = vmatmul.bf16.gmra.mxu0 %v1480_v25  ;;  %1700 = vperm.xlu1 %5447, %v36_v7  }
 0x1b1   :  { %1401 = vmatmul.bf16.gmra.mxu3 %v1297_v9  ;;  %v1468_v9 = vld [vmem:[%s8364_s0 + $0x8a] sm:$0xff]  ;;  %v1558_v25 = vpop.f32.mrf.mxu0 }
 0x1b2   :  { %v1481_v59 = vpack.c.bf16 %v1469_v33, %v1468_v9  ;;  %v1471_v33 = vld [vmem:[%s8364_s0 + $0xa2] sm:$0xff] }
 0x1b4   :  { %v692_v14 = vpop.f32.mrf.mxu3 }
 0x1b5   :  { %v722_v35 = vadd.f32 %v692_v14, %v6174_v8  ;;  %v38_v8 = vld [vmem:[%s8365_s1 + $0x78] sm:$0xff] }
 0x1b6   :  { %v1236_v29 = vpop.f32.mrf.mxu2  ;;  %1710 = vperm.xlu0 %5446, %v38_v8   ;;  %v42_v14 = vld [vmem:[%s8365_s1 + $0x98] sm:$0xff] }
 0x1b7   :  { %v904_v50 = vadd.f32 %v6462_v5, %v722_v35 }
 0x1b8   :  { %v6539_v21 = vpop.f32.mrf.mxu1  ;;  %1715 = vperm.xlu1 %5447, %v39_v43  }
 0x1b9   :  { %v1085_v17 = vadd.f32 %v1055_v46, %v904_v50  ;;  %v6580_v4 = vpop.f32.mrf.mxu0 }
 0x1bb   :  { %v6550_v24 = vadd.f32 %v1236_v29, %v1085_v17 }
 0x1bc   :  { %v694_v5 = vpop.f32.mrf.mxu3 }
 0x1bd   :  { %v723_v39 = vadd.f32 %v694_v5, %v6199_v57  ;;  %v41_v57 = vld [vmem:[%s8365_s1 + $0x90] sm:$0xff] }
 0x1be   :  { %v6556_v15 = vpop.f32.mrf.mxu2  ;;  %1725 = vperm.xlu0 %5446, %v41_v57  }
 0x1bf   :  { %v6565_v27 = vadd.f32 %v6470_v19, %v723_v39  ;;  %v34_v19 = vld [vmem:[%s8365_s1 + $0x58] sm:$0xff]  ;;  %v37_v39 = vld [vmem:[%s8365_s1 + $0x70] sm:$0xff] }
 0x1c0   :  { %v1060_v46 = vpop.f32.mrf.mxu1  ;;  %1597 = vmatmul.bf16.gmra.mxu0 %v1481_v59  ;;  %1730 = vperm.xlu1 %5447, %v42_v14  }
 0x1c1   :  { %1406 = vmatmul.bf16.gmra.mxu3 %v1298_v63  ;;  %1690 = vperm.xlu2 %5448, %v34_v19   ;;  %v1470_v63 = vld [vmem:[%s8364_s0 + $0x9a] sm:$0xff] }
 0x1c2   :  { %v1482_v59 = vpack.c.bf16 %v1471_v33, %v1470_v63 }
 0x1c4   :  { %v697_v62 = vpop.f32.mrf.mxu3 }
 0x1c5   :  { %v724_v7 = vadd.f32 %v697_v62, %v6206_v45  ;;  %v4697_v45 = vld [vmem:[%s8364_s0 + $0x139] sm:$0xff] }
 0x1c6   :  { %v1241_v35 = vpop.f32.mrf.mxu2  ;;  %v1299_v43 = vpack.c.bf16 %v4697_v45, %v4696_v60 }
 0x1c7   :  { %v906_v29 = vadd.f32 %v6495_v1, %v724_v7  ;;  %v40_v7 = vld [vmem:[%s8365_s1 + $0x88] sm:$0xff] }
 0x1c8   :  { %v6578_v50 = vpop.f32.mrf.mxu1 }
 0x1c9   :  { %8407 = vst [vmem:[#allocation3_spill] sm:$0xff] %v6578_v50  ;;  %v1087_v17 = vadd.f32 %v1060_v46, %v906_v29  ;;  %1705 = vperm.xlu2 %5448, %v37_v39  }
 0x1cb   :  { %v6588_v2 = vadd.f32 %v1241_v35, %v1087_v17  ;;  %v4698_v17 = vld [vmem:[%s8364_s0 + $0x141] sm:$0xff] }
 0x1cc   :  { %v699_v8 = vpop.f32.mrf.mxu3 }
 0x1cd   :  { %v725_v5 = vadd.f32 %v699_v8, %v6230_v18  ;;  %v1563_v18 = vpop.f32.mrf.mxu0 }
 0x1ce   :  { %v6591_v1 = vpop.f32.mrf.mxu2 }
 0x1cf   :  { %8408 = vst [vmem:[#allocation4_spill] sm:$0xff] %v6591_v1  ;;  %v6600_v9 = vadd.f32 %v6504_v61, %v725_v5 }
 0x1d0   :  { %v1065_v46 = vpop.f32.mrf.mxu1  ;;  %1602 = vmatmul.bf16.gmra.mxu0 %v1482_v59 }
 0x1d1   :  { %1411 = vmatmul.bf16.gmra.mxu3 %v1299_v43  ;;  %1720 = vperm.xlu2 %5448, %v40_v7   ;;  %v1472_v43 = vld [vmem:[%s8364_s0 + $0xaa] sm:$0x3] }
 0x1d2   :  { %v1483_v39 = vpack.c.bf16 %v1472_v43, %v1472_v43 }
 0x1d4   :  { %v702_v57 = vpop.f32.mrf.mxu3 }
 0x1d5   :  { %v726_v62 = vadd.f32 %v702_v57, %v6237_v23  ;;  %v6610_v35 = vpop.f32.mrf.mxu0  ;;  %v4699_v23 = vld [vmem:[%s8364_s0 + $0x149] sm:$0xff] }
 0x1d6   :  { %v1246_v14 = vpop.f32.mrf.mxu2  ;;  %v1300_v8 = vpack.c.bf16 %v4699_v23, %v4698_v17  ;;  %v4702_v23 = vld [vmem:[%s8364_s0 + $0x161] sm:$0x3] }
 0x1d7   :  { %v908_v61 = vadd.f32 %v6529_v54, %v726_v62  ;;  %v43_v54 = vld [vmem:[%s8365_s1 + $0xa0] sm:$0x3]  ;;  %v4700_v62 = vld [vmem:[%s8364_s0 + $0x151] sm:$0xff] }
 0x1d8   :  { %v1067_v29 = vpop.f32.mrf.mxu1 }
 0x1d9   :  { %v1089_v19 = vadd.f32 %v1065_v46, %v908_v61  ;;  %1735 = vperm.xlu2 %5448, %v43_v54   ;;  %v5347_v54 = vld [vmem:[%s8366_s3 + $0x38] sm:$0xff] }
 0x1da   :  { %2282 = vmatpush.bf16.msra.mxu2 %v5347_v54 }
 0x1db   :  { %v6618_v60 = vadd.f32 %v1246_v14, %v1089_v19  ;;  %v4701_v14 = vld [vmem:[%s8364_s0 + $0x159] sm:$0xff] }
 0x1dc   :  { %v704_v45 = vpop.f32.mrf.mxu3  ;;  %v1301_v61 = vpack.c.bf16 %v4701_v14, %v4700_v62  ;;  %v5346_v14 = vld [vmem:[%s8366_s3 + $0x30] sm:$0xff] }
 0x1dd   :  { %8409 = vst [vmem:[#allocation5_spill] sm:$0xff] %v6618_v60  ;;  %v1568_v63 = vpop.f32.mrf.mxu0  ;;  %v1072_v60 = vadd.f32 %v6310_v38, %v6332_v52 }
 0x1de   :  { %v1248_v5 = vpop.f32.mrf.mxu2  ;;  %2283 = vmatpush.bf16.msra.mxu2 %v5346_v14 }
 0x1e0   :  { %1607 = vmatmul.bf16.gmra.mxu0 %v1483_v39 }
 0x1e1   :  { %1416 = vmatmul.bf16.gmra.mxu3 %v1300_v8  ;;  %v1302_v8 = vpack.c.bf16 %v4702_v23, %v4702_v23 }
 0x1e4   :  { %v1377_v33 = vpop.f32.mrf.mxu3 }
 0x1e5   :  { %v1431_v59 = vadd.f32 %v1377_v33, %v6281_v6  ;;  %v6629_v57 = vpop.f32.mrf.mxu0 }
 0x1e7   :  { %v6627_v46 = vadd.f32 %v1558_v25, %v1431_v59 }
 0x1ec   :  { %v1379_v7 = vpop.f32.mrf.mxu3 }
 0x1ed   :  { %v1573_v19 = vpop.f32.mrf.mxu0 }
 0x1f1   :  { %1421 = vmatmul.bf16.gmra.mxu3 %v1301_v61 }
 0x1f4   :  { %v1382_v29 = vpop.f32.mrf.mxu3 }
 0x1f5   :  { %v1433_v17 = vadd.f32 %v1382_v29, %v6318_v48  ;;  %v6640_v25 = vpop.f32.mrf.mxu0  ;;  %v5355_v48 = vld [vmem:[%s8366_s3 + $0x78] sm:$0xff] }
 0x1f6   :  { %2171 = vmatpush.bf16.msra.mxu1 %v5355_v48 }
 0x1f7   :  { %v6638_v6 = vadd.f32 %v1563_v18, %v1433_v17  ;;  %v5354_v17 = vld [vmem:[%s8366_s3 + $0x70] sm:$0xff] }
 0x1fa   :  { %2172 = vmatpush.bf16.msra.mxu1 %v5354_v17 }
 0x1fc   :  { %v1384_v45 = vpop.f32.mrf.mxu3 }
 0x1fd   :  { %v1578_v5 = vpop.f32.mrf.mxu0 }
 0x201   :  { %1426 = vmatmul.bf16.gmra.mxu3 %v1302_v8 }
 0x204   :  { %v1387_v18 = vpop.f32.mrf.mxu3 }
 0x205   :  { %v1435_v43 = vadd.f32 %v1387_v18, %v6352_v34  ;;  %v6654_v33 = vpop.f32.mrf.mxu0 }
 0x207   :  { %v6652_v39 = vadd.f32 %v1568_v63, %v1435_v43 }
 0x20c   :  { %v1389_v59 = vpop.f32.mrf.mxu3 }
 0x20d   :  { %v1583_v62 = vpop.f32.mrf.mxu0 }
 0x214   :  { %v1392_v61 = vpop.f32.mrf.mxu3 }
 0x215   :  { %v1437_v29 = vadd.f32 %v1392_v61, %v6384_v55  ;;  %v6665_v34 = vpop.f32.mrf.mxu0  ;;  %v5345_v55 = vld [vmem:[%s8366_s3 + $0x28] sm:$0xff] }
 0x216   :  { %2284 = vmatpush.bf16.msra.mxu2 %v5345_v55 }
 0x217   :  { %v6663_v23 = vadd.f32 %v1573_v19, %v1437_v29  ;;  %v5353_v19 = vld [vmem:[%s8366_s3 + $0x68] sm:$0xff] }
 0x218   :  { %2173 = vmatpush.bf16.msra.mxu1 %v5353_v19  ;;  %v6692_v19 = vpop.permute.xlu1 %1645 }
 0x21c   :  { %v1394_v63 = vpop.f32.mrf.mxu3 }
 0x21d   :  { %v1588_v8 = vpop.f32.mrf.mxu0 }
 0x224   :  { %v1397_v54 = vpop.f32.mrf.mxu3 }
 0x225   :  { %v1439_v48 = vadd.f32 %v1397_v54, %v6413_v42  ;;  %v6670_v43 = vpop.f32.mrf.mxu0  ;;  %v6685_v54 = vpop.permute.xlu0 %1635 }
 0x227   :  { %v6668_v18 = vadd.f32 %v1578_v5, %v1439_v48  ;;  %v1070_v5 = vadd.f32 %v6270_v0, %v6299_v51  ;;  %v5344_v0 = vld [vmem:[%s8366_s3 + $0x20] sm:$0xff]  ;;  %v6699_v51 = vpop.permute.xlu2 %1655 }
 0x228   :  { %2285 = vmatpush.bf16.msra.mxu2 %v5344_v0 }
 0x229   :  { %v1251_v55 = vadd.f32 %v6292_v16, %v1070_v5  ;;  %v1074_v16 = vadd.f32 %v6344_v11, %v6364_v36  ;;  %v5352_v36 = vld [vmem:[%s8366_s3 + $0x60] sm:$0xff] }
 0x22a   :  { %2174 = vmatpush.bf16.msra.mxu1 %v5352_v36 }
 0x22b   :  { %v1432_v50 = vadd.f32 %v1379_v7, %v1251_v55  ;;  %v1255_v7 = vadd.f32 %v6355_v10, %v1074_v16  ;;  %v1787_v10 = vmul.f32 %v6627_v46, %v6627_v46 }
 0x22c   :  { %v1399_v14 = vpop.f32.mrf.mxu3 }
 0x22d   :  { %v6678_v61 = vpop.f32.mrf.mxu0  ;;  %v6707_v38 = vadd.f32 %v6580_v4, %v1432_v50  ;;  %v6723_v50 = vpop.permute.xlu1 %1650  ;;  %v1436_v4 = vadd.f32 %v1389_v59, %v1255_v7 }
 0x234   :  { %v1402_v29 = vpop.f32.mrf.mxu3 }
 0x235   :  { %v1441_v42 = vadd.f32 %v1402_v29, %v6442_v56  ;;  %v6687_v48 = vpop.f32.mrf.mxu0  ;;  %v1253_v56 = vadd.f32 %v6326_v30, %v1072_v60  ;;  %v6709_v29 = vpop.permute.xlu0 %1640  ;;  %v1788_v30 = vmul.f32 %v6707_v38, %v6707_v38 }
 0x236   :  { %v1739_v59 = vmul.f32 %v6709_v29, %v6707_v38 }
 0x237   :  { %v6683_v17 = vadd.f32 %v1583_v62, %v1441_v42  ;;  %v1434_v52 = vadd.f32 %v1384_v45, %v1253_v56  ;;  %v1076_v42 = vadd.f32 %v6376_v53, %v6396_v58  ;;  %v1789_v53 = vmul.f32 %v6638_v6, %v6638_v6  ;;  %v6734_v45 = vpop.permute.xlu2 %1660 }
 0x238   :  { %v1809_v0 = vmul.f32 %v1788_v30, %v6709_v29 }
 0x239   :  { %v6717_v60 = vadd.f32 %v6610_v35, %v1434_v52  ;;  %v1257_v35 = vadd.f32 %v6387_v31, %v1076_v42  ;;  %v1740_v52 = vmul.f32 %v6692_v19, %v6638_v6  ;;  %v1810_v7 = vmul.f32 %v1789_v53, %v6692_v19 }
 0x23b   :  { %v1790_v56 = vmul.f32 %v6717_v60, %v6717_v60  ;;  %v1438_v31 = vadd.f32 %v1394_v63, %v1257_v35  ;;  %v1741_v36 = vmul.f32 %v6723_v50, %v6717_v60 }
 0x23c   :  { %v6694_v1 = vpop.f32.mrf.mxu3 }
 0x23d   :  { %v6704_v62 = vpop.f32.mrf.mxu0  ;;  %v6746_v16 = vpop.permute.xlu0 %1665  ;;  %v6765_v53 = vadd.f32 %v6640_v25, %v1438_v31 }
 0x23f   :  { %v6777_v25 = vpop.permute.xlu2 %1675 }
 0x244   :  { %v1407_v5 = vpop.f32.mrf.mxu3 }
 0x245   :  { %v1443_v11 = vadd.f32 %v1407_v5, %v6478_v22  ;;  %v1078_v22 = vadd.f32 %v6405_v20, %v6421_v40  ;;  %v6736_v55 = vpop.f32.mrf.mxu0  ;;  %v1738_v20 = vmul.f32 %v6685_v54, %v6627_v46  ;;  %v1808_v40 = vmul.f32 %v1787_v10, %v6685_v54 }
 0x246   :  { %v1080_v5 = vadd.f32 %v6432_v26, %v6457_v12 }
 0x247   :  { %v6729_v58 = vadd.f32 %v1588_v8, %v1443_v11  ;;  %v6744_v8 = vadd.f32 %v6629_v57, %v1436_v4  ;;  %v1259_v42 = vadd.f32 %v6416_v32, %v1078_v22  ;;  %v1791_v57 = vmul.f32 %v6652_v39, %v6652_v39  ;;  %v6767_v32 = vpop.permute.xlu1 %1670 }
 0x248   :  { %v1759_v63 = vadd.f32 %v1739_v59, %v1738_v20  ;;  %v1829_v11 = vadd.f32 %v1809_v0, %v1808_v40  ;;  %v1811_v4 = vmul.f32 %v1790_v56, %v6723_v50  ;;  %v1742_v22 = vmul.f32 %v6699_v51, %v6652_v39 }
 0x249   :  { %v1792_v10 = vmul.f32 %v6744_v8, %v6744_v8  ;;  %v1440_v26 = vadd.f32 %v1399_v14, %v1259_v42  ;;  %v1261_v59 = vadd.f32 %v6445_v37, %v1080_v5  ;;  %v1082_v0 = vadd.f32 %v6468_v47, %v6490_v44  ;;  %v6789_v44 = vpop.permute.xlu0 %1680 }
 0x24a   :  { %v1760_v12 = vadd.f32 %v1759_v63, %v1740_v52  ;;  %v1830_v35 = vadd.f32 %v1829_v11, %v1810_v7  ;;  %v1812_v56 = vmul.f32 %v1791_v57, %v6699_v51  ;;  %v1793_v20 = vmul.f32 %v6663_v23, %v6663_v23 }
 0x24b   :  { %v1743_v52 = vmul.f32 %v6734_v45, %v6744_v8  ;;  %v1813_v7 = vmul.f32 %v1792_v10, %v6734_v45  ;;  %v1794_v37 = vmul.f32 %v6765_v53, %v6765_v53  ;;  %v6787_v47 = vadd.f32 %v6654_v33, %v1440_v26 }
 0x24c   :  { %v1409_v30 = vpop.f32.mrf.mxu3  ;;  %v1761_v14 = vadd.f32 %v1760_v12, %v1741_v36  ;;  %v1831_v40 = vadd.f32 %v1830_v35, %v1811_v4  ;;  %v1442_v42 = vadd.f32 %v6694_v1, %v1261_v59  ;;  %v1744_v57 = vmul.f32 %v6746_v16, %v6663_v23 }
 0x24d   :  { %v6779_v31 = vpop.f32.mrf.mxu0  ;;  %v1263_v63 = vadd.f32 %v6481_v3, %v1082_v0  ;;  %v1814_v36 = vmul.f32 %v1793_v20, %v6746_v16  ;;  %v1795_v4 = vmul.f32 %v6668_v18, %v6668_v18  ;;  %v1084_v33 = vadd.f32 %v6502_v28, %v6524_v49  ;;  %v5343_v3 = vld [vmem:[%s8366_s3 + $0x18] sm:$0xff] }
 0x24e   :  { %v1762_v5 = vadd.f32 %v1761_v14, %v1742_v22  ;;  %v1832_v11 = vadd.f32 %v1831_v40, %v1812_v56  ;;  %v1745_v1 = vmul.f32 %v6767_v32, %v6765_v53  ;;  %v1815_v22 = vmul.f32 %v1794_v37, %v6767_v32  ;;  %2286 = vmatpush.bf16.msra.mxu2 %v5343_v3 }
 0x24f   :  { %v1796_v59 = vmul.f32 %v6787_v47, %v6787_v47  ;;  %v6809_v0 = vpop.permute.xlu1 %1685  ;;  %v6812_v28 = vadd.f32 %v6665_v34, %v1442_v42  ;;  %v1746_v56 = vmul.f32 %v6777_v25, %v6668_v18  ;;  %v1816_v40 = vmul.f32 %v1795_v4, %v6777_v25 }
 0x250   :  { %v1763_v26 = vadd.f32 %v1762_v5, %v1743_v52  ;;  %v1833_v35 = vadd.f32 %v1832_v11, %v1813_v7  ;;  %8410 = vst [vmem:[#allocation6_spill] sm:$0xff] %v6809_v0  ;;  %v1797_v52 = vmul.f32 %v6683_v17, %v6683_v17  ;;  %v6822_v7 = vpop.permute.xlu2 %1690  ;;  %v1747_v42 = vmul.f32 %v6789_v44, %v6787_v47 }
 0x251   :  { %8411 = vst [vmem:[#allocation7_spill] sm:$0xff] %v6822_v7 }
 0x252   :  { %v1764_v49 = vadd.f32 %v1763_v26, %v1744_v57  ;;  %v1834_v14 = vadd.f32 %v1833_v35, %v1814_v36  ;;  %v6831_v57 = vpop.permute.xlu0 %1695  ;;  %v1748_v36 = vmul.f32 %v6809_v0, %v6683_v17  ;;  %v1818_v26 = vmul.f32 %v1797_v52, %v6809_v0 }
 0x253   :  { %8412 = vst [vmem:[#allocation8_spill] sm:$0xff] %v6831_v57  ;;  %v1749_v35 = vmul.f32 %v6822_v7, %v6812_v28 }
 0x254   :  { %v1412_v10 = vpop.f32.mrf.mxu3  ;;  %v1765_v34 = vadd.f32 %v1764_v49, %v1745_v1  ;;  %v1835_v5 = vadd.f32 %v1834_v14, %v1815_v22  ;;  %v1799_v1 = vmul.f32 %v6729_v58, %v6729_v58  ;;  %v1750_v49 = vmul.f32 %v6831_v57, %v6729_v58 }
 0x255   :  { %v1445_v12 = vadd.f32 %v1412_v10, %v6512_v13  ;;  %v1444_v13 = vadd.f32 %v1409_v30, %v1263_v63  ;;  %v6824_v37 = vpop.f32.mrf.mxu0  ;;  %v1817_v30 = vmul.f32 %v1796_v59, %v6789_v44  ;;  %v1265_v63 = vadd.f32 %v6515_v41, %v1084_v33  ;;  %v5351_v41 = vld [vmem:[%s8366_s3 + $0x58] sm:$0xff] }
 0x256   :  { %v1766_v11 = vadd.f32 %v1765_v34, %v1746_v56  ;;  %v1836_v10 = vadd.f32 %v1835_v5, %v1816_v40  ;;  %2175 = vmatpush.bf16.msra.mxu1 %v5351_v41  ;;  %v1820_v52 = vmul.f32 %v1799_v1, %v6831_v57 }
 0x257   :  { %v6817_v20 = vadd.f32 %v6678_v61, %v1445_v12  ;;  %v1798_v61 = vmul.f32 %v6812_v28, %v6812_v28  ;;  %v6837_v4 = vadd.f32 %v6670_v43, %v1444_v13  ;;  %v6848_v59 = vpop.permute.xlu1 %1700 }
 0x258   :  { %v1767_v3 = vadd.f32 %v1766_v11, %v1747_v42  ;;  %v1837_v33 = vadd.f32 %v1836_v10, %v1817_v30  ;;  %8413 = vst [vmem:[#allocation9_spill] sm:$0xff] %v6848_v59 }
 0x259   :  { %v1819_v43 = vmul.f32 %v1798_v61, %v6822_v7  ;;  %v1800_v13 = vmul.f32 %v6837_v4, %v6837_v4  ;;  %v1751_v42 = vmul.f32 %v6848_v59, %v6837_v4  ;;  %v1801_v30 = vmul.f32 %v6817_v20, %v6817_v20  ;;  %v6864_v61 = vpop.permute.xlu2 %1705 }
 0x25a   :  { %v1768_v56 = vadd.f32 %v1767_v3, %v1748_v36  ;;  %v1838_v40 = vadd.f32 %v1837_v33, %v1818_v26  ;;  %8414 = vst [vmem:[#allocation10_spill] sm:$0xff] %v6864_v61  ;;  %v1752_v36 = vmul.f32 %v6864_v61, %v6817_v20  ;;  %v6871_v1 = vpop.permute.xlu0 %1710  ;;  %v1086_v33 = vadd.f32 %v6539_v21, %v6565_v27 }
 0x25b   :  { %8415 = vst [vmem:[#allocation11_spill] sm:$0xff] %v6871_v1 }
 0x25c   :  { %v1414_v12 = vpop.f32.mrf.mxu3  ;;  %v1769_v5 = vadd.f32 %v1768_v56, %v1749_v35  ;;  %v1822_v35 = vmul.f32 %v1801_v30, %v6864_v61  ;;  %v1267_v21 = vadd.f32 %v6556_v15, %v1086_v33 }
 0x25d   :  { %v1446_v22 = vadd.f32 %v1414_v12, %v1265_v63  ;;  %v6858_v34 = vpop.f32.mrf.mxu0  ;;  %v1839_v63 = vadd.f32 %v1838_v40, %v1819_v43 }
 0x25e   :  { %v1770_v11 = vadd.f32 %v1769_v5, %v1750_v49 }
 0x25f   :  { %v6855_v14 = vadd.f32 %v6687_v48, %v1446_v22  ;;  %v1821_v48 = vmul.f32 %v1800_v13, %v6848_v59  ;;  %v1840_v26 = vadd.f32 %v1839_v63, %v1820_v52  ;;  %v6883_v40 = vpop.permute.xlu1 %1715 }
 0x260   :  { %v1771_v3 = vadd.f32 %v1770_v11, %v1751_v42  ;;  %8416 = vst [vmem:[#allocation12_spill] sm:$0xff] %v6883_v40 }
 0x261   :  { %v1802_v10 = vmul.f32 %v6855_v14, %v6855_v14  ;;  %v1753_v22 = vmul.f32 %v6871_v1, %v6855_v14  ;;  %v1841_v43 = vadd.f32 %v1840_v26, %v1821_v48  ;;  %v6894_v26 = vpop.permute.xlu2 %1720 }
 0x262   :  { %v1772_v49 = vadd.f32 %v1771_v3, %v1752_v36  ;;  %8417 = vst [vmem:[#allocation13_spill] sm:$0xff] %v6894_v26 }
 0x263   :  { %v1823_v56 = vmul.f32 %v1802_v10, %v6871_v1  ;;  %v1842_v42 = vadd.f32 %v1841_v43, %v1822_v35  ;;  %v8418_v43 = vld [vmem:[#allocation3_spill] sm:$0xff] }
 0x264   :  { %v1417_v12 = vpop.f32.mrf.mxu3  ;;  %v1773_v5 = vadd.f32 %v1772_v49, %v1753_v22  ;;  %v1088_v49 = vadd.f32 %v8418_v43, %v6600_v9  ;;  %v5361_v43 = vld [vmem:[%s8366_s3 + $0xa8] sm:$0xff] }
 0x265   :  { %v1447_v41 = vadd.f32 %v1417_v12, %v6550_v24  ;;  %v1610_v52 = vpop.f32.mrf.mxu0  ;;  %v1843_v27 = vadd.f32 %v1842_v42, %v1823_v56  ;;  %v6907_v56 = vpop.permute.xlu0 %1725 }
 0x266   :  { %8419 = vst [vmem:[#allocation3_spill] sm:$0xff] %v6907_v56 }
 0x267   :  { %v6881_v13 = vadd.f32 %v6704_v62, %v1447_v41 }
 0x269   :  { %v1754_v30 = vmul.f32 %v6883_v40, %v6881_v13  ;;  %v1803_v24 = vmul.f32 %v6881_v13, %v6881_v13 }
 0x26b   :  { %v1774_v63 = vadd.f32 %v1773_v5, %v1754_v30  ;;  %v1824_v11 = vmul.f32 %v1803_v24, %v6883_v40  ;;  %v8420_v5 = vld [vmem:[#allocation4_spill] sm:$0xff] }
 0x26c   :  { %v1419_v48 = vpop.f32.mrf.mxu3  ;;  %v1269_v30 = vadd.f32 %v8420_v5, %v1088_v49  ;;  %v6941_v49 = vpop.permute.xlu2 %1735 }
 0x26d   :  { %v1844_v62 = vadd.f32 %v1843_v27, %v1824_v11  ;;  %v1448_v36 = vadd.f32 %v1419_v48, %v1267_v21  ;;  %v6921_v11 = vpop.permute.xlu1 %1730 }
 0x26e   :  { %8421 = vst [vmem:[#allocation4_spill] sm:$0xff] %v6921_v11 }
 0x26f   :  { %v6892_v10 = vadd.f32 %v6736_v55, %v1448_v36 }
 0x271   :  { %v1755_v12 = vmul.f32 %v6894_v26, %v6892_v10  ;;  %v1804_v3 = vmul.f32 %v6892_v10, %v6892_v10 }
 0x273   :  { %v1775_v35 = vadd.f32 %v1774_v63, %v1755_v12  ;;  %v1825_v15 = vmul.f32 %v1804_v3, %v6894_v26 }
 0x274   :  { %v1422_v22 = vpop.f32.mrf.mxu3 }
 0x275   :  { %v1845_v41 = vadd.f32 %v1844_v62, %v1825_v15  ;;  %v1449_v33 = vadd.f32 %v1422_v22, %v6588_v2  ;;  %v8422_v15 = vld [vmem:[#allocation5_spill] sm:$0xff] }
 0x276   :  { %8423 = vst [vmem:[#allocation5_spill] sm:$0xff] %v6941_v49 }
 0x277   :  { %v6905_v55 = vadd.f32 %v6779_v31, %v1449_v33  ;;  %v5363_v31 = vld [vmem:[%s8366_s3 + $0xb8] sm:$0xff] }
 0x278   :  { %2442 = vmatpush.bf16.msrb.mxu3 %v5363_v31  ;;  %v5371_v33 = vld [vmem:[%s8366_s3 + $0xf8] sm:$0xff] }
 0x279   :  { %v1756_v52 = vmul.f32 %v6907_v56, %v6905_v55  ;;  %v1805_v42 = vmul.f32 %v6905_v55, %v6905_v55  ;;  %2623 = vmatpush.bf16.msrb.mxu0 %v5371_v33 }
 0x27b   :  { %v1776_v24 = vadd.f32 %v1775_v35, %v1756_v52  ;;  %v1826_v21 = vmul.f32 %v1805_v42, %v6907_v56 }
 0x27c   :  { %v1424_v2 = vpop.f32.mrf.mxu3 }
 0x27d   :  { %v1846_v27 = vadd.f32 %v1845_v41, %v1826_v21  ;;  %v1450_v63 = vadd.f32 %v1424_v2, %v1269_v30  ;;  %v5370_v30 = vld [vmem:[%s8366_s3 + $0xf0] sm:$0xff] }
 0x27e   :  { %2624 = vmatpush.bf16.msrb.mxu0 %v5370_v30 }
 0x27f   :  { %v6916_v9 = vadd.f32 %v6824_v37, %v1450_v63  ;;  %v5362_v37 = vld [vmem:[%s8366_s3 + $0xb0] sm:$0xff] }
 0x280   :  { %2443 = vmatpush.bf16.msrb.mxu3 %v5362_v37 }
 0x281   :  { %v1757_v48 = vmul.f32 %v6921_v11, %v6916_v9  ;;  %v1806_v62 = vmul.f32 %v6916_v9, %v6916_v9 }
 0x283   :  { %v1777_v36 = vadd.f32 %v1776_v24, %v1757_v48  ;;  %v1827_v12 = vmul.f32 %v1806_v62, %v6921_v11  ;;  %v5360_v24 = vld [vmem:[%s8366_s3 + $0xa0] sm:$0xff]  ;;  %v5369_v48 = vld [vmem:[%s8366_s3 + $0xe8] sm:$0xff]  ;;  %v5359_v62 = vld [vmem:[%s8366_s3 + $0x98] sm:$0xff] }
 0x284   :  { %v1427_v3 = vpop.f32.mrf.mxu3  ;;  %2444 = vmatpush.bf16.msrb.mxu3 %v5361_v43  ;;  %2625 = vmatpush.bf16.msrb.mxu0 %v5369_v48 }
 0x285   :  { %v1847_v35 = vadd.f32 %v1846_v27, %v1827_v12  ;;  %v1451_v22 = vadd.f32 %v1427_v3, %v8422_v15  ;;  %v5368_v15 = vld [vmem:[%s8366_s3 + $0xe0] sm:$0xff] }
 0x287   :  { %v6933_v41 = vadd.f32 %v6858_v34, %v1451_v22 }
 0x288   :  { %2445 = vmatpush.bf16.msrb.mxu3 %v5360_v24  ;;  %2626 = vmatpush.bf16.msrb.mxu0 %v5368_v15  ;;  %v5349_v15 = vld [vmem:[%s8366_s3 + $0x48] sm:$0xff] }
 0x289   :  { %v1758_v52 = vmul.f32 %v6941_v49, %v6933_v41  ;;  %v1807_v42 = vmul.f32 %v6933_v41, %v6933_v41 }
 0x28b   :  { %v1779_v34 = vsel %vm1778_vm0, %v1758_v52, 0.0  ;;  %v1828_v5 = vmul.f32 %v1807_v42, %v6941_v49  ;;  %v5463_v42 = vmov 0.0  }
 0x28c   :  { %v1780_v21 = vadd.f32 %v1779_v34, %v1777_v36  ;;  %v1429_v2 = vpop.f32.mrf.mxu3  ;;  %2446 = vmatpush.bf16.msrb.mxu3 %v5359_v62  ;;  %2001 = vst [vmem:[#allocation2] sm:$0xff] %v5463_v42  ;;  %v5367_v34 = vld [vmem:[%s8366_s3 + $0xd8] sm:$0xff] }
 0x28d   :  { %v1848_v27 = vsel %vm1778_vm0, %v1828_v5, 0.0  ;;  %v5357_v5 = vld [vmem:[%s8366_s3 + $0x88] sm:$0xff]  ;;  %2002 = vst [vmem:[#allocation2 + $0x8] sm:$0x3] %v5463_v42  ;;  %2627 = vmatpush.bf16.msrb.mxu0 %v5367_v34 }
 0x28e   :  { %v1781_v63 = vrot.slane %v1780_v21, 4  ;;  %v1849_v31 = vadd.f32 %v1848_v27, %v1847_v35  ;;  %v5358_v35 = vld [vmem:[%s8366_s3 + $0x90] sm:$0xff]  ;;  %2003 = vst [vmem:[#allocation2 + $0xac] sm:$0xff] %v5463_v42 }
 0x28f   :  { %2004 = vst [vmem:[#allocation2 + $0xb4] sm:$0x3] %v5463_v42  ;;  %v5342_v27 = vld [vmem:[%s8366_s3 + $0x10] sm:$0xff] }
 0x290   :  { %v1782_v12 = vadd.f32 %v1781_v63, %v1780_v21  ;;  %v1850_v37 = vrot.slane %v1849_v31, 4  ;;  %2447 = vmatpush.bf16.msrb.mxu3 %v5358_v35  ;;  %v5350_v63 = vld [vmem:[%s8366_s3 + $0x50] sm:$0xff]  ;;  %2287 = vmatpush.bf16.msra.mxu2 %v5342_v27 }
 0x291   :  { %2176 = vmatpush.bf16.msra.mxu1 %v5350_v63  ;;  %v5387_v63 = vld [vmem:[%s8366_s3 + $0x178] sm:$0xff] }
 0x292   :  { %v1783_v36 = vrot.slane %v1782_v12, 2  ;;  %v1851_v3 = vadd.f32 %v1850_v37, %v1849_v31  ;;  %v5366_v31 = vld [vmem:[%s8366_s3 + $0xd0] sm:$0xff]  ;;  %v5356_v37 = vld [vmem:[%s8366_s3 + $0x80] sm:$0xff] }
 0x293   :  { %2628 = vmatpush.bf16.msrb.mxu0 %v5366_v31  ;;  %v5379_v31 = vld [vmem:[%s8366_s3 + $0x138] sm:$0xff] }
 0x294   :  { %v1784_v22 = vadd.f32 %v1783_v36, %v1782_v12  ;;  %v1852_v33 = vrot.slane %v1851_v3, 2  ;;  %2448 = vmatpush.bf16.msrb.mxu3 %v5357_v5 }
 0x295   :  { %2177 = vmatpush.bf16.msra.mxu1 %v5349_v15 }
 0x296   :  { %v1785_v43 = vrot.slane %v1784_v22, 1  ;;  %v1853_v52 = vadd.f32 %v1852_v33, %v1851_v3  ;;  %v5341_v3 = vld [vmem:[%s8366_s3 + $0x8] sm:$0xff]  ;;  %v5348_v33 = vld [vmem:[%s8366_s3 + $0x40] sm:$0xff] }
 0x297   :  { %2288 = vmatpush.bf16.msra.mxu2 %v5341_v3 }
 0x298   :  { %v1786_v30 = vadd.f32 %v1785_v43, %v1784_v22  ;;  %v1854_v24 = vrot.slane %v1853_v52, 1  ;;  %2449 = vmatpush.bf16.msrb.mxu3 %v5356_v37  ;;  %v5340_v22 = vld [vmem:[%s8366_s3] sm:$0xff] }
 0x299   :  { %2178 = vmatpush.bf16.msra.mxu1 %v5348_v33 }
 0x29a   :  { %v1855_v21 = vadd.f32 %v1854_v24, %v1853_v52  ;;  %v6978_v2 = vmul.f32 0.0078125, %v1786_v30  ;;  %v5364_v52 = vld [vmem:[%s8366_s3 + $0xc0] sm:$0xff] }
 0x29b   :  { %2289 = vmatpush.bf16.msra.mxu2 %v5340_v22 }
 0x29c   :  { %v1857_v48 = vmul.f32 0.0078125, %v1855_v21  ;;  %v1858_v62 = vmul.f32 %v6978_v2, %v6978_v2  ;;  %v1891_v12 = vsub.f32 %v6933_v41, %v6978_v2  ;;  %v5365_v41 = vld [vmem:[%s8366_s3 + $0xc8] sm:$0xff]  ;;  %v1872_v3 = vsub.f32 %v6707_v38, %v6978_v2 }
 0x29d   :  { %2629 = vmatpush.bf16.msrb.mxu0 %v5365_v41  ;;  %2804 = vmatpush.bf16.msrb.mxu1 %v5379_v31  ;;  %v1873_v15 = vsub.f32 %v6638_v6, %v6978_v2  ;;  %v1874_v41 = vsub.f32 %v6717_v60, %v6978_v2  ;;  %v1875_v22 = vsub.f32 %v6652_v39, %v6978_v2  ;;  %v7049_v6 = vld [vmem:[%s8367_s4] ss:$0 sm:$0xff] }
 0x29e   :  { %v1859_v36 = vsub.f32 %v1857_v48, %v1858_v62  ;;  %v1876_v33 = vsub.f32 %v6744_v8, %v6978_v2  ;;  %v1878_v38 = vsub.f32 %v6765_v53, %v6978_v2  ;;  %v1879_v39 = vsub.f32 %v6668_v18, %v6978_v2 }
 0x29f   :  { %2985 = vmatpush.bf16.msrb.mxu2 %v5387_v63  ;;  %v1880_v60 = vsub.f32 %v6787_v47, %v6978_v2  ;;  %v1881_v8 = vsub.f32 %v6683_v17, %v6978_v2  ;;  %v1883_v53 = vsub.f32 %v6729_v58, %v6978_v2  ;;  %v1885_v18 = vsub.f32 %v6817_v20, %v6978_v2  ;;  %v7071_v17 = vld [vmem:[%s8367_s4 + $0x1] ss:$0 sm:$0xff] }
 0x2a0   :  { %v1860_v35 = vadd.f32 1e-05, %v1859_v36  ;;  %v1871_v36 = vsub.f32 %v6627_v46, %v6978_v2  ;;  %v1877_v46 = vsub.f32 %v6663_v23, %v6978_v2  ;;  %v1882_v23 = vsub.f32 %v6812_v28, %v6978_v2 }
 0x2a1   :  { %2630 = vmatpush.bf16.msrb.mxu0 %v5364_v52 }
 0x2a2   :  { %5455 = vrsqrt.f32 %v1860_v35  ;;  %vm1867_vm2 = vweird.f32 %v1860_v35 }
 0x2a8   :  { %v5456_v21 = vpop.eup %5455 }
 0x2a9   :  { %v1862_v27 = vmul.f32 %v5456_v21, %v1860_v35  ;;  %vm1868_vm1 = vweird.f32 %v5456_v21 }
 0x2aa   :  { %vm1869_vm3 = vmor %vm1867_vm2, %vm1868_vm1 }
 0x2ab   :  { %v1863_v48 = vmul.f32 %v5456_v21, %v1862_v27  ;;  %v1884_v27 = vsub.f32 %v6837_v4, %v6978_v2 }
 0x2ad   :  { %v1864_v62 = vmul.f32 0.5, %v1863_v48 }
 0x2af   :  { %v1865_v37 = vsub.f32 1.5, %v1864_v62 }
 0x2b1   :  { %v1866_v52 = vmul.f32 %v5456_v21, %v1865_v37 }
 0x2b3   :  { %v7059_v35 = vsel %vm1869_vm3, %v5456_v21, %v1866_v52 }
 0x2b4   :  { %v1912_v63 = vmul.f32 %v1891_v12, %v7059_v35  ;;  %v1892_v47 = vmul.f32 %v1871_v36, %v7059_v35  ;;  %v1893_v21 = vmul.f32 %v1872_v3, %v7059_v35  ;;  %v1894_v31 = vmul.f32 %v1873_v15, %v7059_v35 }
 0x2b5   :  { %v1895_v48 = vmul.f32 %v1874_v41, %v7059_v35  ;;  %v1896_v62 = vmul.f32 %v1875_v22, %v7059_v35  ;;  %v1897_v37 = vmul.f32 %v1876_v33, %v7059_v35  ;;  %v1898_v52 = vmul.f32 %v1877_v46, %v7059_v35 }
 0x2b6   :  { %v1935_v12 = vmul.f32 %v7049_v6, %v1912_v63  ;;  %v1915_v24 = vmul.f32 %v7049_v6, %v1892_v47  ;;  %v1916_v30 = vmul.f32 %v7049_v6, %v1893_v21  ;;  %v1917_v36 = vmul.f32 %v7049_v6, %v1894_v31 }
 0x2b7   :  { %v1918_v3 = vmul.f32 %v7049_v6, %v1895_v48  ;;  %v1919_v15 = vmul.f32 %v7049_v6, %v1896_v62  ;;  %v1920_v41 = vmul.f32 %v7049_v6, %v1897_v37  ;;  %v1921_v22 = vmul.f32 %v7049_v6, %v1898_v52 }
 0x2b8   :  { %v1958_v33 = vadd.f32 %v7071_v17, %v1935_v12  ;;  %v1938_v46 = vadd.f32 %v7071_v17, %v1915_v24  ;;  %v1939_v63 = vadd.f32 %v7071_v17, %v1916_v30  ;;  %v1940_v47 = vadd.f32 %v7071_v17, %v1917_v36  ;;  %v5386_v24 = vld [vmem:[%s8366_s3 + $0x170] sm:$0xff]  ;;  %v2345_v12 = vld [vmem:[#allocation2 + $0x2] sm:$0xff] }
 0x2b9   :  { %v1941_v21 = vadd.f32 %v7071_v17, %v1918_v3  ;;  %v1942_v31 = vadd.f32 %v7071_v17, %v1919_v15  ;;  %v1943_v48 = vadd.f32 %v7071_v17, %v1920_v41  ;;  %v1944_v62 = vadd.f32 %v7071_v17, %v1921_v22  ;;  %v5378_v30 = vld [vmem:[%s8366_s3 + $0x130] sm:$0xff]  ;;  %2986 = vmatpush.bf16.msrb.mxu2 %v5386_v24 }
 0x2ba   :  { %v1979_v5 = vmax.f32 %v1958_v33, 0.0  ;;  %v1959_v37 = vmax.f32 %v1938_v46, 0.0  ;;  %v1960_v34 = vmax.f32 %v1939_v63, 0.0  ;;  %v1961_v52 = vmax.f32 %v1940_v47, 0.0  ;;  %2805 = vmatpush.bf16.msrb.mxu1 %v5378_v30 }
 0x2bb   :  { %v1962_v36 = vmax.f32 %v1941_v21, 0.0  ;;  %v1963_v3 = vmax.f32 %v1942_v31, 0.0  ;;  %v1964_v15 = vmax.f32 %v1943_v48, 0.0  ;;  %v1965_v43 = vmax.f32 %v1944_v62, 0.0 }
 0x2bc   :  { %v2000_v41 = vmul.f32 %v1979_v5, %v6941_v49  ;;  %v7104_v22 = vmul.f32 %v1959_v37, %v6685_v54  ;;  %v7107_v33 = vmul.f32 %v1960_v34, %v6709_v29  ;;  %v7110_v46 = vmul.f32 %v1961_v52, %v6692_v19 }
 0x2bd   :  { %v7113_v63 = vmul.f32 %v1962_v36, %v6723_v50  ;;  %v7116_v47 = vmul.f32 %v1963_v3, %v6699_v51  ;;  %v7119_v21 = vmul.f32 %v1964_v15, %v6734_v45  ;;  %v7122_v5 = vmul.f32 %v1965_v43, %v6746_v16 }
 0x2be   :  { %2025 = vst [vmem:[#allocation2 + $0xaa] sm:$0x3] %v2000_v41  ;;  %v2366_v34 = vpack.c.bf16 %v7104_v22, %v2345_v12  ;;  %v7127_v31 = vpack.c.bf16 %v7110_v46, %v7107_v33  ;;  %v1899_v48 = vmul.f32 %v1878_v38, %v7059_v35  ;;  %v1900_v62 = vmul.f32 %v1879_v39, %v7059_v35  ;;  %v2074_v41 = vld [vmem:[#allocation2 + $0x1] sm:$0xff] }
 0x2bf   :  { %2005 = vst [vmem:[#allocation2 + $0xa] sm:$0xff] %v7104_v22  ;;  %v7134_v37 = vpack.c.bf16 %v7116_v47, %v7113_v63  ;;  %v7138_v43 = vpack.c.bf16 %v7122_v5, %v7119_v21  ;;  %v1901_v52 = vmul.f32 %v1880_v60, %v7059_v35  ;;  %v1902_v24 = vmul.f32 %v1881_v8, %v7059_v35 }
 0x2c0   :  { %2450 = vmatmul.bf16.vlgmr.msrb.gmra.mxu3 %v2366_v34  ;;  %2006 = vst [vmem:[#allocation2 + $0x12] sm:$0xff] %v7107_v33  ;;  %v1922_v38 = vmul.f32 %v7049_v6, %v1899_v48  ;;  %v1923_v39 = vmul.f32 %v7049_v6, %v1900_v62  ;;  %v1903_v30 = vmul.f32 %v1882_v23, %v7059_v35 }
 0x2c1   :  { %2007 = vst [vmem:[#allocation2 + $0x1a] sm:$0xff] %v7110_v46  ;;  %v1924_v12 = vmul.f32 %v7049_v6, %v1901_v52  ;;  %v1925_v60 = vmul.f32 %v7049_v6, %v1902_v24  ;;  %v1904_v8 = vmul.f32 %v1883_v53, %v7059_v35  ;;  %v1905_v36 = vmul.f32 %v1884_v27, %v7059_v35 }
 0x2c2   :  { %2008 = vst [vmem:[#allocation2 + $0x22] sm:$0xff] %v7113_v63  ;;  %v1945_v28 = vadd.f32 %v7071_v17, %v1922_v38  ;;  %v1946_v23 = vadd.f32 %v7071_v17, %v1923_v39  ;;  %v1926_v3 = vmul.f32 %v7049_v6, %v1903_v30  ;;  %v1906_v15 = vmul.f32 %v1885_v18, %v7059_v35 }
 0x2c3   :  { %2009 = vst [vmem:[#allocation2 + $0x2a] sm:$0xff] %v7116_v47  ;;  %v1947_v58 = vadd.f32 %v7071_v17, %v1924_v12  ;;  %v1948_v4 = vadd.f32 %v7071_v17, %v1925_v60  ;;  %v1927_v53 = vmul.f32 %v7049_v6, %v1904_v8  ;;  %v1928_v27 = vmul.f32 %v7049_v6, %v1905_v36 }
 0x2c4   :  { %2010 = vst [vmem:[#allocation2 + $0x32] sm:$0xff] %v7119_v21  ;;  %v1966_v34 = vmax.f32 %v1945_v28, 0.0  ;;  %v1967_v48 = vmax.f32 %v1946_v23, 0.0  ;;  %v1949_v62 = vadd.f32 %v7071_v17, %v1926_v3  ;;  %v1929_v20 = vmul.f32 %v7049_v6, %v1906_v15 }
 0x2c5   :  { %2011 = vst [vmem:[#allocation2 + $0x3a] sm:$0xff] %v7122_v5  ;;  %v1968_v18 = vmax.f32 %v1947_v58, 0.0  ;;  %v1969_v52 = vmax.f32 %v1948_v4, 0.0  ;;  %v1950_v24 = vadd.f32 %v7071_v17, %v1927_v53  ;;  %v1951_v38 = vadd.f32 %v7071_v17, %v1928_v27 }
 0x2c6   :  { %v2075_v39 = vld [vmem:[#allocation2 + $0x9] sm:$0xff]  ;;  %v7180_v12 = vmul.f32 %v1966_v34, %v6767_v32  ;;  %v7183_v60 = vmul.f32 %v1967_v48, %v6777_v25  ;;  %v1970_v8 = vmax.f32 %v1949_v62, 0.0  ;;  %v1952_v36 = vadd.f32 %v7071_v17, %v1929_v20 }
 0x2c7   :  { %v2027_v30 = vld [vmem:[#allocation2 + $0x8] sm:$0xff]  ;;  %v2095_v28 = vpack.c.bf16 %v2075_v39, %v2074_v41  ;;  %v7187_v3 = vld [vmem:[#allocation2 + $0x11] sm:$0xff]  ;;  %v7190_v15 = vmul.f32 %v1968_v18, %v6789_v44  ;;  %v7193_v58 = vmul.f32 %v1969_v52, %v6809_v0  ;;  %v1972_v62 = vmax.f32 %v1951_v38, 0.0 }
 0x2c8   :  { %v2047_v23 = vpack.c.bf16 %v2027_v30, %v5463_v42  ;;  %v2547_v4 = vpack.c.bf16 %v7187_v3, %v2075_v39  ;;  %2012 = vst [vmem:[#allocation2 + $0x42] sm:$0xff] %v7180_v12  ;;  %v7199_v53 = vpack.c.bf16 %v7183_v60, %v7180_v12  ;;  %v7202_v27 = vmul.f32 %v1970_v8, %v6822_v7  ;;  %v5385_v34 = vld [vmem:[%s8366_s3 + $0x168] sm:$0xff] }
 0x2c9   :  { %v1971_v42 = vmax.f32 %v1950_v24, 0.0  ;;  %2179 = vmatmul.bf16.vlgmr.msra.gmra.mxu1 %v2095_v28  ;;  %2013 = vst [vmem:[#allocation2 + $0x4a] sm:$0xff] %v7183_v60  ;;  %v7207_v41 = vpack.c.bf16 %v7193_v58, %v7190_v15  ;;  %v1973_v20 = vmax.f32 %v1952_v36, 0.0  ;;  %v8424_v18 = vsub.f32 %v6855_v14, %v6978_v2  ;;  %2987 = vmatpush.bf16.msrb.mxu2 %v5385_v34 }
 0x2ca   :  { %2290 = vmatmul.bf16.vlgmr.msra.gmra.mxu2 %v2047_v23  ;;  %2631 = vmatmul.bf16.vlgmr.msrb.gmra.mxu0 %v2547_v4  ;;  %2014 = vst [vmem:[#allocation2 + $0x52] sm:$0xff] %v7190_v15  ;;  %v8425_v24 = vsub.f32 %v6881_v13, %v6978_v2  ;;  %v7231_v38 = vmul.f32 %v1972_v62, %v6848_v59 }
 0x2cb   :  { %v7214_v48 = vmul.f32 %v1971_v42, %v6831_v57  ;;  %2015 = vst [vmem:[#allocation2 + $0x5a] sm:$0xff] %v7193_v58  ;;  %v1907_v52 = vmul.f32 %v8424_v18, %v7059_v35  ;;  %v7235_v14 = vmul.f32 %v1973_v20, %v6864_v61  ;;  %v8426_v36 = vsub.f32 %v6892_v10, %v6978_v2  ;;  %v2529_v10 = vld [vmem:[#allocation2 + $0x21] sm:$0xff] }
 0x2cc   :  { %v1908_v39 = vmul.f32 %v8425_v24, %v7059_v35  ;;  %2016 = vst [vmem:[#allocation2 + $0x62] sm:$0xff] %v7202_v27  ;;  %v8427_v23 = vsub.f32 %v6905_v55, %v6978_v2  ;;  %v8428_v42 = vsub.f32 %v6916_v9, %v6978_v2  ;;  %v5396_v61 = vld [vmem:[%s8366_s3 + $0x1c0] sm:$0xff] }
 0x2cd   :  { %v7228_v30 = vpack.c.bf16 %v7214_v48, %v7202_v27  ;;  %2017 = vst [vmem:[#allocation2 + $0x6a] sm:$0xff] %v7214_v48  ;;  %v1930_v8 = vmul.f32 %v7049_v6, %v1907_v52  ;;  %v1909_v28 = vmul.f32 %v8426_v36, %v7059_v35  ;;  %v7255_v62 = vpack.c.bf16 %v7235_v14, %v7231_v38 }
 0x2ce   :  { %2018 = vst [vmem:[#allocation2 + $0x72] sm:$0xff] %v7231_v38  ;;  %v1931_v13 = vmul.f32 %v7049_v6, %v1908_v39  ;;  %v1910_v4 = vmul.f32 %v8427_v23, %v7059_v35  ;;  %v1911_v34 = vmul.f32 %v8428_v42, %v7059_v35  ;;  %v2077_v23 = vld [vmem:[#allocation2 + $0x19] sm:$0xff]  ;;  %v2028_v42 = vld [vmem:[#allocation2 + $0x10] sm:$0xff] }
 0x2cf   :  { %2019 = vst [vmem:[#allocation2 + $0x7a] sm:$0xff] %v7235_v14  ;;  %v1953_v20 = vadd.f32 %v7071_v17, %v1930_v8  ;;  %v1932_v18 = vmul.f32 %v7049_v6, %v1909_v28 }
 0x2d0   :  { %2455 = vmatmul.bf16.gmra.mxu3 %v7127_v31  ;;  %v1954_v55 = vadd.f32 %v7071_v17, %v1931_v13  ;;  %v1933_v9 = vmul.f32 %v7049_v6, %v1910_v4  ;;  %v1934_v35 = vmul.f32 %v7049_v6, %v1911_v34  ;;  %v2029_v13 = vld [vmem:[#allocation2 + $0x18] sm:$0xff] }
 0x2d1   :  { %v1974_v2 = vmax.f32 %v1953_v20, 0.0  ;;  %v1955_v24 = vadd.f32 %v7071_v17, %v1932_v18  ;;  %v2096_v18 = vpack.c.bf16 %v2077_v23, %v7187_v3 }
 0x2d2   :  { %v1975_v52 = vmax.f32 %v1954_v55, 0.0  ;;  %v1956_v39 = vadd.f32 %v7071_v17, %v1933_v9  ;;  %v1957_v36 = vadd.f32 %v7071_v17, %v1934_v35  ;;  %v2048_v9 = vpack.c.bf16 %v2029_v13, %v2028_v42  ;;  %v2032_v13 = vld [vmem:[#allocation2 + $0x30] sm:$0xff] }
 0x2d3   :  { %v7268_v8 = vmul.f32 %v1974_v2, %v6871_v1  ;;  %v1976_v4 = vmax.f32 %v1955_v24, 0.0 }
 0x2d4   :  { %v7272_v28 = vmul.f32 %v1975_v52, %v6883_v40  ;;  %v1977_v20 = vmax.f32 %v1956_v39, 0.0  ;;  %v1978_v6 = vmax.f32 %v1957_v36, 0.0  ;;  %v2548_v52 = vpack.c.bf16 %v2529_v10, %v2077_v23  ;;  %v5377_v36 = vld [vmem:[%s8366_s3 + $0x128] sm:$0xff]  ;;  %v2531_v23 = vld [vmem:[#allocation2 + $0x31] sm:$0xff] }
 0x2d5   :  { %2020 = vst [vmem:[#allocation2 + $0x82] sm:$0xff] %v7268_v8  ;;  %v7281_v17 = vmul.f32 %v1976_v4, %v6894_v26  ;;  %2806 = vmatpush.bf16.msrb.mxu1 %v5377_v36  ;;  %v5384_v4 = vld [vmem:[%s8366_s3 + $0x160] sm:$0xff] }
 0x2d6   :  { %2021 = vst [vmem:[#allocation2 + $0x8a] sm:$0xff] %v7272_v28  ;;  %v7278_v34 = vpack.c.bf16 %v7272_v28, %v7268_v8  ;;  %v7284_v55 = vmul.f32 %v1977_v20, %v6907_v56  ;;  %v7288_v2 = vmul.f32 %v1978_v6, %v6921_v11  ;;  %v5376_v6 = vld [vmem:[%s8366_s3 + $0x120] sm:$0xff]  ;;  %2988 = vmatpush.bf16.msrb.mxu2 %v5384_v4  ;;  %v5375_v4 = vld [vmem:[%s8366_s3 + $0x118] sm:$0xff] }
 0x2d7   :  { %2022 = vst [vmem:[#allocation2 + $0x92] sm:$0xff] %v7281_v17  ;;  %v2081_v20 = vld [vmem:[#allocation2 + $0x39] sm:$0xff]  ;;  %v2537_v39 = vld [vmem:[#allocation2 + $0x61] sm:$0xff] }
 0x2d8   :  { %v7295_v24 = vpack.c.bf16 %v7284_v55, %v7281_v17  ;;  %2023 = vst [vmem:[#allocation2 + $0x9a] sm:$0xff] %v7284_v55 }
 0x2d9   :  { %2184 = vmatmul.bf16.gmra.mxu1 %v2096_v18  ;;  %2024 = vst [vmem:[#allocation2 + $0xa2] sm:$0xff] %v7288_v2  ;;  %v2079_v18 = vld [vmem:[#allocation2 + $0x29] sm:$0xff] }
 0x2da   :  { %2295 = vmatmul.bf16.gmra.mxu2 %v2048_v9  ;;  %2636 = vmatmul.bf16.gmra.mxu0 %v2548_v52  ;;  %v2030_v9 = vld [vmem:[#allocation2 + $0x20] sm:$0xff]  ;;  %v2031_v52 = vld [vmem:[#allocation2 + $0x28] sm:$0xff]  ;;  %v2097_v42 = vpack.c.bf16 %v2079_v18, %v2529_v10  ;;  %v2549_v3 = vpack.c.bf16 %v2531_v23, %v2079_v18  ;;  %v2033_v10 = vld [vmem:[#allocation2 + $0x38] sm:$0xff]  ;;  %v2098_v18 = vpack.c.bf16 %v2081_v20, %v2531_v23 }
 0x2db   :  { %v2049_v36 = vpack.c.bf16 %v2031_v52, %v2030_v9  ;;  %2807 = vmatpush.bf16.msrb.mxu1 %v5376_v6  ;;  %v2533_v9 = vld [vmem:[#allocation2 + $0x41] sm:$0xff]  ;;  %v2083_v6 = vld [vmem:[#allocation2 + $0x49] sm:$0xff] }
 0x2dc   :  { %v2550_v52 = vpack.c.bf16 %v2533_v9, %v2081_v20  ;;  %v2035_v23 = vld [vmem:[#allocation2 + $0x48] sm:$0xff]  ;;  %v2099_v20 = vpack.c.bf16 %v2083_v6, %v2533_v9  ;;  %v5374_v9 = vld [vmem:[%s8366_s3 + $0x110] sm:$0xff] }
 0x2df   :  { %2808 = vmatpush.bf16.msrb.mxu1 %v5375_v4  ;;  %v2037_v4 = vld [vmem:[#allocation2 + $0x58] sm:$0xff] }
 0x2e0   :  { %2460 = vmatmul.bf16.gmra.mxu3 %v7134_v37  ;;  %v2545_v26 = vld [vmem:[#allocation2 + $0xa1] sm:$0xff] }
 0x2e3   :  { %2809 = vmatpush.bf16.msrb.mxu1 %v5374_v9 }
 0x2e9   :  { %2189 = vmatmul.bf16.gmra.mxu1 %v2097_v42  ;;  %v2050_v42 = vpack.c.bf16 %v2033_v10, %v2032_v13  ;;  %v2535_v13 = vld [vmem:[#allocation2 + $0x51] sm:$0xff] }
 0x2ea   :  { %2300 = vmatmul.bf16.gmra.mxu2 %v2049_v36  ;;  %2641 = vmatmul.bf16.gmra.mxu0 %v2549_v3  ;;  %v5383_v3 = vld [vmem:[%s8366_s3 + $0x158] sm:$0xff]  ;;  %v2034_v36 = vld [vmem:[#allocation2 + $0x40] sm:$0xff] }
 0x2eb   :  { %2989 = vmatpush.bf16.msrb.mxu2 %v5383_v3  ;;  %v2051_v10 = vpack.c.bf16 %v2035_v23, %v2034_v36  ;;  %v2036_v3 = vld [vmem:[#allocation2 + $0x50] sm:$0xff]  ;;  %v2038_v36 = vld [vmem:[#allocation2 + $0x60] sm:$0xff]  ;;  %v2039_v23 = vld [vmem:[#allocation2 + $0x68] sm:$0xff] }
 0x2ec   :  { %v2052_v49 = vpack.c.bf16 %v2037_v4, %v2036_v3 }
 0x2f0   :  { %2465 = vmatmul.bf16.gmra.mxu3 %v7138_v43 }
 0x2f9   :  { %2194 = vmatmul.bf16.gmra.mxu1 %v2098_v18  ;;  %v2551_v18 = vpack.c.bf16 %v2535_v13, %v2083_v6  ;;  %v2087_v6 = vld [vmem:[#allocation2 + $0x69] sm:$0xff] }
 0x2fa   :  { %2305 = vmatmul.bf16.gmra.mxu2 %v2050_v42  ;;  %2646 = vmatmul.bf16.gmra.mxu0 %v2550_v52  ;;  %v5382_v42 = vld [vmem:[%s8366_s3 + $0x150] sm:$0xff]  ;;  %v2085_v52 = vld [vmem:[#allocation2 + $0x59] sm:$0xff] }
 0x2fb   :  { %2990 = vmatpush.bf16.msrb.mxu2 %v5382_v42  ;;  %v2100_v35 = vpack.c.bf16 %v2085_v52, %v2535_v13  ;;  %v2552_v11 = vpack.c.bf16 %v2537_v39, %v2085_v52  ;;  %v2040_v13 = vld [vmem:[#allocation2 + $0x70] sm:$0xff]  ;;  %v2541_v52 = vld [vmem:[#allocation2 + $0x81] sm:$0xff] }
 0x300   :  { %2470 = vmatmul.bf16.gmra.mxu3 %v7199_v53 }
 0x309   :  { %2199 = vmatmul.bf16.gmra.mxu1 %v2099_v20  ;;  %v2539_v20 = vld [vmem:[#allocation2 + $0x71] sm:$0xff] }
 0x30a   :  { %2310 = vmatmul.bf16.gmra.mxu2 %v2051_v10  ;;  %2651 = vmatmul.bf16.gmra.mxu0 %v2551_v18  ;;  %v2101_v10 = vpack.c.bf16 %v2087_v6, %v2537_v39  ;;  %v2053_v18 = vpack.c.bf16 %v2039_v23, %v2038_v36  ;;  %v2553_v42 = vpack.c.bf16 %v2539_v20, %v2087_v6  ;;  %v2041_v39 = vld [vmem:[#allocation2 + $0x78] sm:$0xff]  ;;  %v5394_v23 = vld [vmem:[%s8366_s3 + $0x1b0] sm:$0xff] }
 0x30b   :  { %v2054_v4 = vpack.c.bf16 %v2041_v39, %v2040_v13  ;;  %v5395_v6 = vld [vmem:[%s8366_s3 + $0x1b8] sm:$0xff]  ;;  %v2043_v13 = vld [vmem:[#allocation2 + $0x88] sm:$0xff] }
 0x30c   :  { %v5403_v36 = vld [vmem:[%s8366_s3 + $0x1f8] sm:$0xff]  ;;  %3166 = vmatpush.bf16.msra.mxu3 %v5395_v6 }
 0x30d   :  { %3347 = vmatpush.bf16.msra.mxu0 %v5403_v36  ;;  %v2543_v39 = vld [vmem:[#allocation2 + $0x91] sm:$0xff]  ;;  %v5392_v36 = vld [vmem:[%s8366_s3 + $0x1a0] sm:$0xff] }
 0x310   :  { %2475 = vmatmul.bf16.gmra.mxu3 %v7207_v41 }
 0x311   :  { %3167 = vmatpush.bf16.msra.mxu3 %v5394_v23  ;;  %v5400_v23 = vld [vmem:[%s8366_s3 + $0x1e0] sm:$0xff] }
 0x319   :  { %2204 = vmatmul.bf16.gmra.mxu1 %v2100_v35  ;;  %v2089_v35 = vld [vmem:[#allocation2 + $0x79] sm:$0xff] }
 0x31a   :  { %2315 = vmatmul.bf16.gmra.mxu2 %v2052_v49  ;;  %2656 = vmatmul.bf16.gmra.mxu0 %v2552_v11  ;;  %v5381_v11 = vld [vmem:[%s8366_s3 + $0x148] sm:$0xff]  ;;  %v2102_v3 = vpack.c.bf16 %v2089_v35, %v2539_v20  ;;  %v2554_v9 = vpack.c.bf16 %v2541_v52, %v2089_v35  ;;  %v5402_v20 = vld [vmem:[%s8366_s3 + $0x1f0] sm:$0xff]  ;;  %v2042_v35 = vld [vmem:[#allocation2 + $0x80] sm:$0xff] }
 0x31b   :  { %v5373_v49 = vld [vmem:[%s8366_s3 + $0x108] sm:$0xff]  ;;  %2991 = vmatpush.bf16.msrb.mxu2 %v5381_v11  ;;  %3348 = vmatpush.bf16.msra.mxu0 %v5402_v20  ;;  %v2055_v6 = vpack.c.bf16 %v2043_v13, %v2042_v35  ;;  %v5372_v20 = vld [vmem:[%s8366_s3 + $0x100] sm:$0xff] }
 0x31c   :  { %2810 = vmatpush.bf16.msrb.mxu1 %v5373_v49  ;;  %v2091_v49 = vld [vmem:[#allocation2 + $0x89] sm:$0xff] }
 0x320   :  { %2480 = vmatmul.bf16.gmra.mxu3 %v7228_v30  ;;  %2811 = vmatpush.bf16.msrb.mxu1 %v5372_v20  ;;  %v5397_v20 = vld [vmem:[%s8366_s3 + $0x1c8] sm:$0xff] }
 0x329   :  { %2209 = vmatmul.bf16.gmra.mxu1 %v2101_v10  ;;  %v5380_v10 = vld [vmem:[%s8366_s3 + $0x140] sm:$0xff] }
 0x32a   :  { %2320 = vmatmul.bf16.gmra.mxu2 %v2053_v18  ;;  %2661 = vmatmul.bf16.gmra.mxu0 %v2553_v42  ;;  %v5393_v18 = vld [vmem:[%s8366_s3 + $0x1a8] sm:$0xff] }
 0x32b   :  { %v5401_v42 = vld [vmem:[%s8366_s3 + $0x1e8] sm:$0xff]  ;;  %2992 = vmatpush.bf16.msrb.mxu2 %v5380_v10  ;;  %3168 = vmatpush.bf16.msra.mxu3 %v5393_v18  ;;  %v2555_v10 = vpack.c.bf16 %v2543_v39, %v2091_v49 }
 0x32c   :  { %3349 = vmatpush.bf16.msra.mxu0 %v5401_v42  ;;  %v5399_v42 = vld [vmem:[%s8366_s3 + $0x1d8] sm:$0xff] }
 0x32f   :  { %3169 = vmatpush.bf16.msra.mxu3 %v5392_v36  ;;  %v5398_v36 = vld [vmem:[%s8366_s3 + $0x1d0] sm:$0xff] }
 0x330   :  { %2485 = vmatmul.bf16.gmra.mxu3 %v7255_v62  ;;  %3350 = vmatpush.bf16.msra.mxu0 %v5400_v23 }
 0x334   :  { %3351 = vmatpush.bf16.msra.mxu0 %v5399_v42  ;;  %v2044_v42 = vld [vmem:[#allocation2 + $0x90] sm:$0xff] }
 0x338   :  { %3352 = vmatpush.bf16.msra.mxu0 %v5398_v36  ;;  %v5388_v36 = vld [vmem:[%s8366_s3 + $0x180] sm:$0xff] }
 0x339   :  { %2214 = vmatmul.bf16.gmra.mxu1 %v2102_v3 }
 0x33a   :  { %2325 = vmatmul.bf16.gmra.mxu2 %v2054_v4  ;;  %2666 = vmatmul.bf16.gmra.mxu0 %v2554_v9  ;;  %v2103_v9 = vpack.c.bf16 %v2091_v49, %v2541_v52  ;;  %v5391_v52 = vld [vmem:[%s8366_s3 + $0x198] sm:$0xff] }
 0x33b   :  { %3170 = vmatpush.bf16.msra.mxu3 %v5391_v52  ;;  %v2093_v52 = vld [vmem:[#allocation2 + $0x99] sm:$0xff] }
 0x33c   :  { %3353 = vmatpush.bf16.msra.mxu0 %v5397_v20  ;;  %v2556_v59 = vpack.c.bf16 %v2545_v26, %v2093_v52 }
 0x340   :  { %2490 = vmatmul.bf16.gmra.mxu3 %v7278_v34  ;;  %3354 = vmatpush.bf16.msra.mxu0 %v5396_v61 }
 0x343   :  { %v2451_v11 = vpop.f32.mrf.mxu3 }
 0x346   :  { %v2180_v3 = vpop.f32.mrf.mxu1 }
 0x347   :  { %v2632_v4 = vpop.f32.mrf.mxu0 }
 0x349   :  { %2219 = vmatmul.bf16.gmra.mxu1 %v2103_v9 }
 0x34a   :  { %2330 = vmatmul.bf16.gmra.mxu2 %v2055_v6  ;;  %2671 = vmatmul.bf16.gmra.mxu0 %v2555_v10  ;;  %v5390_v6 = vld [vmem:[%s8366_s3 + $0x190] sm:$0xff] }
 0x34b   :  { %v2453_v18 = vpop.f32.mrf.mxu3  ;;  %3171 = vmatpush.bf16.msra.mxu3 %v5390_v6  ;;  %v2104_v6 = vpack.c.bf16 %v2093_v52, %v2543_v39  ;;  %v5419_v39 = vld [vmem:[%s8368_s5 + $0x38] sm:$0xff] }
 0x34c   :  { %3928 = vmatpush.bf16.msra.mxu2 %v5419_v39 }
 0x34d   :  { %v2291_v35 = vpop.f32.mrf.mxu2 }
 0x34e   :  { %v2292_v13 = vadd.f32 %v2291_v35, %v2180_v3  ;;  %v2182_v56 = vpop.f32.mrf.mxu1  ;;  %v5389_v3 = vld [vmem:[%s8366_s3 + $0x188] sm:$0xff]  ;;  %v2045_v35 = vld [vmem:[#allocation2 + $0x98] sm:$0xff] }
 0x34f   :  { %v2634_v9 = vpop.f32.mrf.mxu0  ;;  %3172 = vmatpush.bf16.msra.mxu3 %v5389_v3  ;;  %v2056_v1 = vpack.c.bf16 %v2045_v35, %v2044_v42  ;;  %v2365_v3 = vld [vmem:[#allocation2 + $0xa2] sm:$0x3] }
 0x350   :  { %v2505_v49 = vadd.f32 %v2451_v11, %v2292_v13  ;;  %2495 = vmatmul.bf16.gmra.mxu3 %v7295_v24  ;;  %v2376_v35 = vpack.c.bf16 %v2365_v3, %v2365_v3 }
 0x352   :  { %v7392_v23 = vadd.f32 %v2632_v4, %v2505_v49 }
 0x353   :  { %v2456_v11 = vpop.f32.mrf.mxu3  ;;  %3173 = vmatpush.bf16.msra.mxu3 %v5388_v36  ;;  %v2546_v36 = vld [vmem:[#allocation2 + $0xa9] sm:$0x3] }
 0x355   :  { %v2293_v10 = vpop.f32.mrf.mxu2 }
 0x356   :  { %v2294_v13 = vadd.f32 %v2293_v10, %v2182_v56  ;;  %v2185_v40 = vpop.f32.mrf.mxu1 }
 0x357   :  { %v2637_v49 = vpop.f32.mrf.mxu0 }
 0x358   :  { %v2506_v4 = vadd.f32 %v2453_v18, %v2294_v13 }
 0x359   :  { %2224 = vmatmul.bf16.gmra.mxu1 %v2104_v6  ;;  %v2046_v6 = vld [vmem:[#allocation2 + $0xa0] sm:$0x3] }
 0x35a   :  { %2335 = vmatmul.bf16.gmra.mxu2 %v2056_v1  ;;  %v7406_v56 = vadd.f32 %v2634_v9, %v2506_v4  ;;  %2676 = vmatmul.bf16.gmra.mxu0 %v2556_v59  ;;  %v5411_v1 = vld [vmem:[%s8366_s3 + $0x238] sm:$0xff]  ;;  %v2094_v4 = vld [vmem:[#allocation2 + $0xa1] sm:$0x3] }
 0x35b   :  { %v2458_v18 = vpop.f32.mrf.mxu3  ;;  %3528 = vmatpush.bf16.msra.mxu1 %v5411_v1  ;;  %v2105_v3 = vpack.c.bf16 %v2094_v4, %v2094_v4 }
 0x35d   :  { %v2296_v20 = vpop.f32.mrf.mxu2 }
 0x35e   :  { %v2297_v10 = vadd.f32 %v2296_v20, %v2185_v40  ;;  %v2187_v42 = vpop.f32.mrf.mxu1 }
 0x35f   :  { %v2639_v26 = vpop.f32.mrf.mxu0 }
 0x360   :  { %v2507_v13 = vadd.f32 %v2456_v11, %v2297_v10  ;;  %2500 = vmatmul.bf16.gmra.mxu3 %v2376_v35  ;;  %v2057_v11 = vpack.c.bf16 %v2046_v6, %v2046_v6  ;;  %v2557_v10 = vpack.c.bf16 %v2546_v36, %v2546_v36  ;;  %v2888_v6 = vld [vmem:[#allocation2 + $0xb] sm:$0xff]  ;;  %v3251_v36 = vld [vmem:[#allocation2 + $0x1b] sm:$0xff] }
 0x362   :  { %v7414_v59 = vadd.f32 %v2637_v49, %v2507_v13 }
 0x363   :  { %v2461_v9 = vpop.f32.mrf.mxu3 }
 0x365   :  { %v2298_v52 = vpop.f32.mrf.mxu2 }
 0x366   :  { %v2299_v61 = vadd.f32 %v2298_v52, %v2187_v42  ;;  %v2190_v39 = vpop.f32.mrf.mxu1  ;;  %v5418_v42 = vld [vmem:[%s8368_s5 + $0x30] sm:$0xff] }
 0x367   :  { %v2642_v20 = vpop.f32.mrf.mxu0  ;;  %3929 = vmatpush.bf16.msra.mxu2 %v5418_v42 }
 0x368   :  { %v2508_v40 = vadd.f32 %v2458_v18, %v2299_v61  ;;  %v5410_v18 = vld [vmem:[%s8366_s3 + $0x230] sm:$0xff] }
 0x369   :  { %2229 = vmatmul.bf16.gmra.mxu1 %v2105_v3  ;;  %v2889_v61 = vld [vmem:[#allocation2 + $0x13] sm:$0xff] }
 0x36a   :  { %2340 = vmatmul.bf16.gmra.mxu2 %v2057_v11  ;;  %v7416_v57 = vadd.f32 %v2639_v26, %v2508_v40  ;;  %2681 = vmatmul.bf16.gmra.mxu0 %v2557_v10  ;;  %v2909_v11 = vpack.c.bf16 %v2889_v61, %v2888_v6  ;;  %v3271_v10 = vpack.c.bf16 %v3251_v36, %v2889_v61  ;;  %v2891_v61 = vld [vmem:[#allocation2 + $0x23] sm:$0xff] }
 0x36b   :  { %v2463_v35 = vpop.f32.mrf.mxu3  ;;  %3529 = vmatpush.bf16.msra.mxu1 %v5410_v18 }
 0x36d   :  { %v2301_v49 = vpop.f32.mrf.mxu2 }
 0x36e   :  { %v2302_v13 = vadd.f32 %v2301_v49, %v2190_v39  ;;  %v2192_v1 = vpop.f32.mrf.mxu1  ;;  %v8429_v49 = vpack.c.bf16 %v7107_v33, %v7104_v22  ;;  %v3253_v22 = vld [vmem:[#allocation2 + $0x2b] sm:$0xff] }
 0x36f   :  { %v2644_v0 = vpop.f32.mrf.mxu0 }
 0x370   :  { %v2509_v7 = vadd.f32 %v2461_v9, %v2302_v13  ;;  %3174 = vmatmul.bf16.vlgmr.msra.gmra.mxu3 %v7127_v31 }
 0x372   :  { %v7425_v26 = vadd.f32 %v2642_v20, %v2509_v7 }
 0x373   :  { %v2466_v52 = vpop.f32.mrf.mxu3 }
 0x375   :  { %v2303_v4 = vpop.f32.mrf.mxu2 }
 0x376   :  { %v2304_v9 = vadd.f32 %v2303_v4, %v2192_v1  ;;  %v2195_v39 = vpop.f32.mrf.mxu1 }
 0x377   :  { %v2647_v3 = vpop.f32.mrf.mxu0 }
 0x378   :  { %v2510_v40 = vadd.f32 %v2463_v35, %v2304_v9 }
 0x379   :  { %2812 = vmatmul.bf16.vlgmr.msrb.gmra.mxu1 %v8429_v49 }
 0x37a   :  { %2993 = vmatmul.bf16.vlgmr.msrb.gmra.mxu2 %v2909_v11  ;;  %v7430_v31 = vadd.f32 %v2644_v0, %v2510_v40  ;;  %3355 = vmatmul.bf16.vlgmr.msra.gmra.mxu0 %v3271_v10  ;;  %v2910_v40 = vpack.c.bf16 %v2891_v61, %v3251_v36  ;;  %v3272_v10 = vpack.c.bf16 %v3253_v22, %v2891_v61  ;;  %v3255_v61 = vld [vmem:[#allocation2 + $0x3b] sm:$0xff] }
 0x37b   :  { %v2468_v7 = vpop.f32.mrf.mxu3 }
 0x37d   :  { %v2306_v20 = vpop.f32.mrf.mxu2 }
 0x37e   :  { %v2307_v13 = vadd.f32 %v2306_v20, %v2195_v39  ;;  %v2197_v42 = vpop.f32.mrf.mxu1  ;;  %v5417_v39 = vld [vmem:[%s8368_s5 + $0x28] sm:$0xff] }
 0x37f   :  { %v2649_v1 = vpop.f32.mrf.mxu0  ;;  %3930 = vmatpush.bf16.msra.mxu2 %v5417_v39 }
 0x380   :  { %v2511_v18 = vadd.f32 %v2466_v52, %v2307_v13  ;;  %3179 = vmatmul.bf16.gmra.mxu3 %v7134_v37  ;;  %v8430_v52 = vpack.c.bf16 %v7113_v63, %v7110_v46 }
 0x382   :  { %v7433_v35 = vadd.f32 %v2647_v3, %v2511_v18  ;;  %v5409_v3 = vld [vmem:[%s8366_s3 + $0x228] sm:$0xff] }
 0x383   :  { %v2471_v4 = vpop.f32.mrf.mxu3  ;;  %3530 = vmatpush.bf16.msra.mxu1 %v5409_v3 }
 0x385   :  { %v2308_v6 = vpop.f32.mrf.mxu2 }
 0x386   :  { %v2309_v9 = vadd.f32 %v2308_v6, %v2197_v42  ;;  %v2200_v33 = vpop.f32.mrf.mxu1 }
 0x387   :  { %v2652_v0 = vpop.f32.mrf.mxu0 }
 0x388   :  { %v2512_v11 = vadd.f32 %v2468_v7, %v2309_v9 }
 0x389   :  { %2817 = vmatmul.bf16.gmra.mxu1 %v8430_v52 }
 0x38a   :  { %2998 = vmatmul.bf16.gmra.mxu2 %v2910_v40  ;;  %v7441_v37 = vadd.f32 %v2649_v1, %v2512_v11  ;;  %3360 = vmatmul.bf16.gmra.mxu0 %v3272_v10  ;;  %v2893_v1 = vld [vmem:[#allocation2 + $0x33] sm:$0xff] }
 0x38b   :  { %v2473_v49 = vpop.f32.mrf.mxu3  ;;  %v2911_v39 = vpack.c.bf16 %v2893_v1, %v3253_v22  ;;  %v3273_v10 = vpack.c.bf16 %v3255_v61, %v2893_v1 }
 0x38d   :  { %v2311_v36 = vpop.f32.mrf.mxu2 }
 0x38e   :  { %v2312_v7 = vadd.f32 %v2311_v36, %v2200_v33  ;;  %v2202_v20 = vpop.f32.mrf.mxu1  ;;  %v8431_v33 = vpack.c.bf16 %v7119_v21, %v7116_v47  ;;  %v5408_v47 = vld [vmem:[%s8366_s3 + $0x220] sm:$0xff] }
 0x38f   :  { %v2654_v42 = vpop.f32.mrf.mxu0  ;;  %3531 = vmatpush.bf16.msra.mxu1 %v5408_v47 }
 0x390   :  { %v2513_v13 = vadd.f32 %v2471_v4, %v2312_v7  ;;  %3184 = vmatmul.bf16.gmra.mxu3 %v7138_v43  ;;  %v5416_v43 = vld [vmem:[%s8368_s5 + $0x20] sm:$0xff] }
 0x391   :  { %3931 = vmatpush.bf16.msra.mxu2 %v5416_v43 }
 0x392   :  { %v7447_v46 = vadd.f32 %v2652_v0, %v2513_v13  ;;  %v2895_v13 = vld [vmem:[#allocation2 + $0x43] sm:$0xff] }
 0x393   :  { %v2476_v63 = vpop.f32.mrf.mxu3 }
 0x395   :  { %v2313_v18 = vpop.f32.mrf.mxu2 }
 0x396   :  { %v2314_v6 = vadd.f32 %v2313_v18, %v2202_v20  ;;  %v2205_v9 = vpop.f32.mrf.mxu1  ;;  %v3257_v18 = vld [vmem:[#allocation2 + $0x4b] sm:$0xff] }
 0x397   :  { %v2657_v40 = vpop.f32.mrf.mxu0 }
 0x398   :  { %v2514_v11 = vadd.f32 %v2473_v49, %v2314_v6 }
 0x399   :  { %2822 = vmatmul.bf16.gmra.mxu1 %v8431_v33 }
 0x39a   :  { %3003 = vmatmul.bf16.gmra.mxu2 %v2911_v39  ;;  %v7452_v4 = vadd.f32 %v2654_v42, %v2514_v11  ;;  %3365 = vmatmul.bf16.gmra.mxu0 %v3273_v10  ;;  %v2912_v11 = vpack.c.bf16 %v2895_v13, %v3255_v61  ;;  %v8432_v39 = vpack.c.bf16 %v7180_v12, %v7122_v5 }
 0x39b   :  { %v2478_v0 = vpop.f32.mrf.mxu3 }
 0x39d   :  { %v2316_v52 = vpop.f32.mrf.mxu2 }
 0x39e   :  { %v2317_v3 = vadd.f32 %v2316_v52, %v2205_v9  ;;  %v2207_v49 = vpop.f32.mrf.mxu1 }
 0x39f   :  { %v2659_v22 = vpop.f32.mrf.mxu0 }
 0x3a0   :  { %v2515_v36 = vadd.f32 %v2476_v63, %v2317_v3  ;;  %3189 = vmatmul.bf16.gmra.mxu3 %v7199_v53  ;;  %v3274_v63 = vpack.c.bf16 %v3257_v18, %v2895_v13 }
 0x3a2   :  { %v7461_v21 = vadd.f32 %v2657_v40, %v2515_v36 }
 0x3a3   :  { %v2481_v7 = vpop.f32.mrf.mxu3 }
 0x3a5   :  { %v2318_v20 = vpop.f32.mrf.mxu2 }
 0x3a6   :  { %v2319_v42 = vadd.f32 %v2318_v20, %v2207_v49  ;;  %v2210_v1 = vpop.f32.mrf.mxu1  ;;  %v2897_v49 = vld [vmem:[#allocation2 + $0x53] sm:$0xff] }
 0x3a7   :  { %v2662_v9 = vpop.f32.mrf.mxu0 }
 0x3a8   :  { %v2516_v6 = vadd.f32 %v2478_v0, %v2319_v42  ;;  %v5415_v0 = vld [vmem:[%s8368_s5 + $0x18] sm:$0xff]  ;;  %v2913_v42 = vpack.c.bf16 %v2897_v49, %v3257_v18 }
 0x3a9   :  { %2827 = vmatmul.bf16.gmra.mxu1 %v8432_v39  ;;  %3932 = vmatpush.bf16.msra.mxu2 %v5415_v0 }
 0x3aa   :  { %3008 = vmatmul.bf16.gmra.mxu2 %v2912_v11  ;;  %v7466_v10 = vadd.f32 %v2659_v22, %v2516_v6  ;;  %3370 = vmatmul.bf16.gmra.mxu0 %v3274_v63  ;;  %v3259_v22 = vld [vmem:[#allocation2 + $0x5b] sm:$0xff] }
 0x3ab   :  { %v2483_v53 = vpop.f32.mrf.mxu3 }
 0x3ad   :  { %v2321_v40 = vpop.f32.mrf.mxu2 }
 0x3ae   :  { %v2322_v33 = vadd.f32 %v2321_v40, %v2210_v1  ;;  %v2212_v43 = vpop.f32.mrf.mxu1  ;;  %v3275_v1 = vpack.c.bf16 %v3259_v22, %v2897_v49 }
 0x3af   :  { %v2664_v3 = vpop.f32.mrf.mxu0 }
 0x3b0   :  { %v2517_v52 = vadd.f32 %v2481_v7, %v2322_v33  ;;  %3194 = vmatmul.bf16.gmra.mxu3 %v7207_v41  ;;  %v5407_v7 = vld [vmem:[%s8366_s3 + $0x218] sm:$0xff]  ;;  %v8433_v41 = vpack.c.bf16 %v7190_v15, %v7183_v60  ;;  %v3261_v15 = vld [vmem:[#allocation2 + $0x6b] sm:$0xff] }
 0x3b1   :  { %3532 = vmatpush.bf16.msra.mxu1 %v5407_v7 }
 0x3b2   :  { %v7472_v61 = vadd.f32 %v2662_v9, %v2517_v52  ;;  %v2899_v52 = vld [vmem:[#allocation2 + $0x63] sm:$0xff] }
 0x3b3   :  { %v2486_v5 = vpop.f32.mrf.mxu3  ;;  %v2914_v49 = vpack.c.bf16 %v2899_v52, %v3259_v22 }
 0x3b5   :  { %v2323_v12 = vpop.f32.mrf.mxu2 }
 0x3b6   :  { %v2324_v36 = vadd.f32 %v2323_v12, %v2212_v43  ;;  %v2215_v47 = vpop.f32.mrf.mxu1 }
 0x3b7   :  { %v2667_v13 = vpop.f32.mrf.mxu0 }
 0x3b8   :  { %v2518_v20 = vadd.f32 %v2483_v53, %v2324_v36  ;;  %v5414_v36 = vld [vmem:[%s8368_s5 + $0x10] sm:$0xff] }
 0x3b9   :  { %2832 = vmatmul.bf16.gmra.mxu1 %v8433_v41  ;;  %3933 = vmatpush.bf16.msra.mxu2 %v5414_v36 }
 0x3ba   :  { %3013 = vmatmul.bf16.gmra.mxu2 %v2913_v42  ;;  %v7480_v6 = vadd.f32 %v2664_v3, %v2518_v20  ;;  %3375 = vmatmul.bf16.gmra.mxu0 %v3275_v1  ;;  %v5406_v20 = vld [vmem:[%s8366_s3 + $0x210] sm:$0xff] }
 0x3bb   :  { %v2488_v9 = vpop.f32.mrf.mxu3  ;;  %3533 = vmatpush.bf16.msra.mxu1 %v5406_v20 }
 0x3bd   :  { %v2326_v11 = vpop.f32.mrf.mxu2 }
 0x3be   :  { %v2327_v63 = vadd.f32 %v2326_v11, %v2215_v47  ;;  %v2217_v39 = vpop.f32.mrf.mxu1  ;;  %v3276_v47 = vpack.c.bf16 %v3261_v15, %v2899_v52  ;;  %v2901_v11 = vld [vmem:[#allocation2 + $0x73] sm:$0xff] }
 0x3bf   :  { %v2669_v18 = vpop.f32.mrf.mxu0  ;;  %v2915_v52 = vpack.c.bf16 %v2901_v11, %v3261_v15  ;;  %v5405_v15 = vld [vmem:[%s8366_s3 + $0x208] sm:$0xff] }
 0x3c0   :  { %v2519_v53 = vadd.f32 %v2486_v5, %v2327_v63  ;;  %3199 = vmatmul.bf16.gmra.mxu3 %v7228_v30  ;;  %v8434_v5 = vpack.c.bf16 %v7202_v27, %v7193_v58  ;;  %3534 = vmatpush.bf16.msra.mxu1 %v5405_v15 }
 0x3c2   :  { %v7483_v40 = vadd.f32 %v2667_v13, %v2519_v53 }
 0x3c3   :  { %v2491_v33 = vpop.f32.mrf.mxu3 }
 0x3c5   :  { %v2328_v43 = vpop.f32.mrf.mxu2 }
 0x3c6   :  { %v2329_v60 = vadd.f32 %v2328_v43, %v2217_v39  ;;  %v2220_v0 = vpop.f32.mrf.mxu1  ;;  %v3263_v39 = vld [vmem:[#allocation2 + $0x7b] sm:$0xff] }
 0x3c7   :  { %v2672_v12 = vpop.f32.mrf.mxu0 }
 0x3c8   :  { %v2520_v3 = vadd.f32 %v2488_v9, %v2329_v60  ;;  %v3277_v60 = vpack.c.bf16 %v3263_v39, %v2901_v11  ;;  %v8436_v11 = vpack.c.bf16 %v7268_v8, %v7235_v14 }
 0x3c9   :  { %2837 = vmatmul.bf16.gmra.mxu1 %v8434_v5  ;;  %v5413_v5 = vld [vmem:[%s8368_s5 + $0x8] sm:$0xff] }
 0x3ca   :  { %3018 = vmatmul.bf16.gmra.mxu2 %v2914_v49  ;;  %v7491_v30 = vadd.f32 %v2669_v18, %v2520_v3  ;;  %3380 = vmatmul.bf16.gmra.mxu0 %v3276_v47 }
 0x3cb   :  { %v2493_v13 = vpop.f32.mrf.mxu3  ;;  %3934 = vmatpush.bf16.msra.mxu2 %v5413_v5  ;;  %v5404_v5 = vld [vmem:[%s8366_s3 + $0x200] sm:$0xff] }
 0x3cc   :  { %3535 = vmatpush.bf16.msra.mxu1 %v5404_v5 }
 0x3cd   :  { %v2331_v22 = vpop.f32.mrf.mxu2 }
 0x3ce   :  { %v2332_v42 = vadd.f32 %v2331_v22, %v2220_v0  ;;  %v2222_v7 = vpop.f32.mrf.mxu1  ;;  %v8435_v0 = vpack.c.bf16 %v7231_v38, %v7214_v48 }
 0x3cf   :  { %v2674_v41 = vpop.f32.mrf.mxu0 }
 0x3d0   :  { %v2521_v1 = vadd.f32 %v2491_v33, %v2332_v42  ;;  %3204 = vmatmul.bf16.gmra.mxu3 %v7255_v62  ;;  %v3265_v42 = vld [vmem:[#allocation2 + $0x8b] sm:$0xff] }
 0x3d2   :  { %v7497_v58 = vadd.f32 %v2672_v12, %v2521_v1 }
 0x3d3   :  { %v2496_v27 = vpop.f32.mrf.mxu3 }
 0x3d5   :  { %v2333_v9 = vpop.f32.mrf.mxu2 }
 0x3d6   :  { %v2334_v63 = vadd.f32 %v2333_v9, %v2222_v7  ;;  %v2225_v53 = vpop.f32.mrf.mxu1 }
 0x3d7   :  { %v2677_v43 = vpop.f32.mrf.mxu0 }
 0x3d8   :  { %v2522_v18 = vadd.f32 %v2493_v13, %v2334_v63  ;;  %v2903_v13 = vld [vmem:[#allocation2 + $0x83] sm:$0xff] }
 0x3d9   :  { %2842 = vmatmul.bf16.gmra.mxu1 %v8435_v0  ;;  %v3278_v9 = vpack.c.bf16 %v3265_v42, %v2903_v13  ;;  %v5412_v0 = vld [vmem:[%s8368_s5] sm:$0xff] }
 0x3da   :  { %3023 = vmatmul.bf16.gmra.mxu2 %v2915_v52  ;;  %v7502_v33 = vadd.f32 %v2674_v41, %v2522_v18  ;;  %3385 = vmatmul.bf16.gmra.mxu0 %v3277_v60 }
 0x3db   :  { %v2498_v62 = vpop.f32.mrf.mxu3  ;;  %3935 = vmatpush.bf16.msra.mxu2 %v5412_v0 }
 0x3dd   :  { %v2336_v3 = vpop.f32.mrf.mxu2 }
 0x3de   :  { %v2337_v12 = vadd.f32 %v2336_v3, %v2225_v53  ;;  %v2227_v49 = vpop.f32.mrf.mxu1  ;;  %v3267_v3 = vld [vmem:[#allocation2 + $0x9b] sm:$0xff] }
 0x3df   :  { %v2679_v47 = vpop.f32.mrf.mxu0 }
 0x3e0   :  { %v2523_v36 = vadd.f32 %v2496_v27, %v2337_v12  ;;  %3209 = vmatmul.bf16.gmra.mxu3 %v7278_v34  ;;  %v2916_v27 = vpack.c.bf16 %v2903_v13, %v3263_v39 }
 0x3e2   :  { %v7511_v48 = vadd.f32 %v2677_v43, %v2523_v36 }
 0x3e3   :  { %v2501_v38 = vpop.f32.mrf.mxu3 }
 0x3e5   :  { %v2338_v20 = vpop.f32.mrf.mxu2 }
 0x3e6   :  { %v2339_v22 = vadd.f32 %v2338_v20, %v2227_v49  ;;  %v2230_v7 = vpop.f32.mrf.mxu1  ;;  %v3088_v20 = vld [vmem:[#allocation2 + $0xaa] sm:$0xff] }
 0x3e7   :  { %v2682_v41 = vpop.f32.mrf.mxu0 }
 0x3e8   :  { %v2524_v1 = vadd.f32 %v2498_v62, %v2339_v22  ;;  %v2905_v62 = vld [vmem:[#allocation2 + $0x93] sm:$0xff] }
 0x3e9   :  { %2847 = vmatmul.bf16.gmra.mxu1 %v8436_v11  ;;  %v3279_v15 = vpack.c.bf16 %v3267_v3, %v2905_v62 }
 0x3ea   :  { %3028 = vmatmul.bf16.gmra.mxu2 %v2916_v27  ;;  %v7516_v34 = vadd.f32 %v2679_v47, %v2524_v1  ;;  %3390 = vmatmul.bf16.gmra.mxu0 %v3278_v9  ;;  %v2917_v47 = vpack.c.bf16 %v2905_v62, %v3265_v42 }
 0x3eb   :  { %v2503_v63 = vpop.f32.mrf.mxu3 }
 0x3ec   :  { %v3269_v63 = vld [vmem:[#allocation2 + $0xab] sm:$0xff] }
 0x3ed   :  { %v2341_v53 = vpop.f32.mrf.mxu2 }
 0x3ee   :  { %v2342_v18 = vadd.f32 %v2341_v53, %v2230_v7  ;;  %v2232_v43 = vpop.f32.mrf.mxu1 }
 0x3ef   :  { %v2684_v60 = vpop.f32.mrf.mxu0 }
 0x3f0   :  { %v2525_v52 = vadd.f32 %v2501_v38, %v2342_v18  ;;  %3214 = vmatmul.bf16.gmra.mxu3 %v7295_v24  ;;  %v8437_v24 = vpack.c.bf16 %v7281_v17, %v7272_v28  ;;  %v2907_v17 = vld [vmem:[#allocation2 + $0xa3] sm:$0xff] }
 0x3f1   :  { %v2918_v60 = vpack.c.bf16 %v2907_v17, %v3267_v3  ;;  %v3280_v0 = vpack.c.bf16 %v3269_v63, %v2907_v17 }
 0x3f2   :  { %v7522_v39 = vadd.f32 %v2682_v41, %v2525_v52 }
 0x3f3   :  { %v3175_v14 = vpop.f32.mrf.mxu3 }
 0x3f5   :  { %v2343_v8 = vpop.f32.mrf.mxu2 }
 0x3f6   :  { %v2813_v12 = vpop.f32.mrf.mxu1 }
 0x3f7   :  { %v2867_v49 = vadd.f32 %v2813_v12, %v7392_v23  ;;  %v3356_v36 = vpop.f32.mrf.mxu0  ;;  %v3099_v23 = vpack.c.bf16 %v3088_v20, %v7288_v2  ;;  %v2908_v20 = vld [vmem:[#allocation2 + $0xab] sm:$0x3] }
 0x3f9   :  { %2852 = vmatmul.bf16.gmra.mxu1 %v8437_v24 }
 0x3fa   :  { %3033 = vmatmul.bf16.gmra.mxu2 %v2917_v47  ;;  %3395 = vmatmul.bf16.gmra.mxu0 %v3279_v15 }
 0x3fb   :  { %v3177_v38 = vpop.f32.mrf.mxu3 }
 0x3fd   :  { %v2994_v13 = vpop.f32.mrf.mxu2 }
 0x3fe   :  { %v3048_v22 = vadd.f32 %v2994_v13, %v2867_v49  ;;  %v2815_v7 = vpop.f32.mrf.mxu1 }
 0x3ff   :  { %v2868_v1 = vadd.f32 %v2815_v7, %v7406_v56  ;;  %v3358_v41 = vpop.f32.mrf.mxu0  ;;  %v3089_v56 = vld [vmem:[#allocation2 + $0xb2] sm:$0x3] }
 0x400   :  { %v3229_v42 = vadd.f32 %v3175_v14, %v3048_v22  ;;  %3219 = vmatmul.bf16.gmra.mxu3 %v3099_v23  ;;  %v8438_v14 = vpack.c.bf16 %v7288_v2, %v7284_v55  ;;  %v3100_v49 = vpack.c.bf16 %v3089_v56, %v3089_v56  ;;  %v3270_v55 = vld [vmem:[#allocation2 + $0xb3] sm:$0x3] }
 0x401   :  { %v3281_v7 = vpack.c.bf16 %v3270_v55, %v3270_v55  ;;  %v3431_v56 = vld [vmem:[#allocation2 + $0x14] sm:$0xff] }
 0x402   :  { %v7533_v27 = vadd.f32 %v3356_v36, %v3229_v42 }
 0x403   :  { %v3180_v9 = vpop.f32.mrf.mxu3 }
 0x405   :  { %v2996_v28 = vpop.f32.mrf.mxu2 }
 0x406   :  { %v3049_v11 = vadd.f32 %v2996_v28, %v2868_v1  ;;  %v2818_v53 = vpop.f32.mrf.mxu1 }
 0x407   :  { %v2869_v43 = vadd.f32 %v2818_v53, %v7414_v59  ;;  %v3361_v52 = vpop.f32.mrf.mxu0 }
 0x408   :  { %v3230_v18 = vadd.f32 %v3177_v38, %v3049_v11  ;;  %v2727_v38 = vld [vmem:[#allocation2 + $0xaa] sm:$0x3] }
 0x409   :  { %2857 = vmatmul.bf16.gmra.mxu1 %v8438_v14 }
 0x40a   :  { %3038 = vmatmul.bf16.gmra.mxu2 %v2918_v60  ;;  %v7539_v8 = vadd.f32 %v3358_v41, %v3230_v18  ;;  %3400 = vmatmul.bf16.gmra.mxu0 %v3280_v0  ;;  %v2738_v41 = vpack.c.bf16 %v2727_v38, %v2727_v38  ;;  %v5216_v60 = vld [vmem:[%s8364_s0 + $0x230] sm:$0xff] }
 0x40b   :  { %v3182_v62 = vpop.f32.mrf.mxu3 }
 0x40d   :  { %v2999_v12 = vpop.f32.mrf.mxu2 }
 0x40e   :  { %v3050_v36 = vadd.f32 %v2999_v12, %v2869_v43  ;;  %v2820_v47 = vpop.f32.mrf.mxu1 }
 0x40f   :  { %v2870_v59 = vadd.f32 %v2820_v47, %v7416_v57  ;;  %v3363_v15 = vpop.f32.mrf.mxu0 }
 0x410   :  { %v3231_v5 = vadd.f32 %v3180_v9, %v3050_v36  ;;  %3224 = vmatmul.bf16.gmra.mxu3 %v3100_v49  ;;  %v2919_v9 = vpack.c.bf16 %v2908_v20, %v2908_v20 }
 0x412   :  { %v7542_v3 = vadd.f32 %v3361_v52, %v3231_v5 }
 0x413   :  { %v3185_v24 = vpop.f32.mrf.mxu3 }
 0x415   :  { %v3001_v2 = vpop.f32.mrf.mxu2 }
 0x416   :  { %v3051_v13 = vadd.f32 %v3001_v2, %v2870_v59  ;;  %v2823_v22 = vpop.f32.mrf.mxu1 }
 0x417   :  { %v2871_v42 = vadd.f32 %v2823_v22, %v7425_v26  ;;  %v3366_v1 = vpop.f32.mrf.mxu0  ;;  %v5215_v26 = vld [vmem:[%s8364_s0 + $0x228] sm:$0xff] }
 0x418   :  { %v3232_v23 = vadd.f32 %v3182_v62, %v3051_v13  ;;  %v3432_v62 = vld [vmem:[#allocation2 + $0x1c] sm:$0xff]  ;;  %v3853_v49 = vpack.c.bf16 %v5216_v60, %v5215_v26 }
 0x419   :  { %2862 = vmatmul.bf16.gmra.mxu1 %v2738_v41  ;;  %v3452_v59 = vpack.c.bf16 %v3432_v62, %v3431_v56  ;;  %v3433_v41 = vld [vmem:[#allocation2 + $0x24] sm:$0xff] }
 0x41a   :  { %3043 = vmatmul.bf16.gmra.mxu2 %v2919_v9  ;;  %v7545_v57 = vadd.f32 %v3363_v15, %v3232_v23  ;;  %3405 = vmatmul.bf16.gmra.mxu0 %v3281_v7  ;;  %v5218_v23 = vld [vmem:[%s8364_s0 + $0x240] sm:$0xff]  ;;  %v3434_v9 = vld [vmem:[#allocation2 + $0x2c] sm:$0xff] }
 0x41b   :  { %v3187_v28 = vpop.f32.mrf.mxu3 }
 0x41d   :  { %v3004_v17 = vpop.f32.mrf.mxu2 }
 0x41e   :  { %v3052_v11 = vadd.f32 %v3004_v17, %v2871_v42  ;;  %v2825_v63 = vpop.f32.mrf.mxu1 }
 0x41f   :  { %v2872_v18 = vadd.f32 %v2825_v63, %v7430_v31  ;;  %v3368_v43 = vpop.f32.mrf.mxu0 }
 0x420   :  { %v3233_v53 = vadd.f32 %v3185_v24, %v3052_v11 }
 0x422   :  { %v7548_v52 = vadd.f32 %v3366_v1, %v3233_v53 }
 0x423   :  { %v3190_v0 = vpop.f32.mrf.mxu3 }
 0x425   :  { %v3006_v14 = vpop.f32.mrf.mxu2 }
 0x426   :  { %v3053_v12 = vadd.f32 %v3006_v14, %v2872_v18  ;;  %v2828_v36 = vpop.f32.mrf.mxu1  ;;  %v3453_v18 = vpack.c.bf16 %v3434_v9, %v3433_v41 }
 0x427   :  { %v2873_v31 = vadd.f32 %v2828_v36, %v7433_v35  ;;  %v3371_v5 = vpop.f32.mrf.mxu0  ;;  %v5217_v35 = vld [vmem:[%s8364_s0 + $0x238] sm:$0xff]  ;;  %v5220_v36 = vld [vmem:[%s8364_s0 + $0x250] sm:$0xff] }
 0x428   :  { %v3234_v47 = vadd.f32 %v3187_v28, %v3053_v12  ;;  %v3854_v17 = vpack.c.bf16 %v5218_v23, %v5217_v35 }
 0x429   :  { %3536 = vmatmul.bf16.vlgmr.msra.gmra.mxu1 %v3452_v59  ;;  %v3436_v59 = vld [vmem:[#allocation2 + $0x3c] sm:$0xff] }
 0x42a   :  { %3936 = vmatmul.bf16.vlgmr.msra.gmra.mxu2 %v3853_v49  ;;  %v7557_v15 = vadd.f32 %v3368_v43, %v3234_v47 }
 0x42b   :  { %v3192_v24 = vpop.f32.mrf.mxu3 }
 0x42d   :  { %v3009_v55 = vpop.f32.mrf.mxu2 }
 0x42e   :  { %v3054_v2 = vadd.f32 %v3009_v55, %v2873_v31  ;;  %v2830_v38 = vpop.f32.mrf.mxu1 }
 0x42f   :  { %v2874_v13 = vadd.f32 %v2830_v38, %v7441_v37  ;;  %v3373_v22 = vpop.f32.mrf.mxu0 }
 0x430   :  { %v3235_v20 = vadd.f32 %v3190_v0, %v3054_v2 }
 0x432   :  { %v7560_v7 = vadd.f32 %v3371_v5, %v3235_v20  ;;  %v3435_v5 = vld [vmem:[#allocation2 + $0x34] sm:$0xff] }
 0x433   :  { %v3195_v42 = vpop.f32.mrf.mxu3 }
 0x435   :  { %v3011_v1 = vpop.f32.mrf.mxu2 }
 0x436   :  { %v3055_v28 = vadd.f32 %v3011_v1, %v2874_v13  ;;  %v2833_v11 = vpop.f32.mrf.mxu1  ;;  %v3454_v13 = vpack.c.bf16 %v3436_v59, %v3435_v5 }
 0x437   :  { %v2875_v37 = vadd.f32 %v2833_v11, %v7447_v46  ;;  %v3376_v53 = vpop.f32.mrf.mxu0  ;;  %v5219_v46 = vld [vmem:[%s8364_s0 + $0x248] sm:$0xff]  ;;  %v5222_v11 = vld [vmem:[%s8364_s0 + $0x260] sm:$0xff] }
 0x438   :  { %v3236_v63 = vadd.f32 %v3192_v24, %v3055_v28  ;;  %v3855_v55 = vpack.c.bf16 %v5220_v36, %v5219_v46 }
 0x439   :  { %3541 = vmatmul.bf16.gmra.mxu1 %v3453_v18  ;;  %v3438_v18 = vld [vmem:[#allocation2 + $0x4c] sm:$0xff] }
 0x43a   :  { %3941 = vmatmul.bf16.gmra.mxu2 %v3854_v17  ;;  %v7569_v43 = vadd.f32 %v3373_v22, %v3236_v63 }
 0x43b   :  { %v3197_v26 = vpop.f32.mrf.mxu3 }
 0x43d   :  { %v3014_v60 = vpop.f32.mrf.mxu2 }
 0x43e   :  { %v3056_v0 = vadd.f32 %v3014_v60, %v2875_v37  ;;  %v2835_v14 = vpop.f32.mrf.mxu1 }
 0x43f   :  { %v2876_v62 = vadd.f32 %v2835_v14, %v7452_v4  ;;  %v3378_v12 = vpop.f32.mrf.mxu0 }
 0x440   :  { %v3237_v56 = vadd.f32 %v3195_v42, %v3056_v0 }
 0x442   :  { %v7572_v49 = vadd.f32 %v3376_v53, %v3237_v56  ;;  %v3437_v53 = vld [vmem:[#allocation2 + $0x44] sm:$0xff] }
 0x443   :  { %v3200_v47 = vpop.f32.mrf.mxu3 }
 0x445   :  { %v3016_v31 = vpop.f32.mrf.mxu2 }
 0x446   :  { %v3057_v24 = vadd.f32 %v3016_v31, %v2876_v62  ;;  %v2838_v2 = vpop.f32.mrf.mxu1  ;;  %v3455_v62 = vpack.c.bf16 %v3438_v18, %v3437_v53 }
 0x447   :  { %v2877_v4 = vadd.f32 %v2838_v2, %v7461_v21  ;;  %v3381_v20 = vpop.f32.mrf.mxu0  ;;  %v5221_v21 = vld [vmem:[%s8364_s0 + $0x258] sm:$0xff]  ;;  %v5224_v2 = vld [vmem:[%s8364_s0 + $0x270] sm:$0xff] }
 0x448   :  { %v3238_v38 = vadd.f32 %v3197_v26, %v3057_v24  ;;  %v3856_v60 = vpack.c.bf16 %v5222_v11, %v5221_v21 }
 0x449   :  { %3546 = vmatmul.bf16.gmra.mxu1 %v3454_v13  ;;  %v3440_v13 = vld [vmem:[#allocation2 + $0x5c] sm:$0xff] }
 0x44a   :  { %3946 = vmatmul.bf16.gmra.mxu2 %v3855_v55  ;;  %v7581_v22 = vadd.f32 %v3378_v12, %v3238_v38 }
 0x44b   :  { %v3202_v35 = vpop.f32.mrf.mxu3 }
 0x44d   :  { %v3019_v23 = vpop.f32.mrf.mxu2 }
 0x44e   :  { %v3058_v42 = vadd.f32 %v3019_v23, %v2877_v4  ;;  %v2840_v1 = vpop.f32.mrf.mxu1 }
 0x44f   :  { %v2878_v9 = vadd.f32 %v2840_v1, %v7466_v10  ;;  %v3383_v28 = vpop.f32.mrf.mxu0 }
 0x450   :  { %v3239_v41 = vadd.f32 %v3200_v47, %v3058_v42 }
 0x452   :  { %v7584_v17 = vadd.f32 %v3381_v20, %v3239_v41  ;;  %v3439_v20 = vld [vmem:[#allocation2 + $0x54] sm:$0xff] }
 0x453   :  { %v3205_v63 = vpop.f32.mrf.mxu3 }
 0x455   :  { %v3021_v37 = vpop.f32.mrf.mxu2 }
 0x456   :  { %v3059_v26 = vadd.f32 %v3021_v37, %v2878_v9  ;;  %v2843_v0 = vpop.f32.mrf.mxu1  ;;  %v3456_v9 = vpack.c.bf16 %v3440_v13, %v3439_v20 }
 0x457   :  { %v2879_v10 = vadd.f32 %v2843_v0, %v7472_v61  ;;  %v3386_v56 = vpop.f32.mrf.mxu0  ;;  %v5223_v61 = vld [vmem:[%s8364_s0 + $0x268] sm:$0xff]  ;;  %v5226_v0 = vld [vmem:[%s8364_s0 + $0x280] sm:$0xff] }
 0x458   :  { %v3240_v14 = vadd.f32 %v3202_v35, %v3059_v26  ;;  %v3857_v23 = vpack.c.bf16 %v5224_v2, %v5223_v61 }
 0x459   :  { %3551 = vmatmul.bf16.gmra.mxu1 %v3455_v62  ;;  %v3442_v62 = vld [vmem:[#allocation2 + $0x6c] sm:$0xff] }
 0x45a   :  { %3951 = vmatmul.bf16.gmra.mxu2 %v3856_v60  ;;  %v7593_v12 = vadd.f32 %v3383_v28, %v3240_v14 }
 0x45b   :  { %v3207_v46 = vpop.f32.mrf.mxu3 }
 0x45d   :  { %v3024_v36 = vpop.f32.mrf.mxu2 }
 0x45e   :  { %v3060_v47 = vadd.f32 %v3024_v36, %v2879_v10  ;;  %v2845_v31 = vpop.f32.mrf.mxu1 }
 0x45f   :  { %v2880_v59 = vadd.f32 %v2845_v31, %v7480_v6  ;;  %v3388_v24 = vpop.f32.mrf.mxu0 }
 0x460   :  { %v3241_v5 = vadd.f32 %v3205_v63, %v3060_v47 }
 0x462   :  { %v7596_v55 = vadd.f32 %v3386_v56, %v3241_v5  ;;  %v3441_v56 = vld [vmem:[#allocation2 + $0x64] sm:$0xff] }
 0x463   :  { %v3210_v38 = vpop.f32.mrf.mxu3 }
 0x465   :  { %v3026_v4 = vpop.f32.mrf.mxu2 }
 0x466   :  { %v3061_v35 = vadd.f32 %v3026_v4, %v2880_v59  ;;  %v2848_v42 = vpop.f32.mrf.mxu1  ;;  %v3457_v59 = vpack.c.bf16 %v3442_v62, %v3441_v56 }
 0x467   :  { %v2881_v6 = vadd.f32 %v2848_v42, %v7483_v40  ;;  %v3391_v41 = vpop.f32.mrf.mxu0  ;;  %v5225_v40 = vld [vmem:[%s8364_s0 + $0x278] sm:$0xff]  ;;  %v5228_v42 = vld [vmem:[%s8364_s0 + $0x290] sm:$0xff] }
 0x468   :  { %v3242_v1 = vadd.f32 %v3207_v46, %v3061_v35  ;;  %v3858_v36 = vpack.c.bf16 %v5226_v0, %v5225_v40 }
 0x469   :  { %3556 = vmatmul.bf16.gmra.mxu1 %v3456_v9  ;;  %v3444_v9 = vld [vmem:[#allocation2 + $0x7c] sm:$0xff] }
 0x46a   :  { %3956 = vmatmul.bf16.gmra.mxu2 %v3857_v23  ;;  %v7605_v28 = vadd.f32 %v3388_v24, %v3242_v1 }
 0x46b   :  { %v3212_v21 = vpop.f32.mrf.mxu3 }
 0x46d   :  { %v3029_v11 = vpop.f32.mrf.mxu2 }
 0x46e   :  { %v3062_v63 = vadd.f32 %v3029_v11, %v2881_v6  ;;  %v2850_v37 = vpop.f32.mrf.mxu1 }
 0x46f   :  { %v2882_v18 = vadd.f32 %v2850_v37, %v7491_v30  ;;  %v3393_v26 = vpop.f32.mrf.mxu0 }
 0x470   :  { %v3243_v53 = vadd.f32 %v3210_v38, %v3062_v63 }
 0x472   :  { %v7608_v60 = vadd.f32 %v3391_v41, %v3243_v53  ;;  %v3443_v41 = vld [vmem:[#allocation2 + $0x74] sm:$0xff] }
 0x473   :  { %v3215_v14 = vpop.f32.mrf.mxu3 }
 0x475   :  { %v3031_v10 = vpop.f32.mrf.mxu2 }
 0x476   :  { %v3063_v46 = vadd.f32 %v3031_v10, %v2882_v18  ;;  %v2853_v47 = vpop.f32.mrf.mxu1  ;;  %v3458_v18 = vpack.c.bf16 %v3444_v9, %v3443_v41 }
 0x477   :  { %v2883_v30 = vadd.f32 %v2853_v47, %v7497_v58  ;;  %v3396_v5 = vpop.f32.mrf.mxu0  ;;  %v5227_v58 = vld [vmem:[%s8364_s0 + $0x288] sm:$0xff]  ;;  %v5230_v47 = vld [vmem:[%s8364_s0 + $0x2a0] sm:$0xff] }
 0x478   :  { %v3244_v31 = vadd.f32 %v3212_v21, %v3063_v46  ;;  %v3859_v11 = vpack.c.bf16 %v5228_v42, %v5227_v58 }
 0x479   :  { %3561 = vmatmul.bf16.gmra.mxu1 %v3457_v59  ;;  %v3446_v59 = vld [vmem:[#allocation2 + $0x8c] sm:$0xff] }
 0x47a   :  { %3961 = vmatmul.bf16.gmra.mxu2 %v3858_v36  ;;  %v7617_v24 = vadd.f32 %v3393_v26, %v3244_v31 }
 0x47b   :  { %v3217_v61 = vpop.f32.mrf.mxu3 }
 0x47d   :  { %v3034_v2 = vpop.f32.mrf.mxu2 }
 0x47e   :  { %v3064_v38 = vadd.f32 %v3034_v2, %v2883_v30  ;;  %v2855_v4 = vpop.f32.mrf.mxu1 }
 0x47f   :  { %v2884_v13 = vadd.f32 %v2855_v4, %v7502_v33  ;;  %v3398_v35 = vpop.f32.mrf.mxu0 }
 0x480   :  { %v3245_v20 = vadd.f32 %v3215_v14, %v3064_v38 }
 0x482   :  { %v7620_v23 = vadd.f32 %v3396_v5, %v3245_v20  ;;  %v3445_v5 = vld [vmem:[#allocation2 + $0x84] sm:$0xff] }
 0x483   :  { %v3220_v1 = vpop.f32.mrf.mxu3  ;;  %v3459_v20 = vpack.c.bf16 %v3446_v59, %v3445_v5  ;;  %v5461_v5 = vld [vmem:[#allocation2] sm:$0xff] }
 0x485   :  { %v3036_v6 = vpop.f32.mrf.mxu2 }
 0x486   :  { %v3065_v21 = vadd.f32 %v3036_v6, %v2884_v13  ;;  %v2858_v63 = vpop.f32.mrf.mxu1 }
 0x487   :  { %v2885_v33 = vadd.f32 %v2858_v63, %v7511_v48  ;;  %v3401_v53 = vpop.f32.mrf.mxu0  ;;  %v5229_v48 = vld [vmem:[%s8364_s0 + $0x298] sm:$0xff] }
 0x488   :  { %v3246_v37 = vadd.f32 %v3217_v61, %v3065_v21  ;;  %v3860_v2 = vpack.c.bf16 %v5230_v47, %v5229_v48 }
 0x489   :  { %3566 = vmatmul.bf16.gmra.mxu1 %v3458_v18 }
 0x48a   :  { %3966 = vmatmul.bf16.gmra.mxu2 %v3859_v11  ;;  %v7629_v26 = vadd.f32 %v3398_v35, %v3246_v37  ;;  %v5231_v11 = vld [vmem:[%s8364_s0 + $0x2a8] sm:$0xff]  ;;  %v3447_v37 = vld [vmem:[#allocation2 + $0x94] sm:$0xff] }
 0x48b   :  { %v3222_v40 = vpop.f32.mrf.mxu3 }
 0x48d   :  { %v3039_v0 = vpop.f32.mrf.mxu2 }
 0x48e   :  { %v3066_v14 = vadd.f32 %v3039_v0, %v2885_v33  ;;  %v2860_v10 = vpop.f32.mrf.mxu1  ;;  %v3448_v33 = vld [vmem:[#allocation2 + $0x9c] sm:$0xff] }
 0x48f   :  { %v2886_v62 = vadd.f32 %v2860_v10, %v7516_v34  ;;  %v3403_v46 = vpop.f32.mrf.mxu0  ;;  %v3460_v0 = vpack.c.bf16 %v3448_v33, %v3447_v37 }
 0x490   :  { %v3247_v56 = vadd.f32 %v3220_v1, %v3066_v14 }
 0x492   :  { %v7632_v36 = vadd.f32 %v3401_v53, %v3247_v56 }
 0x493   :  { %v3225_v31 = vpop.f32.mrf.mxu3 }
 0x495   :  { %v3041_v30 = vpop.f32.mrf.mxu2 }
 0x496   :  { %v3067_v61 = vadd.f32 %v3041_v30, %v2886_v62  ;;  %v2863_v38 = vpop.f32.mrf.mxu1  ;;  %v5233_v62 = vld [vmem:[%s8364_s0 + $0x2b8] sm:$0xff] }
 0x497   :  { %v2887_v34 = vadd.f32 %v2863_v38, %v7522_v39  ;;  %v3406_v13 = vpop.f32.mrf.mxu0  ;;  %v5232_v39 = vld [vmem:[%s8364_s0 + $0x2b0] sm:$0xff] }
 0x498   :  { %v3248_v4 = vadd.f32 %v3222_v40, %v3067_v61  ;;  %v3861_v53 = vpack.c.bf16 %v5232_v39, %v5231_v11  ;;  %v3451_v38 = vld [vmem:[#allocation2 + $0xb4] sm:$0x3] }
 0x499   :  { %3571 = vmatmul.bf16.gmra.mxu1 %v3459_v20  ;;  %v3462_v20 = vpack.c.bf16 %v3451_v38, %v3451_v38 }
 0x49a   :  { %3971 = vmatmul.bf16.gmra.mxu2 %v3860_v2  ;;  %v7641_v35 = vadd.f32 %v3403_v46, %v3248_v4  ;;  %v5234_v46 = vld [vmem:[%s8364_s0 + $0x2c0] sm:$0xff]  ;;  %v5235_v4 = vld [vmem:[%s8364_s0 + $0x2c8] sm:$0x3] }
 0x49b   :  { %v3227_v58 = vpop.f32.mrf.mxu3  ;;  %v3862_v47 = vpack.c.bf16 %v5234_v46, %v5233_v62 }
 0x49d   :  { %v3044_v42 = vpop.f32.mrf.mxu2 }
 0x49e   :  { %v3068_v1 = vadd.f32 %v3044_v42, %v2887_v34  ;;  %v2865_v6 = vpop.f32.mrf.mxu1 }
 0x49f   :  { %v3408_v9 = vpop.f32.mrf.mxu0 }
 0x4a0   :  { %v3249_v41 = vadd.f32 %v3225_v31, %v3068_v1 }
 0x4a2   :  { %v7643_v21 = vadd.f32 %v3406_v13, %v3249_v41 }
 0x4a5   :  { %v3046_v63 = vpop.f32.mrf.mxu2 }
 0x4a6   :  { %v3537_v18 = vpop.f32.mrf.mxu1 }
 0x4a7   :  { %v7652_v40 = vadd.f32 %v3537_v18, %v7533_v27  ;;  %v3449_v27 = vld [vmem:[#allocation2 + $0xa4] sm:$0xff] }
 0x4a8   :  { %v3461_v59 = vpack.c.bf16 %v5461_v5, %v3449_v27 }
 0x4a9   :  { %3576 = vmatmul.bf16.gmra.mxu1 %v3460_v0 }
 0x4aa   :  { %3976 = vmatmul.bf16.gmra.mxu2 %v3861_v53 }
 0x4ad   :  { %v7654_v14 = vpop.f32.mrf.mxu2 }
 0x4ae   :  { %8439 = vst [vmem:[#allocation14_spill] sm:$0xff] %v7654_v14  ;;  %v3539_v10 = vpop.f32.mrf.mxu1 }
 0x4af   :  { %v7657_v56 = vadd.f32 %v3539_v10, %v7539_v8 }
 0x4b1   :  { %v3661_v27 = vmul.f32 %v7657_v56, %v7657_v56  ;;  %v3613_v5 = vmul.f32 %v7657_v56, %v6709_v29 }
 0x4b5   :  { %v7665_v48 = vpop.f32.mrf.mxu2 }
 0x4b6   :  { %8440 = vst [vmem:[#allocation15_spill] sm:$0xff] %v7665_v48  ;;  %v3542_v31 = vpop.f32.mrf.mxu1 }
 0x4b7   :  { %v7668_v30 = vadd.f32 %v3542_v31, %v7542_v3  ;;  %v3863_v3 = vpack.c.bf16 %v5235_v4, %v5235_v4  ;;  %v3660_v31 = vmul.f32 %v7652_v40, %v7652_v40 }
 0x4b9   :  { %3581 = vmatmul.bf16.gmra.mxu1 %v3461_v59  ;;  %v3681_v38 = vmul.f32 %v3660_v31, %v6685_v54 }
 0x4ba   :  { %3981 = vmatmul.bf16.gmra.mxu2 %v3862_v47 }
 0x4bd   :  { %v7670_v8 = vpop.f32.mrf.mxu2 }
 0x4be   :  { %v3544_v61 = vpop.f32.mrf.mxu1 }
 0x4bf   :  { %v7673_v2 = vadd.f32 %v3544_v61, %v7545_v57  ;;  %v3612_v61 = vmul.f32 %v7652_v40, %v6685_v54 }
 0x4c1   :  { %v3663_v59 = vmul.f32 %v7673_v2, %v7673_v2 }
 0x4c5   :  { %v7678_v34 = vpop.f32.mrf.mxu2 }
 0x4c6   :  { %v3547_v13 = vpop.f32.mrf.mxu1 }
 0x4c7   :  { %v7681_v58 = vadd.f32 %v3547_v13, %v7548_v52  ;;  %v3633_v13 = vadd.f32 %v3613_v5, %v3612_v61 }
 0x4c9   :  { %8441 = vst [vmem:[#allocation16_spill] sm:$0xff] %v7681_v58  ;;  %3586 = vmatmul.bf16.gmra.mxu1 %v3462_v20  ;;  %v3664_v20 = vmul.f32 %v7681_v58, %v7681_v58 }
 0x4ca   :  { %3986 = vmatmul.bf16.gmra.mxu2 %v3863_v3 }
 0x4cb   :  { %v3685_v31 = vmul.f32 %v3664_v20, %v6699_v51 }
 0x4cd   :  { %v7683_v42 = vpop.f32.mrf.mxu2 }
 0x4ce   :  { %v3549_v1 = vpop.f32.mrf.mxu1 }
 0x4cf   :  { %v7686_v57 = vadd.f32 %v3549_v1, %v7557_v15  ;;  %v3615_v1 = vmul.f32 %v7673_v2, %v6723_v50 }
 0x4d1   :  { %8442 = vst [vmem:[#allocation17_spill] sm:$0xff] %v7686_v57 }
 0x4d5   :  { %v7688_v6 = vpop.f32.mrf.mxu2 }
 0x4d6   :  { %v3552_v41 = vpop.f32.mrf.mxu1 }
 0x4d7   :  { %v7691_v9 = vadd.f32 %v3552_v41, %v7560_v7 }
 0x4d9   :  { %8443 = vst [vmem:[#allocation18_spill] sm:$0xff] %v7691_v9 }
 0x4dd   :  { %v7693_v11 = vpop.f32.mrf.mxu2 }
 0x4de   :  { %v3554_v39 = vpop.f32.mrf.mxu1 }
 0x4df   :  { %v7696_v52 = vadd.f32 %v3554_v39, %v7569_v43  ;;  %v3684_v39 = vmul.f32 %v3663_v59, %v6723_v50 }
 0x4e1   :  { %8444 = vst [vmem:[#allocation19_spill] sm:$0xff] %v7696_v52 }
 0x4e5   :  { %v7698_v63 = vpop.f32.mrf.mxu2 }
 0x4e6   :  { %v3557_v37 = vpop.f32.mrf.mxu1 }
 0x4e7   :  { %v7701_v33 = vadd.f32 %v3557_v37, %v7572_v49  ;;  %v3665_v37 = vmul.f32 %v7686_v57, %v7686_v57 }
 0x4e9   :  { %8445 = vst [vmem:[#allocation20_spill] sm:$0xff] %v7701_v33  ;;  %v3686_v61 = vmul.f32 %v3665_v37, %v6734_v45 }
 0x4ed   :  { %v7703_v15 = vpop.f32.mrf.mxu2 }
 0x4ee   :  { %v3559_v53 = vpop.f32.mrf.mxu1 }
 0x4ef   :  { %v7706_v18 = vadd.f32 %v3559_v53, %v7581_v22 }
 0x4f1   :  { %8446 = vst [vmem:[#allocation21_spill] sm:$0xff] %v7706_v18 }
 0x4f5   :  { %v7708_v7 = vpop.f32.mrf.mxu2 }
 0x4f6   :  { %v3562_v0 = vpop.f32.mrf.mxu1 }
 0x4f7   :  { %v7711_v10 = vadd.f32 %v3562_v0, %v7584_v17  ;;  %v3662_v17 = vmul.f32 %v7668_v30, %v7668_v30 }
 0x4f9   :  { %8447 = vst [vmem:[#allocation22_spill] sm:$0xff] %v7711_v10  ;;  %v3683_v4 = vmul.f32 %v3662_v17, %v6692_v19  ;;  %v3666_v17 = vmul.f32 %v7691_v9, %v7691_v9 }
 0x4fb   :  { %v3687_v20 = vmul.f32 %v3666_v17, %v6746_v16 }
 0x4fd   :  { %v7713_v43 = vpop.f32.mrf.mxu2 }
 0x4fe   :  { %v3564_v62 = vpop.f32.mrf.mxu1 }
 0x4ff   :  { %v7716_v46 = vadd.f32 %v3564_v62, %v7593_v12  ;;  %v3682_v12 = vmul.f32 %v3661_v27, %v6709_v29  ;;  %v3616_v62 = vmul.f32 %v7681_v58, %v6699_v51 }
 0x501   :  { %8448 = vst [vmem:[#allocation23_spill] sm:$0xff] %v7716_v46  ;;  %v3702_v41 = vadd.f32 %v3682_v12, %v3681_v38  ;;  %v3617_v12 = vmul.f32 %v7686_v57, %v6734_v45 }
 0x505   :  { %v7718_v49 = vpop.f32.mrf.mxu2 }
 0x506   :  { %v3567_v47 = vpop.f32.mrf.mxu1 }
 0x507   :  { %v7723_v22 = vadd.f32 %v3567_v47, %v7596_v55  ;;  %v3614_v55 = vmul.f32 %v7668_v30, %v6692_v19  ;;  %v3703_v47 = vadd.f32 %v3702_v41, %v3683_v4 }
 0x509   :  { %8449 = vst [vmem:[#allocation24_spill] sm:$0xff] %v7723_v22  ;;  %v3634_v0 = vadd.f32 %v3633_v13, %v3614_v55  ;;  %v3704_v59 = vadd.f32 %v3703_v47, %v3684_v39  ;;  %v3667_v55 = vmul.f32 %v7696_v52, %v7696_v52  ;;  %v3668_v13 = vmul.f32 %v7701_v33, %v7701_v33 }
 0x50a   :  { %v3619_v39 = vmul.f32 %v7696_v52, %v6767_v32 }
 0x50b   :  { %v3635_v5 = vadd.f32 %v3634_v0, %v3615_v1  ;;  %v3705_v4 = vadd.f32 %v3704_v59, %v3685_v31  ;;  %v3669_v0 = vmul.f32 %v7706_v18, %v7706_v18  ;;  %v3620_v31 = vmul.f32 %v7701_v33, %v6777_v25  ;;  %v8452_v33 = vld [vmem:[#allocation6_spill] sm:$0xff] }
 0x50c   :  { %v3670_v59 = vmul.f32 %v7711_v10, %v7711_v10 }
 0x50d   :  { %v7742_v3 = vpop.f32.mrf.mxu2  ;;  %v3636_v38 = vadd.f32 %v3635_v5, %v3616_v62  ;;  %v3706_v37 = vadd.f32 %v3705_v4, %v3686_v61  ;;  %v3690_v4 = vmul.f32 %v3669_v0, %v6789_v44 }
 0x50e   :  { %v3569_v53 = vpop.f32.mrf.mxu1 }
 0x50f   :  { %v7752_v27 = vadd.f32 %v3569_v53, %v7605_v28  ;;  %v3618_v28 = vmul.f32 %v7691_v9, %v6746_v16  ;;  %v3637_v41 = vadd.f32 %v3636_v38, %v3617_v12  ;;  %v3688_v53 = vmul.f32 %v3667_v55, %v6767_v32 }
 0x510   :  { %v3707_v5 = vadd.f32 %v3706_v37, %v3687_v20  ;;  %v3689_v12 = vmul.f32 %v3668_v13, %v6777_v25  ;;  %v3621_v55 = vmul.f32 %v7706_v18, %v6789_v44  ;;  %v3691_v13 = vmul.f32 %v3670_v59, %v8452_v33 }
 0x511   :  { %8450 = vst [vmem:[#allocation25_spill] sm:$0xff] %v7752_v27  ;;  %v3638_v47 = vadd.f32 %v3637_v41, %v3618_v28  ;;  %v3671_v28 = vmul.f32 %v7716_v46, %v7716_v46 }
 0x512   :  { %v3708_v38 = vadd.f32 %v3707_v5, %v3688_v53  ;;  %v3672_v53 = vmul.f32 %v7723_v22, %v7723_v22 }
 0x513   :  { %v3639_v61 = vadd.f32 %v3638_v47, %v3619_v39  ;;  %v8453_v39 = vld [vmem:[#allocation7_spill] sm:$0xff] }
 0x514   :  { %v3709_v20 = vadd.f32 %v3708_v38, %v3689_v12  ;;  %v3623_v47 = vmul.f32 %v7716_v46, %v8453_v39  ;;  %v3692_v5 = vmul.f32 %v3671_v28, %v8453_v39  ;;  %v3673_v12 = vmul.f32 %v7752_v27, %v7752_v27  ;;  %v8455_v46 = vld [vmem:[#allocation9_spill] sm:$0xff] }
 0x515   :  { %v7767_v1 = vpop.f32.mrf.mxu2  ;;  %v3640_v41 = vadd.f32 %v3639_v61, %v3620_v31  ;;  %v8454_v61 = vld [vmem:[#allocation8_spill] sm:$0xff] }
 0x516   :  { %v3572_v62 = vpop.f32.mrf.mxu1  ;;  %v3710_v0 = vadd.f32 %v3709_v20, %v3690_v4  ;;  %v3625_v4 = vmul.f32 %v7752_v27, %v8455_v46  ;;  %v4040_v20 = vmul.f32 %v7665_v48, %v7665_v48 }
 0x517   :  { %v7777_v17 = vadd.f32 %v3572_v62, %v7608_v60  ;;  %v3622_v60 = vmul.f32 %v7711_v10, %v8452_v33  ;;  %v3641_v62 = vadd.f32 %v3640_v41, %v3621_v55  ;;  %v3624_v10 = vmul.f32 %v7723_v22, %v8454_v61 }
 0x518   :  { %v3711_v55 = vadd.f32 %v3710_v0, %v3691_v13  ;;  %v3693_v41 = vmul.f32 %v3672_v53, %v8454_v61  ;;  %v3991_v53 = vmul.f32 %v7654_v14, %v6685_v54  ;;  %v3992_v0 = vmul.f32 %v7665_v48, %v6709_v29 }
 0x519   :  { %8451 = vst [vmem:[#allocation26_spill] sm:$0xff] %v7777_v17  ;;  %v3642_v31 = vadd.f32 %v3641_v62, %v3622_v60  ;;  %v3674_v28 = vmul.f32 %v7777_v17, %v7777_v17  ;;  %v4039_v60 = vmul.f32 %v7654_v14, %v7654_v14  ;;  %v4061_v52 = vmul.f32 %v4040_v20, %v6709_v29 }
 0x51a   :  { %v3712_v62 = vadd.f32 %v3711_v55, %v3692_v5  ;;  %v8457_v55 = vld [vmem:[#allocation11_spill] sm:$0xff]  ;;  %v3993_v14 = vmul.f32 %v7670_v8, %v6692_v19  ;;  %v4042_v48 = vmul.f32 %v7678_v34, %v7678_v34  ;;  %v4043_v29 = vmul.f32 %v7683_v42, %v7683_v42 }
 0x51b   :  { %v3643_v38 = vadd.f32 %v3642_v31, %v3623_v47  ;;  %v4041_v31 = vmul.f32 %v7670_v8, %v7670_v8 }
 0x51d   :  { %v7790_v37 = vpop.f32.mrf.mxu2  ;;  %v3644_v22 = vadd.f32 %v3643_v38, %v3624_v10  ;;  %v3713_v10 = vadd.f32 %v3712_v62, %v3693_v41  ;;  %v8458_v62 = vld [vmem:[#allocation12_spill] sm:$0xff] }
 0x51e   :  { %v3574_v18 = vpop.f32.mrf.mxu1 }
 0x51f   :  { %v7802_v59 = vadd.f32 %v3574_v18, %v7617_v24  ;;  %v3694_v24 = vmul.f32 %v3673_v12, %v8455_v46  ;;  %v8456_v18 = vld [vmem:[#allocation10_spill] sm:$0xff]  ;;  %v3645_v5 = vadd.f32 %v3644_v22, %v3625_v4  ;;  %v4012_v4 = vadd.f32 %v3992_v0, %v3991_v53 }
 0x520   :  { %v3626_v13 = vmul.f32 %v7777_v17, %v8456_v18  ;;  %v3695_v12 = vmul.f32 %v3674_v28, %v8456_v18  ;;  %v4060_v17 = vmul.f32 %v4039_v60, %v6685_v54  ;;  %v4062_v28 = vmul.f32 %v4041_v31, %v6692_v19 }
 0x521   :  { %v3675_v47 = vmul.f32 %v7802_v59, %v7802_v59  ;;  %v3627_v38 = vmul.f32 %v7802_v59, %v8457_v55  ;;  %v3714_v57 = vadd.f32 %v3713_v10, %v3694_v24  ;;  %v3994_v54 = vmul.f32 %v7678_v34, %v6723_v50 }
 0x522   :  { %v3646_v58 = vadd.f32 %v3645_v5, %v3626_v13  ;;  %v4044_v19 = vmul.f32 %v7688_v6, %v7688_v6  ;;  %v3995_v53 = vmul.f32 %v7683_v42, %v6699_v51  ;;  %v4064_v10 = vmul.f32 %v4043_v29, %v6699_v51 }
 0x523   :  { %v3696_v22 = vmul.f32 %v3675_v47, %v8457_v55  ;;  %v3715_v60 = vadd.f32 %v3714_v57, %v3695_v12  ;;  %v4081_v47 = vadd.f32 %v4061_v52, %v4060_v17  ;;  %v4045_v5 = vmul.f32 %v7693_v11, %v7693_v11 }
 0x524   :  { %v3647_v20 = vadd.f32 %v3646_v58, %v3627_v38  ;;  %v4065_v12 = vmul.f32 %v4044_v19, %v6734_v45  ;;  %v4046_v38 = vmul.f32 %v7698_v63, %v7698_v63  ;;  %v3997_v29 = vmul.f32 %v7693_v11, %v6746_v16 }
 0x525   :  { %v7824_v27 = vpop.f32.mrf.mxu2  ;;  %v3716_v0 = vadd.f32 %v3715_v60, %v3696_v22  ;;  %v4082_v57 = vadd.f32 %v4081_v47, %v4062_v28  ;;  %v4047_v60 = vmul.f32 %v7703_v15, %v7703_v15 }
 0x526   :  { %v3577_v9 = vpop.f32.mrf.mxu1 }
 0x527   :  { %v7837_v41 = vadd.f32 %v3577_v9, %v7620_v23  ;;  %v4013_v23 = vadd.f32 %v4012_v4, %v3993_v14  ;;  %v4063_v9 = vmul.f32 %v4042_v48, %v6723_v50  ;;  %v3996_v50 = vmul.f32 %v7688_v6, %v6734_v45 }
 0x529   :  { %v3628_v24 = vmul.f32 %v7837_v41, %v8458_v62  ;;  %v3676_v13 = vmul.f32 %v7837_v41, %v7837_v41  ;;  %v4014_v14 = vadd.f32 %v4013_v23, %v3994_v54  ;;  %v4083_v17 = vadd.f32 %v4082_v57, %v4063_v9 }
 0x52a   :  { %v4066_v54 = vmul.f32 %v4045_v5, %v6746_v16  ;;  %v4067_v23 = vmul.f32 %v4046_v38, %v6767_v32  ;;  %v4048_v9 = vmul.f32 %v7708_v7, %v7708_v7  ;;  %v4068_v57 = vmul.f32 %v4047_v60, %v6777_v25 }
 0x52b   :  { %v3648_v31 = vadd.f32 %v3647_v20, %v3628_v24  ;;  %v3697_v58 = vmul.f32 %v3676_v13, %v8458_v62  ;;  %v4015_v4 = vadd.f32 %v4014_v14, %v3995_v53  ;;  %v4084_v28 = vadd.f32 %v4083_v17, %v4064_v10  ;;  %v8459_v24 = vld [vmem:[#allocation13_spill] sm:$0xff] }
 0x52c   :  { %v4049_v5 = vmul.f32 %v7713_v43, %v7713_v43  ;;  %v4069_v17 = vmul.f32 %v4048_v9, %v6789_v44  ;;  %v4050_v38 = vmul.f32 %v7718_v49, %v7718_v49  ;;  %v4003_v9 = vmul.f32 %v7742_v3, %v8454_v61 }
 0x52d   :  { %v7857_v52 = vpop.f32.mrf.mxu2  ;;  %v3717_v48 = vadd.f32 %v3716_v0, %v3697_v58  ;;  %v4016_v20 = vadd.f32 %v4015_v4, %v3996_v50  ;;  %v4085_v47 = vadd.f32 %v4084_v28, %v4065_v12  ;;  %v3999_v58 = vmul.f32 %v7703_v15, %v6777_v25 }
 0x52e   :  { %v3579_v22 = vpop.f32.mrf.mxu1  ;;  %v4001_v28 = vmul.f32 %v7713_v43, %v8452_v33 }
 0x52f   :  { %v7865_v51 = vadd.f32 %v3579_v22, %v7629_v26  ;;  %v3998_v26 = vmul.f32 %v7698_v63, %v6767_v32  ;;  %v4017_v53 = vadd.f32 %v4016_v20, %v3997_v29  ;;  %v4086_v0 = vadd.f32 %v4085_v47, %v4066_v54  ;;  %v8460_v54 = vld [vmem:[#allocation3_spill] sm:$0xff] }
 0x530   :  { %v4051_v29 = vmul.f32 %v7742_v3, %v7742_v3  ;;  %v4052_v47 = vmul.f32 %v7767_v1, %v7767_v1 }
 0x531   :  { %v3629_v45 = vmul.f32 %v7865_v51, %v8459_v24  ;;  %v3677_v13 = vmul.f32 %v7865_v51, %v7865_v51  ;;  %v4018_v32 = vadd.f32 %v4017_v53, %v3998_v26  ;;  %v4087_v50 = vadd.f32 %v4086_v0, %v4067_v23 }
 0x532   :  { %v4072_v0 = vmul.f32 %v4051_v29, %v8454_v61  ;;  %v4005_v61 = vmul.f32 %v7790_v37, %v8456_v18 }
 0x533   :  { %v3649_v16 = vadd.f32 %v3648_v31, %v3629_v45  ;;  %v3698_v19 = vmul.f32 %v3677_v13, %v8459_v24  ;;  %v4000_v31 = vmul.f32 %v7708_v7, %v6789_v44  ;;  %v4019_v25 = vadd.f32 %v4018_v32, %v3999_v58 }
 0x534   :  { %v4088_v4 = vadd.f32 %v4087_v50, %v4068_v57  ;;  %v4071_v13 = vmul.f32 %v4050_v38, %v8453_v39  ;;  %v4053_v58 = vmul.f32 %v7790_v37, %v7790_v37  ;;  %v4073_v50 = vmul.f32 %v4052_v47, %v8455_v46 }
 0x535   :  { %v7885_v10 = vpop.f32.mrf.mxu2  ;;  %v3718_v14 = vadd.f32 %v3717_v48, %v3698_v19  ;;  %v4070_v48 = vmul.f32 %v4049_v5, %v8452_v33  ;;  %v4020_v20 = vadd.f32 %v4019_v25, %v4000_v31  ;;  %v4004_v5 = vmul.f32 %v7767_v1, %v8455_v46  ;;  %v8461_v25 = vld [vmem:[#allocation4_spill] sm:$0xff] }
 0x536   :  { %v3582_v12 = vpop.f32.mrf.mxu1  ;;  %v4089_v45 = vadd.f32 %v4088_v4, %v4069_v17  ;;  %v4054_v31 = vmul.f32 %v7824_v27, %v7824_v27 }
 0x537   :  { %v7895_v22 = vadd.f32 %v3582_v12, %v7632_v36  ;;  %v4002_v36 = vmul.f32 %v7718_v49, %v8453_v39  ;;  %v4021_v23 = vadd.f32 %v4020_v20, %v4001_v28 }
 0x538   :  { %v4090_v53 = vadd.f32 %v4089_v45, %v4070_v48  ;;  %v4006_v48 = vmul.f32 %v7824_v27, %v8457_v55  ;;  %v4007_v45 = vmul.f32 %v7857_v52, %v8458_v62 }
 0x539   :  { %v3630_v44 = vmul.f32 %v7895_v22, %v8460_v54  ;;  %v3678_v60 = vmul.f32 %v7895_v22, %v7895_v22  ;;  %v4022_v39 = vadd.f32 %v4021_v23, %v4002_v36  ;;  %v4056_v36 = vmul.f32 %v7885_v10, %v7885_v10 }
 0x53a   :  { %v4091_v32 = vadd.f32 %v4090_v53, %v4071_v13 }
 0x53b   :  { %v3650_v33 = vadd.f32 %v3649_v16, %v3630_v44  ;;  %v3699_v26 = vmul.f32 %v3678_v60, %v8460_v54  ;;  %v4023_v12 = vadd.f32 %v4022_v39, %v4003_v9  ;;  %v4075_v44 = vmul.f32 %v4054_v31, %v8457_v55 }
 0x53c   :  { %v4092_v38 = vadd.f32 %v4091_v32, %v4072_v0  ;;  %v4008_v55 = vmul.f32 %v7885_v10, %v8459_v24 }
 0x53d   :  { %v7914_v19 = vpop.f32.mrf.mxu2  ;;  %v3719_v57 = vadd.f32 %v3718_v14, %v3699_v26  ;;  %v4074_v14 = vmul.f32 %v4053_v58, %v8456_v18  ;;  %v4024_v46 = vadd.f32 %v4023_v12, %v4004_v5  ;;  %v4077_v5 = vmul.f32 %v4056_v36, %v8459_v24 }
 0x53e   :  { %v3584_v16 = vpop.f32.mrf.mxu1  ;;  %v4093_v29 = vadd.f32 %v4092_v38, %v4073_v50 }
 0x53f   :  { %v7925_v17 = vadd.f32 %v3584_v16, %v7641_v35  ;;  %v4055_v35 = vmul.f32 %v7857_v52, %v7857_v52  ;;  %v4025_v18 = vadd.f32 %v4024_v46, %v4005_v61  ;;  %v8462_v16 = vld [vmem:[#allocation5_spill] sm:$0xff] }
 0x540   :  { %v4094_v47 = vadd.f32 %v4093_v29, %v4074_v14 }
 0x541   :  { %v3631_v4 = vmul.f32 %v7925_v17, %v8461_v25  ;;  %v3679_v28 = vmul.f32 %v7925_v17, %v7925_v17  ;;  %v4026_v23 = vadd.f32 %v4025_v18, %v4006_v48  ;;  %v4076_v9 = vmul.f32 %v4055_v35, %v8458_v62 }
 0x542   :  { %v4095_v0 = vadd.f32 %v4094_v47, %v4075_v44 }
 0x543   :  { %v3651_v60 = vadd.f32 %v3650_v33, %v3631_v4  ;;  %v3700_v20 = vmul.f32 %v3679_v28, %v8461_v25  ;;  %v4057_v33 = vmul.f32 %v7914_v19, %v7914_v19  ;;  %v4027_v39 = vadd.f32 %v4026_v23, %v4007_v45 }
 0x544   :  { %v4096_v31 = vadd.f32 %v4095_v0, %v4076_v9 }
 0x545   :  { %v7944_v13 = vpop.f32.mrf.mxu2  ;;  %v3720_v26 = vadd.f32 %v3719_v57, %v3700_v20  ;;  %v4009_v57 = vmul.f32 %v7914_v19, %v8460_v54  ;;  %v4028_v12 = vadd.f32 %v4027_v39, %v4008_v55 }
 0x546   :  { %v3587_v53 = vpop.f32.mrf.mxu1  ;;  %v4058_v62 = vmul.f32 %v7944_v13, %v7944_v13  ;;  %v4010_v61 = vmul.f32 %v7944_v13, %v8461_v25  ;;  %v4097_v14 = vadd.f32 %v4096_v31, %v4077_v5 }
 0x547   :  { %v7952_v58 = vadd.f32 %v3587_v53, %v7643_v21  ;;  %v4078_v21 = vmul.f32 %v4057_v33, %v8460_v54  ;;  %v4029_v4 = vadd.f32 %v4028_v12, %v4009_v57 }
 0x548   :  { %v4079_v28 = vmul.f32 %v4058_v62, %v8461_v25 }
 0x549   :  { %v3632_v32 = vmul.f32 %v7952_v58, %v8462_v16  ;;  %v3680_v50 = vmul.f32 %v7952_v58, %v7952_v58  ;;  %v4098_v44 = vadd.f32 %v4097_v14, %v4078_v21  ;;  %v4030_v20 = vadd.f32 %v4029_v4, %v4010_v61 }
 0x54b   :  { %v3652_v24 = vsel %vm1778_vm0, %v3632_v32, 0.0  ;;  %v3701_v38 = vmul.f32 %v3680_v50, %v8462_v16 }
 0x54c   :  { %v3653_v46 = vadd.f32 %v3652_v24, %v3651_v60  ;;  %v4099_v60 = vadd.f32 %v4098_v44, %v4079_v28 }
 0x54d   :  { %v7969_v48 = vpop.f32.mrf.mxu2  ;;  %v3721_v35 = vsel %vm1778_vm0, %v3701_v38, 0.0 }
 0x54e   :  { %v4011_v29 = vmul.f32 %v7969_v48, %v8462_v16  ;;  %v4059_v54 = vmul.f32 %v7969_v48, %v7969_v48  ;;  %v3654_v18 = vrot.slane %v3653_v46, 4  ;;  %v3722_v45 = vadd.f32 %v3721_v35, %v3720_v26  ;;  %v3589_v36 = vpop.f32.mrf.mxu1 }
 0x550   :  { %v4031_v47 = vsel %vm1778_vm0, %v4011_v29, 0.0  ;;  %v4080_v25 = vmul.f32 %v4059_v54, %v8462_v16  ;;  %v3655_v23 = vadd.f32 %v3654_v18, %v3653_v46  ;;  %v3723_v9 = vrot.slane %v3722_v45, 4 }
 0x551   :  { %v4032_v55 = vadd.f32 %v4031_v47, %v4030_v20 }
 0x552   :  { %v4100_v33 = vsel %vm1778_vm0, %v4080_v25, 0.0  ;;  %v3656_v53 = vrot.slane %v3655_v23, 2  ;;  %v3724_v0 = vadd.f32 %v3723_v9, %v3722_v45 }
 0x553   :  { %v4033_v39 = vrot.slane %v4032_v55, 4  ;;  %v4101_v5 = vadd.f32 %v4100_v33, %v4099_v60 }
 0x554   :  { %v3657_v57 = vadd.f32 %v3656_v53, %v3655_v23  ;;  %v3725_v62 = vrot.slane %v3724_v0, 2 }
 0x555   :  { %v4034_v32 = vadd.f32 %v4033_v39, %v4032_v55  ;;  %v4102_v50 = vrot.slane %v4101_v5, 4  ;;  %v3989_v26 = vpop.f32.mrf.mxu2 }
 0x556   :  { %v3658_v31 = vrot.slane %v3657_v57, 1  ;;  %v3726_v12 = vadd.f32 %v3725_v62, %v3724_v0  ;;  %v8464_v26 = vld [vmem:[#allocation17_spill] sm:$0xff] }
 0x557   :  { %v4035_v21 = vrot.slane %v4034_v32, 2  ;;  %v4103_v61 = vadd.f32 %v4102_v50, %v4101_v5 }
 0x558   :  { %v3659_v16 = vadd.f32 %v3658_v31, %v3657_v57  ;;  %v3727_v24 = vrot.slane %v3726_v12, 1 }
 0x559   :  { %v4036_v4 = vadd.f32 %v4035_v21, %v4034_v32  ;;  %v4104_v28 = vrot.slane %v4103_v61, 2  ;;  %v8463_v32 = vld [vmem:[#allocation16_spill] sm:$0xff] }
 0x55a   :  { %v3728_v38 = vadd.f32 %v3727_v24, %v3726_v12  ;;  %v7979_v14 = vmul.f32 0.0078125, %v3659_v16 }
 0x55b   :  { %v4037_v54 = vrot.slane %v4036_v4, 1  ;;  %v4105_v44 = vadd.f32 %v4104_v28, %v4103_v61  ;;  %v8470_v28 = vld [vmem:[#allocation23_spill] sm:$0xff] }
 0x55c   :  { %v3730_v46 = vmul.f32 0.0078125, %v3728_v38  ;;  %v3731_v35 = vmul.f32 %v7979_v14, %v7979_v14  ;;  %v3759_v18 = vsub.f32 %v7802_v59, %v7979_v14  ;;  %v3760_v45 = vsub.f32 %v7837_v41, %v7979_v14  ;;  %v8469_v38 = vld [vmem:[#allocation22_spill] sm:$0xff] }
 0x55d   :  { %v3761_v36 = vsub.f32 %v7865_v51, %v7979_v14  ;;  %v3762_v47 = vsub.f32 %v7895_v22, %v7979_v14  ;;  %v3763_v25 = vsub.f32 %v7925_v17, %v7979_v14  ;;  %v3764_v60 = vsub.f32 %v7952_v58, %v7979_v14 }
 0x55e   :  { %v3732_v29 = vsub.f32 %v3730_v46, %v3731_v35  ;;  %v4038_v23 = vadd.f32 %v4037_v54, %v4036_v4  ;;  %v4106_v9 = vrot.slane %v4105_v44, 1  ;;  %v3744_v17 = vsub.f32 %v7652_v40, %v7979_v14  ;;  %v8465_v40 = vld [vmem:[#allocation18_spill] sm:$0xff]  ;;  %v8471_v35 = vld [vmem:[#allocation24_spill] sm:$0xff] }
 0x55f   :  { %v3745_v39 = vsub.f32 %v7657_v56, %v7979_v14  ;;  %v3746_v5 = vsub.f32 %v7668_v30, %v7979_v14  ;;  %v3747_v62 = vsub.f32 %v7673_v2, %v7979_v14  ;;  %v3748_v50 = vsub.f32 %v8463_v32, %v7979_v14  ;;  %v8466_v56 = vld [vmem:[#allocation19_spill] sm:$0xff]  ;;  %v8467_v30 = vld [vmem:[#allocation20_spill] sm:$0xff]  ;;  %v8468_v2 = vld [vmem:[#allocation21_spill] sm:$0xff] }
 0x560   :  { %v3733_v20 = vadd.f32 1e-05, %v3732_v29  ;;  %v4107_v55 = vadd.f32 %v4106_v9, %v4105_v44  ;;  %v7995_v59 = vmul.f32 0.0078125, %v4038_v23  ;;  %v3749_v31 = vsub.f32 %v8464_v26, %v7979_v14  ;;  %v8472_v44 = vld [vmem:[#allocation25_spill] sm:$0xff]  ;;  %v8473_v23 = vld [vmem:[#allocation26_spill] sm:$0xff] }
 0x561   :  { %v3750_v12 = vsub.f32 %v8465_v40, %v7979_v14  ;;  %v3751_v61 = vsub.f32 %v8466_v56, %v7979_v14  ;;  %v3752_v16 = vsub.f32 %v8467_v30, %v7979_v14  ;;  %v3753_v24 = vsub.f32 %v8468_v2, %v7979_v14 }
 0x562   :  { %5457 = vrsqrt.f32 %v3733_v20  ;;  %v4109_v0 = vmul.f32 0.0078125, %v4107_v55  ;;  %v4110_v51 = vmul.f32 %v7995_v59, %v7995_v59  ;;  %vm3740_vm5 = vweird.f32 %v3733_v20 }
 0x563   :  { %v3754_v4 = vsub.f32 %v8469_v38, %v7979_v14  ;;  %v3755_v46 = vsub.f32 %v8470_v28, %v7979_v14  ;;  %v3756_v29 = vsub.f32 %v8471_v35, %v7979_v14  ;;  %v3758_v9 = vsub.f32 %v8473_v23, %v7979_v14 }
 0x564   :  { %v4111_v57 = vsub.f32 %v4109_v0, %v4110_v51  ;;  %v4143_v23 = vsub.f32 %v7969_v48, %v7995_v59 }
 0x566   :  { %v8029_v55 = vadd.f32 1e-05, %v4111_v57 }
 0x568   :  { %v5458_v33 = vpop.eup %5457  ;;  %5459 = vrsqrt.f32 %v8029_v55  ;;  %vm4119_vm7 = vweird.f32 %v8029_v55 }
 0x569   :  { %v3735_v41 = vmul.f32 %v5458_v33, %v3733_v20  ;;  %vm3741_vm4 = vweird.f32 %v5458_v33  ;;  %v3757_v20 = vsub.f32 %v8472_v44, %v7979_v14 }
 0x56a   :  { %vm3742_vm6 = vmor %vm3740_vm5, %vm3741_vm4 }
 0x56b   :  { %v3736_v53 = vmul.f32 %v5458_v33, %v3735_v41 }
 0x56d   :  { %v3737_v22 = vmul.f32 0.5, %v3736_v53 }
 0x56f   :  { %v3738_v58 = vsub.f32 1.5, %v3737_v22 }
 0x571   :  { %v3739_v21 = vmul.f32 %v5458_v33, %v3738_v58 }
 0x573   :  { %v3743_v54 = vsel %vm3742_vm6, %v5458_v33, %v3739_v21 }
 0x574   :  { %v3765_v41 = vmul.f32 %v3744_v17, %v3743_v54  ;;  %v3766_v53 = vmul.f32 %v3745_v39, %v3743_v54  ;;  %v3767_v0 = vmul.f32 %v3746_v5, %v3743_v54  ;;  %v3768_v51 = vmul.f32 %v3747_v62, %v3743_v54  ;;  %v5460_v39 = vpop.eup %5459  ;;  %v8474_v5 = vld [vmem:[#allocation14_spill] sm:$0xff] }
 0x575   :  { %v3769_v22 = vmul.f32 %v3748_v50, %v3743_v54  ;;  %v3770_v58 = vmul.f32 %v3749_v31, %v3743_v54  ;;  %v3771_v32 = vmul.f32 %v3750_v12, %v3743_v54  ;;  %v3772_v26 = vmul.f32 %v3751_v61, %v3743_v54  ;;  %v8475_v50 = vld [vmem:[#allocation15_spill] sm:$0xff]  ;;  %v5451_v61 = vld [vmem:[%s8367_s4 + $0x2] ss:$0 sm:$0xff] }
 0x576   :  { %v3773_v40 = vmul.f32 %v3752_v16, %v3743_v54  ;;  %v3774_v56 = vmul.f32 %v3753_v24, %v3743_v54  ;;  %v3775_v30 = vmul.f32 %v3754_v4, %v3743_v54  ;;  %v3776_v33 = vmul.f32 %v3755_v46, %v3743_v54 }
 0x577   :  { %v3777_v21 = vmul.f32 %v3756_v29, %v3743_v54  ;;  %v3778_v2 = vmul.f32 %v3757_v20, %v3743_v54  ;;  %v3779_v38 = vmul.f32 %v3758_v9, %v3743_v54  ;;  %v3780_v28 = vmul.f32 %v3759_v18, %v3743_v54  ;;  %v8084_v20 = vld [vmem:[%s8367_s4 + $0x3] ss:$0 sm:$0xff] }
 0x578   :  { %v3781_v35 = vmul.f32 %v3760_v45, %v3743_v54  ;;  %v3782_v14 = vmul.f32 %v3761_v36, %v3743_v54  ;;  %v3783_v57 = vmul.f32 %v3762_v47, %v3743_v54  ;;  %v3784_v44 = vmul.f32 %v3763_v25, %v3743_v54 }
 0x579   :  { %v3785_v17 = vmul.f32 %v3764_v60, %v3743_v54  ;;  %v4123_v62 = vsub.f32 %v8474_v5, %v7995_v59  ;;  %v4124_v31 = vsub.f32 %v8475_v50, %v7995_v59  ;;  %v4114_v36 = vmul.f32 %v5460_v39, %v8029_v55 }
 0x57a   :  { %v3788_v54 = vmul.f32 %v5451_v61, %v3765_v41  ;;  %v3789_v9 = vmul.f32 %v5451_v61, %v3766_v53  ;;  %v3790_v16 = vmul.f32 %v5451_v61, %v3767_v0  ;;  %v3791_v60 = vmul.f32 %v5451_v61, %v3768_v51 }
 0x57b   :  { %v4115_v29 = vmul.f32 %v5460_v39, %v4114_v36  ;;  %v3792_v24 = vmul.f32 %v5451_v61, %v3769_v22  ;;  %v3793_v25 = vmul.f32 %v5451_v61, %v3770_v58  ;;  %v3794_v47 = vmul.f32 %v5451_v61, %v3771_v32 }
 0x57c   :  { %v3795_v45 = vmul.f32 %v5451_v61, %v3772_v26  ;;  %v3796_v18 = vmul.f32 %v5451_v61, %v3773_v40  ;;  %v3797_v36 = vmul.f32 %v5451_v61, %v3774_v56  ;;  %v8086_v12 = vmul.f32 %v5451_v61, %v3776_v33 }
 0x57d   :  { %v4116_v46 = vmul.f32 0.5, %v4115_v29  ;;  %v8079_v29 = vmul.f32 %v5451_v61, %v3775_v30  ;;  %v8088_v41 = vmul.f32 %v5451_v61, %v3777_v21  ;;  %vm4120_vm8 = vweird.f32 %v5460_v39 }
 0x57e   :  { %v8090_v0 = vmul.f32 %v5451_v61, %v3778_v2  ;;  %v8092_v51 = vmul.f32 %v5451_v61, %v3779_v38  ;;  %v8094_v22 = vmul.f32 %v5451_v61, %v3780_v28  ;;  %v3804_v58 = vmul.f32 %v5451_v61, %v3781_v35  ;;  %vm4121_vm9 = vmor %vm4119_vm7, %vm4120_vm8 }
 0x57f   :  { %v4117_v4 = vsub.f32 1.5, %v4116_v46  ;;  %v3805_v32 = vmul.f32 %v5451_v61, %v3782_v14  ;;  %v3806_v26 = vmul.f32 %v5451_v61, %v3783_v57  ;;  %v3807_v40 = vmul.f32 %v5451_v61, %v3784_v44 }
 0x580   :  { %v3808_v56 = vmul.f32 %v5451_v61, %v3785_v17  ;;  %v8097_v30 = vadd.f32 %v8084_v20, %v3788_v54  ;;  %v8100_v33 = vadd.f32 %v8084_v20, %v3789_v9  ;;  %v8103_v21 = vadd.f32 %v8084_v20, %v3790_v16 }
 0x581   :  { %v4118_v53 = vmul.f32 %v5460_v39, %v4117_v4  ;;  %v8106_v2 = vadd.f32 %v8084_v20, %v3791_v60  ;;  %v8111_v38 = vadd.f32 %v8084_v20, %v3792_v24  ;;  %v8114_v28 = vadd.f32 %v8084_v20, %v3793_v25 }
 0x582   :  { %v8117_v35 = vadd.f32 %v8084_v20, %v3794_v47  ;;  %v8120_v57 = vadd.f32 %v8084_v20, %v3795_v45  ;;  %v8123_v44 = vadd.f32 %v8084_v20, %v3796_v18  ;;  %v8126_v17 = vadd.f32 %v8084_v20, %v3797_v36 }
 0x583   :  { %v4122_v14 = vsel %vm4121_vm9, %v5460_v39, %v4118_v53  ;;  %v8129_v55 = vadd.f32 %v8084_v20, %v3804_v58  ;;  %v8132_v60 = vadd.f32 %v8084_v20, %v3805_v32  ;;  %v8135_v25 = vadd.f32 %v8084_v20, %v3806_v26 }
 0x584   :  { %v8138_v39 = vadd.f32 %v8084_v20, %v3807_v40  ;;  %v8141_v45 = vadd.f32 %v8084_v20, %v3808_v56  ;;  %v4144_v18 = vmul.f32 %v4123_v62, %v4122_v14  ;;  %v4145_v47 = vmul.f32 %v4124_v31, %v4122_v14 }
 0x585   :  { %v8476_v61 = vsub.f32 %v7670_v8, %v7995_v59  ;;  %v8477_v24 = vsub.f32 %v7678_v34, %v7995_v59  ;;  %v8478_v46 = vsub.f32 %v7683_v42, %v7995_v59  ;;  %v8479_v5 = vsub.f32 %v7688_v6, %v7995_v59  ;;  %v8170_v34 = vld [vmem:[%s8367_s4 + $0x4] ss:$0 sm:$0xff] }
 0x586   :  { %v8480_v50 = vsub.f32 %v7693_v11, %v7995_v59  ;;  %v8481_v8 = vsub.f32 %v7698_v63, %v7995_v59  ;;  %v8482_v42 = vsub.f32 %v7703_v15, %v7995_v59  ;;  %v8483_v6 = vsub.f32 %v7708_v7, %v7995_v59 }
 0x587   :  { %v4146_v16 = vmul.f32 %v8476_v61, %v4122_v14  ;;  %v4147_v4 = vmul.f32 %v8477_v24, %v4122_v14  ;;  %v4148_v54 = vmul.f32 %v8478_v46, %v4122_v14  ;;  %v4149_v62 = vmul.f32 %v8479_v5, %v4122_v14 }
 0x588   :  { %v4150_v31 = vmul.f32 %v8480_v50, %v4122_v14  ;;  %v4151_v9 = vmul.f32 %v8481_v8, %v4122_v14  ;;  %v4152_v36 = vmul.f32 %v8482_v42, %v4122_v14  ;;  %v4153_v53 = vmul.f32 %v8483_v6, %v4122_v14 }
 0x589   :  { %v8484_v11 = vsub.f32 %v7713_v43, %v7995_v59  ;;  %v8485_v63 = vsub.f32 %v7718_v49, %v7995_v59  ;;  %v8486_v26 = vsub.f32 %v7742_v3, %v7995_v59  ;;  %v8487_v15 = vsub.f32 %v7767_v1, %v7995_v59 }
 0x58a   :  { %v8488_v7 = vsub.f32 %v7790_v37, %v7995_v59  ;;  %v8489_v43 = vsub.f32 %v7857_v52, %v7995_v59  ;;  %v8490_v49 = vsub.f32 %v7885_v10, %v7995_v59  ;;  %v8491_v3 = vsub.f32 %v7914_v19, %v7995_v59  ;;  %v8217_v19 = vld [vmem:[%s8367_s4 + $0x5] ss:$0 sm:$0xff] }
 0x58b   :  { %v4154_v58 = vmul.f32 %v8484_v11, %v4122_v14  ;;  %v4155_v32 = vmul.f32 %v8485_v63, %v4122_v14  ;;  %v4156_v40 = vmul.f32 %v8486_v26, %v4122_v14  ;;  %v4157_v56 = vmul.f32 %v8487_v15, %v4122_v14 }
 0x58c   :  { %v4158_v61 = vmul.f32 %v8488_v7, %v4122_v14  ;;  %v4160_v24 = vmul.f32 %v8489_v43, %v4122_v14  ;;  %v4161_v46 = vmul.f32 %v8490_v49, %v4122_v14  ;;  %v4162_v5 = vmul.f32 %v8491_v3, %v4122_v14 }
 0x58d   :  { %v8492_v1 = vsub.f32 %v7944_v13, %v7995_v59  ;;  %v4164_v37 = vmul.f32 %v4143_v23, %v4122_v14  ;;  %v8493_v52 = vsub.f32 %v7824_v27, %v7995_v59  ;;  %v4167_v42 = vmul.f32 %v8170_v34, %v4144_v18 }
 0x58e   :  { %v4168_v10 = vmul.f32 %v8170_v34, %v4145_v47  ;;  %v4169_v6 = vmul.f32 %v8170_v34, %v4146_v16  ;;  %v4170_v13 = vmul.f32 %v8170_v34, %v4147_v4  ;;  %v4171_v48 = vmul.f32 %v8170_v34, %v4148_v54 }
 0x58f   :  { %v4163_v50 = vmul.f32 %v8492_v1, %v4122_v14  ;;  %v4159_v8 = vmul.f32 %v8493_v52, %v4122_v14  ;;  %v4172_v23 = vmul.f32 %v8170_v34, %v4149_v62  ;;  %v4173_v27 = vmul.f32 %v8170_v34, %v4150_v31 }
 0x590   :  { %v4174_v59 = vmul.f32 %v8170_v34, %v4151_v9  ;;  %v4175_v14 = vmul.f32 %v8170_v34, %v4152_v36  ;;  %v4176_v18 = vmul.f32 %v8170_v34, %v4153_v53  ;;  %v4183_v47 = vmul.f32 %v8170_v34, %v4160_v24 }
 0x591   :  { %v4184_v16 = vmul.f32 %v8170_v34, %v4161_v46  ;;  %v4185_v11 = vmul.f32 %v8170_v34, %v4162_v5  ;;  %v4186_v4 = vmul.f32 %v8170_v34, %v4163_v50  ;;  %v4187_v54 = vmul.f32 %v8170_v34, %v4164_v37 }
 0x592   :  { %v4177_v62 = vmul.f32 %v8170_v34, %v4154_v58  ;;  %v4190_v31 = vadd.f32 %v8217_v19, %v4167_v42  ;;  %v4191_v9 = vadd.f32 %v8217_v19, %v4168_v10  ;;  %v4192_v36 = vadd.f32 %v8217_v19, %v4169_v6 }
 0x593   :  { %v4178_v53 = vmul.f32 %v8170_v34, %v4155_v32  ;;  %v4179_v63 = vmul.f32 %v8170_v34, %v4156_v40  ;;  %v4180_v26 = vmul.f32 %v8170_v34, %v4157_v56  ;;  %v4193_v15 = vadd.f32 %v8217_v19, %v4170_v13 }
 0x594   :  { %v4181_v7 = vmul.f32 %v8170_v34, %v4158_v61  ;;  %v4194_v43 = vadd.f32 %v8217_v19, %v4171_v48  ;;  %v4195_v58 = vadd.f32 %v8217_v19, %v4172_v23  ;;  %v4206_v24 = vadd.f32 %v8217_v19, %v4183_v47 }
 0x595   :  { %v4207_v49 = vadd.f32 %v8217_v19, %v4184_v16  ;;  %v4208_v46 = vadd.f32 %v8217_v19, %v4185_v11  ;;  %v4209_v32 = vadd.f32 %v8217_v19, %v4186_v4  ;;  %v4210_v40 = vadd.f32 %v8217_v19, %v4187_v54 }
 0x596   :  { %v4196_v56 = vadd.f32 %v8217_v19, %v4173_v27  ;;  %v4211_v3 = vadd.f32 %v4190_v31, %v8097_v30  ;;  %v4212_v61 = vadd.f32 %v4191_v9, %v8100_v33  ;;  %v4213_v5 = vadd.f32 %v4192_v36, %v8103_v21 }
 0x597   :  { %v4197_v1 = vadd.f32 %v8217_v19, %v4174_v59  ;;  %v4198_v50 = vadd.f32 %v8217_v19, %v4175_v14  ;;  %v4199_v37 = vadd.f32 %v8217_v19, %v4176_v18  ;;  %v4214_v52 = vadd.f32 %v4193_v15, %v8106_v2 }
 0x598   :  { %v4200_v42 = vadd.f32 %v8217_v19, %v4177_v62  ;;  %v4215_v10 = vadd.f32 %v4194_v43, %v8111_v38  ;;  %v4216_v6 = vadd.f32 %v4195_v58, %v8114_v28  ;;  %v8259_v30 = vadd.f32 %v4206_v24, %v8129_v55 }
 0x599   :  { %v8262_v33 = vadd.f32 %v4207_v49, %v8132_v60  ;;  %v8265_v21 = vadd.f32 %v4208_v46, %v8135_v25  ;;  %v8268_v13 = vadd.f32 %v4209_v32, %v8138_v39  ;;  %v8271_v2 = vadd.f32 %v4210_v40, %v8141_v45 }
 0x59a   :  { %v4217_v48 = vadd.f32 %v4196_v56, %v8117_v35  ;;  %v4232_v38 = vmax.f32 %v4211_v3, 0.0  ;;  %v4233_v23 = vmax.f32 %v4212_v61, 0.0  ;;  %v4234_v28 = vmax.f32 %v4213_v5, 0.0 }
 0x59b   :  { %v4182_v55 = vmul.f32 %v8170_v34, %v4159_v8  ;;  %v4201_v27 = vadd.f32 %v8217_v19, %v4178_v53  ;;  %v4218_v60 = vadd.f32 %v4197_v1, %v8120_v57  ;;  %v4235_v59 = vmax.f32 %v4214_v52, 0.0 }
 0x59c   :  { %v3821_v25 = vadd.f32 %v8084_v20, %v8079_v29  ;;  %v4202_v39 = vadd.f32 %v8217_v19, %v4179_v63  ;;  %v4219_v45 = vadd.f32 %v4198_v50, %v8123_v44  ;;  %v4236_v14 = vmax.f32 %v4215_v10, 0.0  ;;  %4253 = vst [vmem:[%s8369_s6] sm:$0xff] %v4232_v38 }
 0x59d   :  { %v3822_v35 = vadd.f32 %v8084_v20, %v8086_v12  ;;  %v4203_v34 = vadd.f32 %v8217_v19, %v4180_v26  ;;  %v4220_v57 = vadd.f32 %v4199_v37, %v8126_v17  ;;  %v4237_v8 = vmax.f32 %v4216_v6, 0.0  ;;  %4254 = vst [vmem:[%s8369_s6 + $0x8] sm:$0xff] %v4233_v23 }
 0x59e   :  { %v3823_v29 = vadd.f32 %v8084_v20, %v8088_v41  ;;  %v4204_v44 = vadd.f32 %v8217_v19, %v4181_v7  ;;  %v4221_v18 = vadd.f32 %v4200_v42, %v3821_v25  ;;  %v4238_v47 = vmax.f32 %v4217_v48, 0.0  ;;  %4255 = vst [vmem:[%s8369_s6 + $0x10] sm:$0xff] %v4234_v28 }
 0x59f   :  { %v3824_v12 = vadd.f32 %v8084_v20, %v8090_v0  ;;  %v4205_v17 = vadd.f32 %v8217_v19, %v4182_v55  ;;  %v4222_v16 = vadd.f32 %v4201_v27, %v3822_v35  ;;  %v4239_v11 = vmax.f32 %v4218_v60, 0.0  ;;  %4256 = vst [vmem:[%s8369_s6 + $0x18] sm:$0xff] %v4235_v59 }
 0x5a0   :  { %v3825_v41 = vadd.f32 %v8084_v20, %v8092_v51  ;;  %v4223_v4 = vadd.f32 %v4202_v39, %v3823_v29  ;;  %v4240_v54 = vmax.f32 %v4219_v45, 0.0  ;;  %4257 = vst [vmem:[%s8369_s6 + $0x20] sm:$0xff] %v4236_v14  ;;  %v3826_v0 = vadd.f32 %v8084_v20, %v8094_v22 }
 0x5a1   :  { %v4224_v62 = vadd.f32 %v4203_v34, %v3824_v12  ;;  %v4241_v19 = vmax.f32 %v4220_v57, 0.0  ;;  %4258 = vst [vmem:[%s8369_s6 + $0x28] sm:$0xff] %v4237_v8  ;;  %v4242_v9 = vmax.f32 %v4221_v18, 0.0  ;;  %v4243_v36 = vmax.f32 %v4222_v16, 0.0 }
 0x5a2   :  { %v4225_v31 = vadd.f32 %v4204_v44, %v3825_v41  ;;  %4259 = vst [vmem:[%s8369_s6 + $0x30] sm:$0xff] %v4238_v47  ;;  %v4226_v51 = vadd.f32 %v4205_v17, %v3826_v0  ;;  %v4244_v53 = vmax.f32 %v4223_v4, 0.0  ;;  %v4248_v26 = vmax.f32 %v8259_v30, 0.0 }
 0x5a3   :  { %4260 = vst [vmem:[%s8369_s6 + $0x38] sm:$0xff] %v4239_v11  ;;  %v4245_v20 = vmax.f32 %v4224_v62, 0.0  ;;  %v4249_v15 = vmax.f32 %v8262_v33, 0.0  ;;  %v4250_v7 = vmax.f32 %v8265_v21, 0.0  ;;  %v4251_v43 = vmax.f32 %v8268_v13, 0.0 }
 0x5a4   :  { %4261 = vst [vmem:[%s8369_s6 + $0x40] sm:$0xff] %v4240_v54  ;;  %v4246_v22 = vmax.f32 %v4225_v31, 0.0  ;;  %v4247_v63 = vmax.f32 %v4226_v51, 0.0  ;;  %v4252_v58 = vmax.f32 %v8271_v2, 0.0 }
 0x5a5   :  { %4262 = vst [vmem:[%s8369_s6 + $0x48] sm:$0xff] %v4241_v19 }
 0x5a6   :  { %4263 = vst [vmem:[%s8369_s6 + $0x50] sm:$0xff] %v4242_v9 }
 0x5a7   :  { %4264 = vst [vmem:[%s8369_s6 + $0x58] sm:$0xff] %v4243_v36 }
 0x5a8   :  { %4265 = vst [vmem:[%s8369_s6 + $0x60] sm:$0xff] %v4244_v53 }
 0x5a9   :  { %4266 = vst [vmem:[%s8369_s6 + $0x68] sm:$0xff] %v4245_v20 }
 0x5aa   :  { %4267 = vst [vmem:[%s8369_s6 + $0x70] sm:$0xff] %v4246_v22 }
 0x5ab   :  { %4268 = vst [vmem:[%s8369_s6 + $0x78] sm:$0xff] %v4247_v63 }
 0x5ac   :  { %4269 = vst [vmem:[%s8369_s6 + $0x80] sm:$0xff] %v4248_v26 }
 0x5ad   :  { %4270 = vst [vmem:[%s8369_s6 + $0x88] sm:$0xff] %v4249_v15 }
 0x5ae   :  { %4271 = vst [vmem:[%s8369_s6 + $0x90] sm:$0xff] %v4250_v7 }
 0x5af   :  { %4272 = vst [vmem:[%s8369_s6 + $0x98] sm:$0xff] %v4251_v43 }
 0x5b0   :  { %4273 = vst [vmem:[%s8369_s6 + $0xa0] sm:$0x3] %v4252_v58 }

</bundles_post_ra>
